<compile_context>
chip_gen: v5e
topology: v5e:2x2
jax: 0.10.0
libtpu: 0.0.40
codegen_flags: <defaults>
</compile_context>

<pallas_src>
import jax
import jax.numpy as jnp
from jax.experimental import pallas as pl
from jax.experimental.pallas import tpu as pltpu

NUM_CLASSES = 4
BN_EPS = 1e-5
IN_DIM = 1000
PAD_IN = 1024      # 1000 -> 1024 (lane-aligned contraction dim)
PAD_OUT = 128      # 4 -> 128 (lane-dense output slab, unmasked stores)


def head_kernel(x_ref, f_ref,
                w1_ref, s1_ref, t1_ref,
                w2_ref, s2_ref, t2_ref,
                wa1_ref, sa1_ref, ta1_ref,
                wa2_ref, sa2_ref, ta2_ref,
                wcx_ref, wcf_ref, sc_ref, tc_ref,
                w3_ref, s3_ref, t3_ref,
                w4_ref, b4_ref,
                out_ref):
    """Fused MLP head: (linear -> folded-BN affine -> ReLU) x5, concat-as-split, final linear."""
    x = x_ref[...]            # [TB, 1024] bf16 (streamed per grid step)
    f = f_ref[...]            # [TB, 512]  bf16 (streamed per grid step)

    def lin_bn_relu(h, w_ref, s_ref, t_ref):
        # bf16 x bf16 matmul on the MXU, f32 accumulation; affine + ReLU + bf16 pack
        # fused on the VPU (activations stay bf16 between layers).
        z = jnp.dot(h, w_ref[...], preferred_element_type=jnp.float32)
        return jnp.maximum(z * s_ref[...] + t_ref[...], 0.0).astype(jnp.bfloat16)

    # image branch: 1024(pad) -> 512 -> 256
    h = lin_bn_relu(x, w1_ref, s1_ref, t1_ref)
    h = lin_bn_relu(h, w2_ref, s2_ref, t2_ref)

    # tabular branch: 512 -> 256 -> 128
    g = lin_bn_relu(f, wa1_ref, sa1_ref, ta1_ref)
    g = lin_bn_relu(g, wa2_ref, sa2_ref, ta2_ref)

    # torch.cat((h, g), dim=1) @ W_comb  ==  h @ W_comb[:256] + g @ W_comb[256:]
    zc = (jnp.dot(h, wcx_ref[...], preferred_element_type=jnp.float32)
          + jnp.dot(g, wcf_ref[...], preferred_element_type=jnp.float32))
    c = jnp.maximum(zc * sc_ref[...] + tc_ref[...], 0.0).astype(jnp.bfloat16)

    # 256 -> 128
    h3 = lin_bn_relu(c, w3_ref, s3_ref, t3_ref)

    # final classifier 128 -> 128(padded from 4); no BN/ReLU; lane-dense unmasked f32 store.
    out_ref[...] = (jnp.dot(h3, w4_ref[...], preferred_element_type=jnp.float32)
                    + b4_ref[...])


# ----------------------------- parameter construction -----------------------------

def _linear_init(key, fan_in, fan_out):
    """PyTorch nn.Linear default init: U(-1/sqrt(fan_in), 1/sqrt(fan_in))."""
    kw, kb = jax.random.split(key)
    bound = 1.0 / jnp.sqrt(jnp.float32(fan_in))
    w = jax.random.uniform(kw, (fan_in, fan_out), jnp.float32, -bound, bound)
    b = jax.random.uniform(kb, (fan_out,), jnp.float32, -bound, bound)
    return w, b


def _bn_init(key, n):
    """Deterministic (but non-trivial) eval-mode BatchNorm1d params."""
    k1, k2, k3, k4 = jax.random.split(key, 4)
    gamma = 1.0 + 0.1 * jax.random.normal(k1, (n,), jnp.float32)
    beta = 0.1 * jax.random.normal(k2, (n,), jnp.float32)
    running_mean = 0.1 * jax.random.normal(k3, (n,), jnp.float32)
    running_var = 1.0 + 0.1 * jax.random.uniform(k4, (n,), jnp.float32)
    return gamma, beta, running_mean, running_var


def _fold_bn(b, gamma, beta, mean, var):
    """Fold linear bias + eval-mode BN into (scale, shift) applied after the matmul."""
    scale = gamma / jnp.sqrt(var + BN_EPS)
    shift = (b - mean) * scale + beta
    return scale.reshape(1, -1), shift.reshape(1, -1)


def make_params(key):
    keys = jax.random.split(key, 16)
    p = {}

    def store_w(name, w):
        p[name] = w.astype(jnp.bfloat16)          # weights travel as bf16 (MXU-native)

    w1, b1 = _linear_init(keys[0], IN_DIM, 512)
    g1, be1, m1, v1 = _bn_init(keys[1], 512)
    w1p = jnp.zeros((PAD_IN, 512), jnp.float32).at[:IN_DIM, :].set(w1)  # pad K 1000->1024
    store_w("w1", w1p)
    p["s1"], p["t1"] = _fold_bn(b1, g1, be1, m1, v1)

    w2, b2 = _linear_init(keys[2], 512, 256)
    g2, be2, m2, v2 = _bn_init(keys[3], 256)
    store_w("w2", w2)
    p["s2"], p["t2"] = _fold_bn(b2, g2, be2, m2, v2)

    wa1, ba1 = _linear_init(keys[4], 512, 256)
    ga1, bea1, ma1, va1 = _bn_init(keys[5], 256)
    store_w("wa1", wa1)
    p["sa1"], p["ta1"] = _fold_bn(ba1, ga1, bea1, ma1, va1)

    wa2, ba2 = _linear_init(keys[6], 256, 128)
    ga2, bea2, ma2, va2 = _bn_init(keys[7], 128)
    store_w("wa2", wa2)
    p["sa2"], p["ta2"] = _fold_bn(ba2, ga2, bea2, ma2, va2)

    wc, bc = _linear_init(keys[8], 384, 256)
    gc, bec, mc, vc = _bn_init(keys[9], 256)
    store_w("wcx", wc[:256, :])                   # image-branch half of concat weight
    store_w("wcf", wc[256:, :])                   # tabular-branch half
    p["sc"], p["tc"] = _fold_bn(bc, gc, bec, mc, vc)

    w3, b3 = _linear_init(keys[10], 256, 128)
    g3, be3, m3, v3 = _bn_init(keys[11], 128)
    store_w("w3", w3)
    p["s3"], p["t3"] = _fold_bn(b3, g3, be3, m3, v3)

    w4, b4 = _linear_init(keys[12], 128, NUM_CLASSES)
    w4p = jnp.zeros((128, PAD_OUT), jnp.float32).at[:, :NUM_CLASSES].set(w4)   # pad N 4->128
    b4p = jnp.zeros((1, PAD_OUT), jnp.float32).at[0, :NUM_CLASSES].set(b4)
    store_w("w4", w4p)
    p["b4"] = b4p
    return p


# ----------------------------------- wrapper -----------------------------------

def _round_up(n, m):
    return (n + m - 1) // m * m


def _pick_tb(B):
    """Batch tile selection.

    - split the batch across v7x's two TensorCores whenever B >= ~2 tiles (cdiv(B, 2)),
    - keep TB a multiple of 128 for large B (full MXU M-dim, v5e-friendly),
    - cap at 512 (halves per-grid-step overhead on v6e once inputs are bf16),
    - small B: one 16-row tile (bf16 sublane-pack friendly).
    """
    half = -(-B // 2)                      # cdiv(B, 2)
    if half >= 128:
        tb = _round_up(half, 128)
    else:
        tb = _round_up(max(half, 1), 16)
    return min(tb, 512)


def simple_cnn_head(x, features, p):
    """Run the fused head kernel. x: [B,1000], features: [B,512] -> [B,4] f32."""
    B = x.shape[0]
    TB = _pick_tb(B)
    B_pad = _round_up(B, TB)

    # Fused cast+pad (single op per input; no zeros+scatter HBM round trip).
    # Activations travel as bf16 -> input DMA per grid step is halved vs f32.
    x_pad = jnp.pad(x.astype(jnp.bfloat16),
                    ((0, B_pad - B), (0, PAD_IN - IN_DIM)))
    f_pad = jnp.pad(features.astype(jnp.bfloat16),
                    ((0, B_pad - B), (0, 0)))

    args = (x_pad, f_pad,
            p["w1"], p["s1"], p["t1"],
            p["w2"], p["s2"], p["t2"],
            p["wa1"], p["sa1"], p["ta1"],
            p["wa2"], p["sa2"], p["ta2"],
            p["wcx"], p["wcf"], p["sc"], p["tc"],
            p["w3"], p["s3"], p["t3"],
            p["w4"], p["b4"])

    def act_spec(cols):
        # Streamed activation tile: new batch block per grid step.
        return pl.BlockSpec((TB, cols), lambda i: (i, 0))

    def resident_spec(a):
        # Whole-array block, constant index -> stays resident in VMEM across the grid.
        return pl.BlockSpec(a.shape, lambda i: (0, 0))

    in_specs = [act_spec(PAD_IN), act_spec(512)] + [resident_spec(a) for a in args[2:]]
    out_spec = pl.BlockSpec((TB, PAD_OUT), lambda i: (i, 0))

    out = pl.pallas_call(
        head_kernel,
        out_shape=jax.ShapeDtypeStruct((B_pad, PAD_OUT), jnp.float32),
        grid=(B_pad // TB,),
        in_specs=in_specs,
        out_specs=out_spec,
        compiler_params=pltpu.CompilerParams(
            dimension_semantics=("parallel",)),   # batch axis splits across v7x's 2 TCs
    )(*args)
    return out[:B, :NUM_CLASSES]


def reference_head(x, features, p):
    """Pure-JAX reference (same bf16 weights / activation casts) for correctness checking."""
    xp = jnp.pad(x.astype(jnp.bfloat16), ((0, 0), (0, PAD_IN - IN_DIM)))
    f = features.astype(jnp.bfloat16)

    def lbr(h, w, s, t):
        z = jnp.dot(h, w, preferred_element_type=jnp.float32)
        return jnp.maximum(z * s + t, 0.0).astype(jnp.bfloat16)

    h = lbr(xp, p["w1"], p["s1"], p["t1"])
    h = lbr(h, p["w2"], p["s2"], p["t2"])
    g = lbr(f, p["wa1"], p["sa1"], p["ta1"])
    g = lbr(g, p["wa2"], p["sa2"], p["ta2"])
    zc = (jnp.dot(h, p["wcx"], preferred_element_type=jnp.float32)
          + jnp.dot(g, p["wcf"], preferred_element_type=jnp.float32))
    c = jnp.maximum(zc * p["sc"] + p["tc"], 0.0).astype(jnp.bfloat16)
    h3 = lbr(c, p["w3"], p["s3"], p["t3"])
    out = (jnp.dot(h3, p["w4"], preferred_element_type=jnp.float32) + p["b4"])
    return out[:, :NUM_CLASSES]


if __name__ == "__main__":
    key = jax.random.PRNGKey(0)
    k_params, k_x, k_f = jax.random.split(key, 3)

    B = 8
    params = make_params(k_params)
    # x: stands in for the 1000-d output of the timm backbone (see TODO above).
    x = jax.random.normal(k_x, (B, IN_DIM), jnp.float32)
    features = jax.random.normal(k_f, (B, 512), jnp.float32)

    out = simple_cnn_head(x, features, params)
    out = jax.block_until_ready(out)

    ref = reference_head(x, features, params)
    assert out.shape == (B, NUM_CLASSES)
    assert jnp.allclose(out, ref, atol=1e-3, rtol=1e-3), "mismatch vs JAX reference"
    print("KERNEL_OK")
</pallas_src>

<mosaic_0001>
module attributes {stable_mosaic.version = 11 : i64} {
  func.func @head_kernel(%arg0: i32, %arg1: memref<16x1024xbf16, #tpu.memory_space<vmem>>, %arg2: memref<16x512xbf16, #tpu.memory_space<vmem>>, %arg3: memref<1024x512xbf16, #tpu.memory_space<vmem>>, %arg4: memref<1x512xf32, #tpu.memory_space<vmem>>, %arg5: memref<1x512xf32, #tpu.memory_space<vmem>>, %arg6: memref<512x256xbf16, #tpu.memory_space<vmem>>, %arg7: memref<1x256xf32, #tpu.memory_space<vmem>>, %arg8: memref<1x256xf32, #tpu.memory_space<vmem>>, %arg9: memref<512x256xbf16, #tpu.memory_space<vmem>>, %arg10: memref<1x256xf32, #tpu.memory_space<vmem>>, %arg11: memref<1x256xf32, #tpu.memory_space<vmem>>, %arg12: memref<256x128xbf16, #tpu.memory_space<vmem>>, %arg13: memref<1x128xf32, #tpu.memory_space<vmem>>, %arg14: memref<1x128xf32, #tpu.memory_space<vmem>>, %arg15: memref<256x256xbf16, #tpu.memory_space<vmem>>, %arg16: memref<128x256xbf16, #tpu.memory_space<vmem>>, %arg17: memref<1x256xf32, #tpu.memory_space<vmem>>, %arg18: memref<1x256xf32, #tpu.memory_space<vmem>>, %arg19: memref<256x128xbf16, #tpu.memory_space<vmem>>, %arg20: memref<1x128xf32, #tpu.memory_space<vmem>>, %arg21: memref<1x128xf32, #tpu.memory_space<vmem>>, %arg22: memref<128x128xbf16, #tpu.memory_space<vmem>>, %arg23: memref<1x128xf32, #tpu.memory_space<vmem>>, %arg24: memref<16x128xf32, #tpu.memory_space<vmem>>) attributes {dimension_semantics = [#tpu.dimension_semantics<parallel>], iteration_bounds = array<i64: 1>, scalar_prefetch = 0 : i64, scratch_operands = 0 : i64, tpu.core_type = #tpu.core_type<tc>, window_params = [{transform_indices = @transform_0, window_bounds = array<i64: 16, 1024>}, {transform_indices = @transform_1, window_bounds = array<i64: 16, 512>}, {pipeline_mode = #tpu.pipeline_mode<synchronous>, transform_indices = @transform_2, window_bounds = array<i64: 1024, 512>}, {pipeline_mode = #tpu.pipeline_mode<synchronous>, transform_indices = @transform_3, window_bounds = array<i64: 1, 512>}, {pipeline_mode = #tpu.pipeline_mode<synchronous>, transform_indices = @transform_4, window_bounds = array<i64: 1, 512>}, {pipeline_mode = #tpu.pipeline_mode<synchronous>, transform_indices = @transform_5, window_bounds = array<i64: 512, 256>}, {pipeline_mode = #tpu.pipeline_mode<synchronous>, transform_indices = @transform_6, window_bounds = array<i64: 1, 256>}, {pipeline_mode = #tpu.pipeline_mode<synchronous>, transform_indices = @transform_7, window_bounds = array<i64: 1, 256>}, {pipeline_mode = #tpu.pipeline_mode<synchronous>, transform_indices = @transform_8, window_bounds = array<i64: 512, 256>}, {pipeline_mode = #tpu.pipeline_mode<synchronous>, transform_indices = @transform_9, window_bounds = array<i64: 1, 256>}, {pipeline_mode = #tpu.pipeline_mode<synchronous>, transform_indices = @transform_10, window_bounds = array<i64: 1, 256>}, {pipeline_mode = #tpu.pipeline_mode<synchronous>, transform_indices = @transform_11, window_bounds = array<i64: 256, 128>}, {pipeline_mode = #tpu.pipeline_mode<synchronous>, transform_indices = @transform_12, window_bounds = array<i64: 1, 128>}, {pipeline_mode = #tpu.pipeline_mode<synchronous>, transform_indices = @transform_13, window_bounds = array<i64: 1, 128>}, {pipeline_mode = #tpu.pipeline_mode<synchronous>, transform_indices = @transform_14, window_bounds = array<i64: 256, 256>}, {pipeline_mode = #tpu.pipeline_mode<synchronous>, transform_indices = @transform_15, window_bounds = array<i64: 128, 256>}, {pipeline_mode = #tpu.pipeline_mode<synchronous>, transform_indices = @transform_16, window_bounds = array<i64: 1, 256>}, {pipeline_mode = #tpu.pipeline_mode<synchronous>, transform_indices = @transform_17, window_bounds = array<i64: 1, 256>}, {pipeline_mode = #tpu.pipeline_mode<synchronous>, transform_indices = @transform_18, window_bounds = array<i64: 256, 128>}, {pipeline_mode = #tpu.pipeline_mode<synchronous>, transform_indices = @transform_19, window_bounds = array<i64: 1, 128>}, {pipeline_mode = #tpu.pipeline_mode<synchronous>, transform_indices = @transform_20, window_bounds = array<i64: 1, 128>}, {pipeline_mode = #tpu.pipeline_mode<synchronous>, transform_indices = @transform_21, window_bounds = array<i64: 128, 128>}, {pipeline_mode = #tpu.pipeline_mode<synchronous>, transform_indices = @transform_22, window_bounds = array<i64: 1, 128>}, {transform_indices = @transform_23, window_bounds = array<i64: 16, 128>}]} {
    %c0 = arith.constant 0 : index
    %c0_0 = arith.constant 0 : index
    %0 = vector.load %arg1[%c0, %c0_0] : memref<16x1024xbf16, #tpu.memory_space<vmem>>, vector<16x1024xbf16>
    %c0_1 = arith.constant 0 : index
    %c0_2 = arith.constant 0 : index
    %1 = vector.load %arg2[%c0_1, %c0_2] : memref<16x512xbf16, #tpu.memory_space<vmem>>, vector<16x512xbf16>
    %c0_3 = arith.constant 0 : index
    %c0_4 = arith.constant 0 : index
    %2 = vector.load %arg3[%c0_3, %c0_4] : memref<1024x512xbf16, #tpu.memory_space<vmem>>, vector<1024x512xbf16>
    %cst = arith.constant dense<0.000000e+00> : vector<16x512xf32>
    %3 = tpu.matmul %0, %2, %cst {dimension_numbers = #tpu.dot_dimension_numbers<[1], [0], [0], [1], [0, 0, 1, 1], [], []>} : vector<16x1024xbf16>, vector<1024x512xbf16>, vector<16x512xf32> -> vector<16x512xf32>
    %c0_5 = arith.constant 0 : index
    %c0_6 = arith.constant 0 : index
    %4 = vector.load %arg4[%c0_5, %c0_6] : memref<1x512xf32, #tpu.memory_space<vmem>>, vector<1x512xf32>
    %5 = vector.broadcast %4 : vector<1x512xf32> to vector<16x512xf32>
    %6 = arith.mulf %3, %5 : vector<16x512xf32>
    %c0_7 = arith.constant 0 : index
    %c0_8 = arith.constant 0 : index
    %7 = vector.load %arg5[%c0_7, %c0_8] : memref<1x512xf32, #tpu.memory_space<vmem>>, vector<1x512xf32>
    %8 = vector.broadcast %7 : vector<1x512xf32> to vector<16x512xf32>
    %9 = arith.addf %6, %8 : vector<16x512xf32>
    %cst_9 = arith.constant 0.000000e+00 : f32
    %10 = vector.broadcast %cst_9 : f32 to vector<16x512xf32>
    %11 = arith.maximumf %9, %10 : vector<16x512xf32>
    %12 = arith.truncf %11 : vector<16x512xf32> to vector<16x512xbf16>
    %c0_10 = arith.constant 0 : index
    %c0_11 = arith.constant 0 : index
    %13 = vector.load %arg6[%c0_10, %c0_11] : memref<512x256xbf16, #tpu.memory_space<vmem>>, vector<512x256xbf16>
    %cst_12 = arith.constant dense<0.000000e+00> : vector<16x256xf32>
    %14 = tpu.matmul %12, %13, %cst_12 {dimension_numbers = #tpu.dot_dimension_numbers<[1], [0], [0], [1], [0, 0, 1, 1], [], []>} : vector<16x512xbf16>, vector<512x256xbf16>, vector<16x256xf32> -> vector<16x256xf32>
    %c0_13 = arith.constant 0 : index
    %c0_14 = arith.constant 0 : index
    %15 = vector.load %arg7[%c0_13, %c0_14] : memref<1x256xf32, #tpu.memory_space<vmem>>, vector<1x256xf32>
    %16 = vector.broadcast %15 : vector<1x256xf32> to vector<16x256xf32>
    %17 = arith.mulf %14, %16 : vector<16x256xf32>
    %c0_15 = arith.constant 0 : index
    %c0_16 = arith.constant 0 : index
    %18 = vector.load %arg8[%c0_15, %c0_16] : memref<1x256xf32, #tpu.memory_space<vmem>>, vector<1x256xf32>
    %19 = vector.broadcast %18 : vector<1x256xf32> to vector<16x256xf32>
    %20 = arith.addf %17, %19 : vector<16x256xf32>
    %cst_17 = arith.constant 0.000000e+00 : f32
    %21 = vector.broadcast %cst_17 : f32 to vector<16x256xf32>
    %22 = arith.maximumf %20, %21 : vector<16x256xf32>
    %23 = arith.truncf %22 : vector<16x256xf32> to vector<16x256xbf16>
    %c0_18 = arith.constant 0 : index
    %c0_19 = arith.constant 0 : index
    %24 = vector.load %arg9[%c0_18, %c0_19] : memref<512x256xbf16, #tpu.memory_space<vmem>>, vector<512x256xbf16>
    %cst_20 = arith.constant dense<0.000000e+00> : vector<16x256xf32>
    %25 = tpu.matmul %1, %24, %cst_20 {dimension_numbers = #tpu.dot_dimension_numbers<[1], [0], [0], [1], [0, 0, 1, 1], [], []>} : vector<16x512xbf16>, vector<512x256xbf16>, vector<16x256xf32> -> vector<16x256xf32>
    %c0_21 = arith.constant 0 : index
    %c0_22 = arith.constant 0 : index
    %26 = vector.load %arg10[%c0_21, %c0_22] : memref<1x256xf32, #tpu.memory_space<vmem>>, vector<1x256xf32>
    %27 = vector.broadcast %26 : vector<1x256xf32> to vector<16x256xf32>
    %28 = arith.mulf %25, %27 : vector<16x256xf32>
    %c0_23 = arith.constant 0 : index
    %c0_24 = arith.constant 0 : index
    %29 = vector.load %arg11[%c0_23, %c0_24] : memref<1x256xf32, #tpu.memory_space<vmem>>, vector<1x256xf32>
    %30 = vector.broadcast %29 : vector<1x256xf32> to vector<16x256xf32>
    %31 = arith.addf %28, %30 : vector<16x256xf32>
    %cst_25 = arith.constant 0.000000e+00 : f32
    %32 = vector.broadcast %cst_25 : f32 to vector<16x256xf32>
    %33 = arith.maximumf %31, %32 : vector<16x256xf32>
    %34 = arith.truncf %33 : vector<16x256xf32> to vector<16x256xbf16>
    %c0_26 = arith.constant 0 : index
    %c0_27 = arith.constant 0 : index
    %35 = vector.load %arg12[%c0_26, %c0_27] : memref<256x128xbf16, #tpu.memory_space<vmem>>, vector<256x128xbf16>
    %cst_28 = arith.constant dense<0.000000e+00> : vector<16x128xf32>
    %36 = tpu.matmul %34, %35, %cst_28 {dimension_numbers = #tpu.dot_dimension_numbers<[1], [0], [0], [1], [0, 0, 1, 1], [], []>} : vector<16x256xbf16>, vector<256x128xbf16>, vector<16x128xf32> -> vector<16x128xf32>
    %c0_29 = arith.constant 0 : index
    %c0_30 = arith.constant 0 : index
    %37 = vector.load %arg13[%c0_29, %c0_30] : memref<1x128xf32, #tpu.memory_space<vmem>>, vector<1x128xf32>
    %38 = vector.broadcast %37 : vector<1x128xf32> to vector<16x128xf32>
    %39 = arith.mulf %36, %38 : vector<16x128xf32>
    %c0_31 = arith.constant 0 : index
    %c0_32 = arith.constant 0 : index
    %40 = vector.load %arg14[%c0_31, %c0_32] : memref<1x128xf32, #tpu.memory_space<vmem>>, vector<1x128xf32>
    %41 = vector.broadcast %40 : vector<1x128xf32> to vector<16x128xf32>
    %42 = arith.addf %39, %41 : vector<16x128xf32>
    %cst_33 = arith.constant 0.000000e+00 : f32
    %43 = vector.broadcast %cst_33 : f32 to vector<16x128xf32>
    %44 = arith.maximumf %42, %43 : vector<16x128xf32>
    %45 = arith.truncf %44 : vector<16x128xf32> to vector<16x128xbf16>
    %c0_34 = arith.constant 0 : index
    %c0_35 = arith.constant 0 : index
    %46 = vector.load %arg15[%c0_34, %c0_35] : memref<256x256xbf16, #tpu.memory_space<vmem>>, vector<256x256xbf16>
    %cst_36 = arith.constant dense<0.000000e+00> : vector<16x256xf32>
    %47 = tpu.matmul %23, %46, %cst_36 {dimension_numbers = #tpu.dot_dimension_numbers<[1], [0], [0], [1], [0, 0, 1, 1], [], []>} : vector<16x256xbf16>, vector<256x256xbf16>, vector<16x256xf32> -> vector<16x256xf32>
    %c0_37 = arith.constant 0 : index
    %c0_38 = arith.constant 0 : index
    %48 = vector.load %arg16[%c0_37, %c0_38] : memref<128x256xbf16, #tpu.memory_space<vmem>>, vector<128x256xbf16>
    %cst_39 = arith.constant dense<0.000000e+00> : vector<16x256xf32>
    %49 = tpu.matmul %45, %48, %cst_39 {dimension_numbers = #tpu.dot_dimension_numbers<[1], [0], [0], [1], [0, 0, 1, 1], [], []>} : vector<16x128xbf16>, vector<128x256xbf16>, vector<16x256xf32> -> vector<16x256xf32>
    %50 = arith.addf %47, %49 : vector<16x256xf32>
    %c0_40 = arith.constant 0 : index
    %c0_41 = arith.constant 0 : index
    %51 = vector.load %arg17[%c0_40, %c0_41] : memref<1x256xf32, #tpu.memory_space<vmem>>, vector<1x256xf32>
    %52 = vector.broadcast %51 : vector<1x256xf32> to vector<16x256xf32>
    %53 = arith.mulf %50, %52 : vector<16x256xf32>
    %c0_42 = arith.constant 0 : index
    %c0_43 = arith.constant 0 : index
    %54 = vector.load %arg18[%c0_42, %c0_43] : memref<1x256xf32, #tpu.memory_space<vmem>>, vector<1x256xf32>
    %55 = vector.broadcast %54 : vector<1x256xf32> to vector<16x256xf32>
    %56 = arith.addf %53, %55 : vector<16x256xf32>
    %cst_44 = arith.constant 0.000000e+00 : f32
    %57 = vector.broadcast %cst_44 : f32 to vector<16x256xf32>
    %58 = arith.maximumf %56, %57 : vector<16x256xf32>
    %59 = arith.truncf %58 : vector<16x256xf32> to vector<16x256xbf16>
    %c0_45 = arith.constant 0 : index
    %c0_46 = arith.constant 0 : index
    %60 = vector.load %arg19[%c0_45, %c0_46] : memref<256x128xbf16, #tpu.memory_space<vmem>>, vector<256x128xbf16>
    %cst_47 = arith.constant dense<0.000000e+00> : vector<16x128xf32>
    %61 = tpu.matmul %59, %60, %cst_47 {dimension_numbers = #tpu.dot_dimension_numbers<[1], [0], [0], [1], [0, 0, 1, 1], [], []>} : vector<16x256xbf16>, vector<256x128xbf16>, vector<16x128xf32> -> vector<16x128xf32>
    %c0_48 = arith.constant 0 : index
    %c0_49 = arith.constant 0 : index
    %62 = vector.load %arg20[%c0_48, %c0_49] : memref<1x128xf32, #tpu.memory_space<vmem>>, vector<1x128xf32>
    %63 = vector.broadcast %62 : vector<1x128xf32> to vector<16x128xf32>
    %64 = arith.mulf %61, %63 : vector<16x128xf32>
    %c0_50 = arith.constant 0 : index
    %c0_51 = arith.constant 0 : index
    %65 = vector.load %arg21[%c0_50, %c0_51] : memref<1x128xf32, #tpu.memory_space<vmem>>, vector<1x128xf32>
    %66 = vector.broadcast %65 : vector<1x128xf32> to vector<16x128xf32>
    %67 = arith.addf %64, %66 : vector<16x128xf32>
    %cst_52 = arith.constant 0.000000e+00 : f32
    %68 = vector.broadcast %cst_52 : f32 to vector<16x128xf32>
    %69 = arith.maximumf %67, %68 : vector<16x128xf32>
    %70 = arith.truncf %69 : vector<16x128xf32> to vector<16x128xbf16>
    %c0_53 = arith.constant 0 : index
    %c0_54 = arith.constant 0 : index
    %71 = vector.load %arg22[%c0_53, %c0_54] : memref<128x128xbf16, #tpu.memory_space<vmem>>, vector<128x128xbf16>
    %cst_55 = arith.constant dense<0.000000e+00> : vector<16x128xf32>
    %72 = tpu.matmul %70, %71, %cst_55 {dimension_numbers = #tpu.dot_dimension_numbers<[1], [0], [0], [1], [0, 0, 1, 1], [], []>} : vector<16x128xbf16>, vector<128x128xbf16>, vector<16x128xf32> -> vector<16x128xf32>
    %c0_56 = arith.constant 0 : index
    %c0_57 = arith.constant 0 : index
    %73 = vector.load %arg23[%c0_56, %c0_57] : memref<1x128xf32, #tpu.memory_space<vmem>>, vector<1x128xf32>
    %74 = vector.broadcast %73 : vector<1x128xf32> to vector<16x128xf32>
    %75 = arith.addf %72, %74 : vector<16x128xf32>
    %c0_58 = arith.constant 0 : index
    %c0_59 = arith.constant 0 : index
    %76 = vector.load %arg24[%c0_58, %c0_59] : memref<16x128xf32, #tpu.memory_space<vmem>>, vector<16x128xf32>
    tpu.vector_store %arg24[%c0_58, %c0_59], %75 {strides = array<i32>} : memref<16x128xf32, #tpu.memory_space<vmem>>, vector<16x128xf32>,
    return
  }
  func.func @transform_0(%arg0: i32) -> (i32, i32) {
    %c0_i32 = arith.constant 0 : i32
    %c0_i32_0 = arith.constant 0 : i32
    return %arg0, %c0_i32 : i32, i32
  }
  func.func @transform_1(%arg0: i32) -> (i32, i32) {
    %c0_i32 = arith.constant 0 : i32
    %c0_i32_0 = arith.constant 0 : i32
    return %arg0, %c0_i32 : i32, i32
  }
  func.func @transform_2(%arg0: i32) -> (i32, i32) {
    %c0_i32 = arith.constant 0 : i32
    %c0_i32_0 = arith.constant 0 : i32
    %c0_i32_1 = arith.constant 0 : i32
    return %c0_i32, %c0_i32_0 : i32, i32
  }
  func.func @transform_3(%arg0: i32) -> (i32, i32) {
    %c0_i32 = arith.constant 0 : i32
    %c0_i32_0 = arith.constant 0 : i32
    %c0_i32_1 = arith.constant 0 : i32
    return %c0_i32, %c0_i32_0 : i32, i32
  }
  func.func @transform_4(%arg0: i32) -> (i32, i32) {
    %c0_i32 = arith.constant 0 : i32
    %c0_i32_0 = arith.constant 0 : i32
    %c0_i32_1 = arith.constant 0 : i32
    return %c0_i32, %c0_i32_0 : i32, i32
  }
  func.func @transform_5(%arg0: i32) -> (i32, i32) {
    %c0_i32 = arith.constant 0 : i32
    %c0_i32_0 = arith.constant 0 : i32
    %c0_i32_1 = arith.constant 0 : i32
    return %c0_i32, %c0_i32_0 : i32, i32
  }
  func.func @transform_6(%arg0: i32) -> (i32, i32) {
    %c0_i32 = arith.constant 0 : i32
    %c0_i32_0 = arith.constant 0 : i32
    %c0_i32_1 = arith.constant 0 : i32
    return %c0_i32, %c0_i32_0 : i32, i32
  }
  func.func @transform_7(%arg0: i32) -> (i32, i32) {
    %c0_i32 = arith.constant 0 : i32
    %c0_i32_0 = arith.constant 0 : i32
    %c0_i32_1 = arith.constant 0 : i32
    return %c0_i32, %c0_i32_0 : i32, i32
  }
  func.func @transform_8(%arg0: i32) -> (i32, i32) {
    %c0_i32 = arith.constant 0 : i32
    %c0_i32_0 = arith.constant 0 : i32
    %c0_i32_1 = arith.constant 0 : i32
    return %c0_i32, %c0_i32_0 : i32, i32
  }
  func.func @transform_9(%arg0: i32) -> (i32, i32) {
    %c0_i32 = arith.constant 0 : i32
    %c0_i32_0 = arith.constant 0 : i32
    %c0_i32_1 = arith.constant 0 : i32
    return %c0_i32, %c0_i32_0 : i32, i32
  }
  func.func @transform_10(%arg0: i32) -> (i32, i32) {
    %c0_i32 = arith.constant 0 : i32
    %c0_i32_0 = arith.constant 0 : i32
    %c0_i32_1 = arith.constant 0 : i32
    return %c0_i32, %c0_i32_0 : i32, i32
  }
  func.func @transform_11(%arg0: i32) -> (i32, i32) {
    %c0_i32 = arith.constant 0 : i32
    %c0_i32_0 = arith.constant 0 : i32
    %c0_i32_1 = arith.constant 0 : i32
    return %c0_i32, %c0_i32_0 : i32, i32
  }
  func.func @transform_12(%arg0: i32) -> (i32, i32) {
    %c0_i32 = arith.constant 0 : i32
    %c0_i32_0 = arith.constant 0 : i32
    %c0_i32_1 = arith.constant 0 : i32
    return %c0_i32, %c0_i32_0 : i32, i32
  }
  func.func @transform_13(%arg0: i32) -> (i32, i32) {
    %c0_i32 = arith.constant 0 : i32
    %c0_i32_0 = arith.constant 0 : i32
    %c0_i32_1 = arith.constant 0 : i32
    return %c0_i32, %c0_i32_0 : i32, i32
  }
  func.func @transform_14(%arg0: i32) -> (i32, i32) {
    %c0_i32 = arith.constant 0 : i32
    %c0_i32_0 = arith.constant 0 : i32
    %c0_i32_1 = arith.constant 0 : i32
    return %c0_i32, %c0_i32_0 : i32, i32
  }
  func.func @transform_15(%arg0: i32) -> (i32, i32) {
    %c0_i32 = arith.constant 0 : i32
    %c0_i32_0 = arith.constant 0 : i32
    %c0_i32_1 = arith.constant 0 : i32
    return %c0_i32, %c0_i32_0 : i32, i32
  }
  func.func @transform_16(%arg0: i32) -> (i32, i32) {
    %c0_i32 = arith.constant 0 : i32
    %c0_i32_0 = arith.constant 0 : i32
    %c0_i32_1 = arith.constant 0 : i32
    return %c0_i32, %c0_i32_0 : i32, i32
  }
  func.func @transform_17(%arg0: i32) -> (i32, i32) {
    %c0_i32 = arith.constant 0 : i32
    %c0_i32_0 = arith.constant 0 : i32
    %c0_i32_1 = arith.constant 0 : i32
    return %c0_i32, %c0_i32_0 : i32, i32
  }
  func.func @transform_18(%arg0: i32) -> (i32, i32) {
    %c0_i32 = arith.constant 0 : i32
    %c0_i32_0 = arith.constant 0 : i32
    %c0_i32_1 = arith.constant 0 : i32
    return %c0_i32, %c0_i32_0 : i32, i32
  }
  func.func @transform_19(%arg0: i32) -> (i32, i32) {
    %c0_i32 = arith.constant 0 : i32
    %c0_i32_0 = arith.constant 0 : i32
    %c0_i32_1 = arith.constant 0 : i32
    return %c0_i32, %c0_i32_0 : i32, i32
  }
  func.func @transform_20(%arg0: i32) -> (i32, i32) {
    %c0_i32 = arith.constant 0 : i32
    %c0_i32_0 = arith.constant 0 : i32
    %c0_i32_1 = arith.constant 0 : i32
    return %c0_i32, %c0_i32_0 : i32, i32
  }
  func.func @transform_21(%arg0: i32) -> (i32, i32) {
    %c0_i32 = arith.constant 0 : i32
    %c0_i32_0 = arith.constant 0 : i32
    %c0_i32_1 = arith.constant 0 : i32
    return %c0_i32, %c0_i32_0 : i32, i32
  }
  func.func @transform_22(%arg0: i32) -> (i32, i32) {
    %c0_i32 = arith.constant 0 : i32
    %c0_i32_0 = arith.constant 0 : i32
    %c0_i32_1 = arith.constant 0 : i32
    return %c0_i32, %c0_i32_0 : i32, i32
  }
  func.func @transform_23(%arg0: i32) -> (i32, i32) {
    %c0_i32 = arith.constant 0 : i32
    %c0_i32_0 = arith.constant 0 : i32
    return %arg0, %c0_i32 : i32, i32
  }
}

</mosaic_0001>

<bundles_post_ra>
// kernel: tpu_custom_call.1
= control target key start
LH: loop header
LB: loop body
LE: loop exit
PB: predicated region body
PF: predicated region fallthrough
CT: control target
= control target key end

     0   :  { %s7541_s0 = inlined_call_operand.hbm [shape: bf16[16,1024], index: 0, kind: input, shape index: {}]   ;;  %s7542_s1 = inlined_call_operand.hbm [shape: bf16[16,512], index: 1, kind: input, shape index: {}]   ;;  %s7543_s2 = inlined_call_operand.hbm [shape: bf16[1024,512], index: 2, kind: input, shape index: {}]   ;;  %s7544_s3 = inlined_call_operand.hbm [shape: f32[1,512], index: 3, kind: input, shape index: {}]   ;;  %s7545_s4 = inlined_call_operand.hbm [shape: f32[1,512], index: 4, kind: input, shape index: {}]   ;;  %s7546_s5 = inlined_call_operand.hbm [shape: bf16[512,256], index: 5, kind: input, shape index: {}]   ;;  %s7547_s6 = inlined_call_operand.vmem [shape: f32[1,256], index: 6, kind: input, shape index: {}]   ;;  %s7548_s7 = inlined_call_operand.vmem [shape: f32[1,256], index: 7, kind: input, shape index: {}]   ;;  %s7549_s8 = inlined_call_operand.hbm [shape: bf16[512,256], index: 8, kind: input, shape index: {}]   ;;  %s7550_s9 = inlined_call_operand.vmem [shape: f32[1,256], index: 9, kind: input, shape index: {}]   ;;  %s7551_s10 = inlined_call_operand.vmem [shape: f32[1,256], index: 10, kind: input, shape index: {}]   ;;  %s7552_s11 = inlined_call_operand.hbm [shape: bf16[256,128], index: 11, kind: input, shape index: {}]   ;;  %s7553_s12 = inlined_call_operand.hbm [shape: f32[1,128], index: 12, kind: input, shape index: {}]   ;;  %s7554_s13 = inlined_call_operand.hbm [shape: f32[1,128], index: 13, kind: input, shape index: {}]   ;;  %s7555_s14 = inlined_call_operand.hbm [shape: bf16[256,256], index: 14, kind: input, shape index: {}]   ;;  %s7556_s15 = inlined_call_operand.hbm [shape: bf16[128,256], index: 15, kind: input, shape index: {}]   ;;  %s7557_s16 = inlined_call_operand.vmem [shape: f32[1,256], index: 16, kind: input, shape index: {}]   ;;  %s7558_s17 = inlined_call_operand.vmem [shape: f32[1,256], index: 17, kind: input, shape index: {}]   ;;  %s7559_s18 = inlined_call_operand.hbm [shape: bf16[256,128], index: 18, kind: input, shape index: {}]   ;;  %s7560_s19 = inlined_call_operand.vmem [shape: f32[1,128], index: 19, kind: input, shape index: {}]   ;;  %s7561_s20 = inlined_call_operand.vmem [shape: f32[1,128], index: 20, kind: input, shape index: {}]   ;;  %s7562_s21 = inlined_call_operand.hbm [shape: bf16[128,128], index: 21, kind: input, shape index: {}]   ;;  %s7563_s22 = inlined_call_operand.vmem [shape: f32[1,128], index: 22, kind: input, shape index: {}]   ;;  %s7564_s23 = inlined_call_operand.hbm [shape: f32[16,128], index: 23, kind: output, shape index: {}]  }
   0x1   :  { %7569 = sst [smem:[#allocation35_spill]] %s7541_s0 }
   0x2   :  { %7570 = sst [smem:[#allocation36_spill]] %s7542_s1 }
   0x3   :  { %7571 = sst [smem:[#allocation37_spill]] %s7543_s2 }
   0x4   :  { %7572 = sst [smem:[#allocation38_spill]] %s7544_s3 }
   0x5   :  { %7573 = sst [smem:[#allocation39_spill]] %s7545_s4 }
   0x6   :  { %7574 = sst [smem:[#allocation40_spill]] %s7546_s5 }
   0x7   :  { %7575 = sst [smem:[#allocation41_spill]] %s7547_s6 }
   0x8   :  { %7576 = sst [smem:[#allocation42_spill]] %s7548_s7 }
   0x9   :  { %7577 = sst [smem:[#allocation43_spill]] %s7561_s20 }
   0xa   :  { %7578 = sst [smem:[#allocation44_spill]] %s7563_s22 }
   0xb   :  { %7579 = sst [smem:[#allocation45_spill]] %s7564_s23 }
   0xc   :  { %28 = vsyncpa [#allocation3], 0 }
   0xd   :  { %29 = vsyncpa [#allocation6], 0 }
   0xe   :  { %30 = vsyncpa [#allocation9], 0 }
   0xf   :  { %31 = vsyncpa [#allocation12], 0 }
  0x10   :  { %32 = vsyncpa [#allocation15], 0 }
  0x11   :  { %33 = vsyncpa [#allocation18], 0 }
  0x12   :  { %34 = vsyncpa [#allocation21], 0 }
  0x13   :  { %35 = vsyncpa [#allocation24], 0  ;;  %s7580_s24 = sld [smem:[#allocation36_spill]] }
  0x19   :  { %s54_s25 = sshll.u32 %s7580_s24, 4  ;;  %s55_s25 = int_to_ptr.hbm [resolvable:$true] %s54_s25 }
  0x1a   :  { %36 = vsyncpa [#allocation4], 0  ;;  %s7109_s5 = smov [#allocation5]   ;;  %s7581_s6 = sld [smem:[#allocation38_spill]] }
  0x1b   :  { %s56_s1 = sshll.u32 %s7109_s5, 4  ;;  %s7565_s7 = smov 256   ;;  %s57_s1 = int_to_ptr.vmem [resolvable:$true] %s56_s1 }
  0x1c   :  { %s7566_s28 = smov 16   ;;  %s7112_s29 = smov [#allocation8]  }
  0x1d   :  { %62 = dma.hbm_to_vmem [thread:$0]  %s55_s25, 512, %s57_s1, [#allocation6], %s7565_s7, %s7565_s7, %s7566_s28  }
  0x1e   :  { %s83_s3 = sshll.u32 %s7112_s29, 4  ;;  %s7582_s30 = sld [smem:[#allocation40_spill]]  ;;  %s84_s3 = int_to_ptr.vmem [resolvable:$true] %s83_s3 }
  0x1f   :  { %s7113_s5 = smov [#allocation11]   ;;  %s7114_s22 = smov 128  }
  0x20   :  { %s81_s27 = sshll.u32 %s7581_s6, 4  ;;  %s104_s23 = sshll.u32 %s7113_s5, 4  ;;  %s82_s27 = int_to_ptr.hbm [resolvable:$true] %s81_s27  ;;  %s105_s23 = int_to_ptr.vmem [resolvable:$true] %s104_s23 }
  0x21   :  { %86 = dma.hbm_to_vmem [thread:$0]  %s82_s27, 64, %s84_s3, [#allocation9]  }
  0x22   :  { %s136_s6 = sshll.u32 %s7552_s11, 4  ;;  %s7115_s20 = smov 8   ;;  %s137_s6 = int_to_ptr.hbm [resolvable:$true] %s136_s6 }
  0x23   :  { %s7116_s25 = smov [#allocation14]   ;;  %s7567_s29 = smov 64  }
  0x24   :  { %s102_s24 = sshll.u32 %s7582_s30, 4  ;;  %s138_s1 = sshll.u32 %s7116_s25, 4  ;;  %s103_s24 = int_to_ptr.hbm [resolvable:$true] %s102_s24  ;;  %s139_s1 = int_to_ptr.vmem [resolvable:$true] %s138_s1 }
  0x25   :  { %110 = dma.hbm_to_vmem [thread:$0]  %s103_s24, 8192, %s105_s23, [#allocation12], %s7114_s22, %s7114_s22, %s7115_s20  }
  0x26   :  { %s7118_s0 = smov 4   ;;  %s161_s11 = sshll.u32 %s7554_s13, 4  ;;  %s162_s11 = int_to_ptr.hbm [resolvable:$true] %s161_s11 }
  0x27   :  { %144 = dma.hbm_to_vmem [thread:$0]  %s137_s6, 2048, %s139_s1, [#allocation15], %s7567_s29, %s7567_s29, %s7118_s0  }
  0x28   :  { %s7119_s4 = smov [#allocation17]   ;;  %s184_s24 = sshll.u32 %s7556_s15, 4  ;;  %s185_s24 = int_to_ptr.hbm [resolvable:$true] %s184_s24 }
  0x29   :  { %s163_s30 = sshll.u32 %s7119_s4, 4  ;;  %s7120_s26 = smov [#allocation20]   ;;  %s164_s30 = int_to_ptr.vmem [resolvable:$true] %s163_s30 }
  0x2a   :  { %166 = dma.hbm_to_vmem [thread:$0]  %s162_s11, 16, %s164_s30, [#allocation18]  }
  0x2b   :  { %s186_s2 = sshll.u32 %s7120_s26, 4  ;;  %s7583_s28 = sld [smem:[#allocation35_spill]]  ;;  %s187_s2 = int_to_ptr.vmem [resolvable:$true] %s186_s2 }
  0x2c   :  { %192 = dma.hbm_to_vmem [thread:$0]  %s185_s24, 2048, %s187_s2, [#allocation21], %s7114_s22, %s7114_s22, %s7115_s20  }
  0x2d   :  { %s7121_s13 = smov [#allocation2]   ;;  %s7584_s15 = sld [smem:[#allocation37_spill]] }
  0x2e   :  { %s43_s1 = sshll.u32 %s7121_s13, 4  ;;  %s7122_s4 = smov 512   ;;  %s44_s1 = int_to_ptr.vmem [resolvable:$true] %s43_s1 }
  0x2f   :  { %s7123_s30 = smov 32   ;;  %s7124_s5 = smov [#allocation7]  }
  0x30   :  { %s69_s7 = sshll.u32 %s7124_s5, 4  ;;  %s7585_s26 = sld [smem:[#allocation39_spill]]  ;;  %s70_s7 = int_to_ptr.vmem [resolvable:$true] %s69_s7 }
  0x31   :  { %s41_s6 = sshll.u32 %s7583_s28, 4  ;;  %s7586_s24 = smov 16   ;;  %s42_s6 = int_to_ptr.hbm [resolvable:$true] %s41_s6 }
  0x32   :  { %49 = dma.hbm_to_vmem [thread:$0]  %s42_s6, 1024, %s44_s1, [#allocation3], %s7122_s4, %s7122_s4, %s7123_s30  }
  0x33   :  { %s67_s11 = sshll.u32 %s7584_s15, 4  ;;  %s7587_s2 = smov 256   ;;  %s68_s11 = int_to_ptr.hbm [resolvable:$true] %s67_s11 }
  0x34   :  { %75 = dma.hbm_to_vmem [thread:$0]  %s68_s11, 32768, %s70_s7, [#allocation6], %s7587_s2, %s7587_s2, %s7586_s24  }
  0x35   :  { %s119_s27 = sshll.u32 %s7549_s8, 4  ;;  %s7125_s3 = smov [#allocation10]   ;;  %s120_s27 = int_to_ptr.hbm [resolvable:$true] %s119_s27 }
  0x36   :  { %s92_s25 = sshll.u32 %s7585_s26, 4  ;;  %s94_s15 = sshll.u32 %s7125_s3, 4  ;;  %s93_s25 = int_to_ptr.hbm [resolvable:$true] %s92_s25  ;;  %s95_s15 = int_to_ptr.vmem [resolvable:$true] %s94_s15 }
  0x37   :  { %97 = dma.hbm_to_vmem [thread:$0]  %s93_s25, 64, %s95_s15, [#allocation9]  }
  0x38   :  { %s7126_s6 = smov [#allocation13]   ;;  %s150_s5 = sshll.u32 %s7553_s12, 4  ;;  %s151_s5 = int_to_ptr.hbm [resolvable:$true] %s150_s5 }
  0x39   :  { %s121_s1 = sshll.u32 %s7126_s6, 4  ;;  %s171_s8 = sshll.u32 %s7555_s14, 4  ;;  %s122_s1 = int_to_ptr.vmem [resolvable:$true] %s121_s1  ;;  %s172_s8 = int_to_ptr.hbm [resolvable:$true] %s171_s8 }
  0x3a   :  { %127 = dma.hbm_to_vmem [thread:$0]  %s120_s27, 8192, %s122_s1, [#allocation12], %s7114_s22, %s7114_s22, %s7115_s20  }
  0x3b   :  { %s7127_s7 = smov [#allocation16]   ;;  %s7128_s23 = smov [#allocation19]  }
  0x3c   :  { %s152_s28 = sshll.u32 %s7127_s7, 4  ;;  %s173_s26 = sshll.u32 %s7128_s23, 4  ;;  %s153_s28 = int_to_ptr.vmem [resolvable:$true] %s152_s28  ;;  %s174_s26 = int_to_ptr.vmem [resolvable:$true] %s173_s26 }
  0x3d   :  { %155 = dma.hbm_to_vmem [thread:$0]  %s151_s5, 16, %s153_s28, [#allocation15]  }
  0x3e   :  { %s201_s12 = sshll.u32 %s7559_s18, 4  ;;  %s218_s14 = sshll.u32 %s7562_s21, 4  ;;  %s202_s12 = int_to_ptr.hbm [resolvable:$true] %s201_s12  ;;  %s219_s14 = int_to_ptr.hbm [resolvable:$true] %s218_s14 }
  0x3f   :  { %179 = dma.hbm_to_vmem [thread:$0]  %s172_s8, 4096, %s174_s26, [#allocation18], %s7114_s22, %s7114_s22, %s7115_s20  }
  0x40   :  { %s7129_s27 = smov [#allocation22]   ;;  %s7588_s15 = smov 64  }
  0x41   :  { %s203_s3 = sshll.u32 %s7129_s27, 4  ;;  %s7130_s6 = smov [#allocation23]   ;;  %s204_s3 = int_to_ptr.vmem [resolvable:$true] %s203_s3 }
  0x42   :  { %209 = dma.hbm_to_vmem [thread:$0]  %s202_s12, 2048, %s204_s3, [#allocation21], %s7588_s15, %s7588_s15, %s7118_s0  }
  0x43   :  { %s220_s18 = sshll.u32 %s7130_s6, 4  ;;  %s221_s18 = int_to_ptr.vmem [resolvable:$true] %s220_s18 }
  0x44   :  { %226 = dma.hbm_to_vmem [thread:$0]  %s219_s14, 1024, %s221_s18, [#allocation24], %s7588_s15, %s7588_s15, %s7118_s0  }
  0x45   :  { %7091 = dma.done.wait [#allocation3], 1024  }
  0x46   :  { %7092 = vsyncadd [#allocation3], 4294966272 }
  0x47   :  { %7093 = dma.done.wait [#allocation6], 33280  }
  0x48   :  { %7094 = vsyncadd [#allocation6], 4294934016 }
  0x49   :  { %7095 = dma.done.wait [#allocation9], 128  }
  0x4a   :  { %7096 = vsyncadd [#allocation9], 4294967168 }
  0x4b   :  { %7097 = dma.done.wait [#allocation12], 16384  }
  0x4c   :  { %7098 = vsyncadd [#allocation12], 4294950912 }
  0x4d   :  { %7099 = dma.done.wait [#allocation15], 2064  }
  0x4e   :  { %7100 = vsyncadd [#allocation15], 4294965232 }
  0x4f   :  { %7101 = dma.done.wait [#allocation18], 4112  }
  0x50   :  { %7102 = vsyncadd [#allocation18], 4294963184 }
  0x51   :  { %7103 = dma.done.wait [#allocation21], 4096  }
  0x52   :  { %7104 = vsyncadd [#allocation21], 4294963200 }
  0x53   :  { %7105 = dma.done.wait [#allocation24], 1024  }
  0x54   :  { %7106 = vsyncadd [#allocation24], 4294966272  ;;  %v4429_v0 = vld [vmem:[#allocation7 + $0xe0] sm:$0xf]  ;;  %v6261_v1 = vld [vmem:[#allocation7 + $0xec] sm:$0xf0] }
  0x55   :  { %v4557_v2 = vld [vmem:[#allocation7 + $0x1e0] sm:$0xf]  ;;  %v4430_v3 = vor.u32 %v6261_v1, %v4429_v0  ;;  %v6293_v4 = vld [vmem:[#allocation7 + $0x1ec] sm:$0xf0]  ;;  %s7589_s30 = sld [smem:[#allocation41_spill]] }
  0x56   :  { %v4685_v5 = vld [vmem:[#allocation7 + $0x2e0] sm:$0xf]  ;;  %v6325_v6 = vld [vmem:[#allocation7 + $0x2ec] sm:$0xf0]  ;;  %v4558_v7 = vor.u32 %v6293_v4, %v4557_v2  ;;  %s7590_s29 = sld [smem:[#allocation42_spill]] }
  0x57   :  { %v4686_v8 = vor.u32 %v6325_v6, %v4685_v5  ;;  %v4813_v9 = vld [vmem:[#allocation7 + $0x3e0] sm:$0xf]  ;;  %v6357_v10 = vld [vmem:[#allocation7 + $0x3ec] sm:$0xf0]  ;;  %1873 = vmatpush.bf16.msra.mxu0 %v4430_v3  ;;  %s7591_s24 = sld [smem:[#allocation43_spill]] }
  0x58   :  { %v4413_v11 = vld [vmem:[#allocation7 + $0xc0] sm:$0xf]  ;;  %v4814_v12 = vor.u32 %v6357_v10, %v4813_v9  ;;  %v6257_v13 = vld [vmem:[#allocation7 + $0xcc] sm:$0xf0]  ;;  %1887 = vmatpush.bf16.msra.mxu1 %v4558_v7  ;;  %s7592_s13 = sld [smem:[#allocation44_spill]] }
  0x59   :  { %v4541_v14 = vld [vmem:[#allocation7 + $0x1c0] sm:$0xf]  ;;  %v6289_v15 = vld [vmem:[#allocation7 + $0x1cc] sm:$0xf0]  ;;  %1901 = vmatpush.bf16.msra.mxu2 %v4686_v8  ;;  %v4414_v16 = vor.u32 %v6257_v13, %v4413_v11  ;;  %s7593_s15 = sld [smem:[#allocation45_spill]] }
  0x5a   :  { %v4542_v17 = vor.u32 %v6289_v15, %v4541_v14  ;;  %v4669_v18 = vld [vmem:[#allocation7 + $0x2c0] sm:$0xf]  ;;  %v6321_v19 = vld [vmem:[#allocation7 + $0x2cc] sm:$0xf0]  ;;  %1915 = vmatpush.bf16.msra.mxu3 %v4814_v12 }
  0x5b   :  { %v4797_v20 = vld [vmem:[#allocation7 + $0x3c0] sm:$0xf]  ;;  %v4670_v21 = vor.u32 %v6321_v19, %v4669_v18  ;;  %v6353_v22 = vld [vmem:[#allocation7 + $0x3cc] sm:$0xf0]  ;;  %1874 = vmatpush.bf16.msra.mxu0 %v4414_v16 }
  0x5c   :  { %v4397_v23 = vld [vmem:[#allocation7 + $0xa0] sm:$0xf]  ;;  %v6253_v24 = vld [vmem:[#allocation7 + $0xac] sm:$0xf0]  ;;  %v4798_v25 = vor.u32 %v6353_v22, %v4797_v20  ;;  %1888 = vmatpush.bf16.msra.mxu1 %v4542_v17 }
  0x5d   :  { %v4525_v26 = vld [vmem:[#allocation7 + $0x1a0] sm:$0xf]  ;;  %v6285_v27 = vld [vmem:[#allocation7 + $0x1ac] sm:$0xf0]  ;;  %v4398_v29 = vor.u32 %v6253_v24, %v4397_v23  ;;  %1902 = vmatpush.bf16.msra.mxu2 %v4670_v21 }
  0x5e   :  { %v4653_v28 = vld [vmem:[#allocation7 + $0x2a0] sm:$0xf]  ;;  %v6317_v30 = vld [vmem:[#allocation7 + $0x2ac] sm:$0xf0]  ;;  %v4526_v33 = vor.u32 %v6285_v27, %v4525_v26  ;;  %1916 = vmatpush.bf16.msra.mxu3 %v4798_v25 }
  0x5f   :  { %v4781_v31 = vld [vmem:[#allocation7 + $0x3a0] sm:$0xf]  ;;  %v6349_v32 = vld [vmem:[#allocation7 + $0x3ac] sm:$0xf0]  ;;  %v4654_v34 = vor.u32 %v6317_v30, %v4653_v28  ;;  %1875 = vmatpush.bf16.msra.mxu0 %v4398_v29  ;;  %s4263_s6 = sshll.u32 %s7593_s15, 4  ;;  %s4264_s6 = int_to_ptr.hbm [resolvable:$true] %s4263_s6 }
  0x60   :  { %v4381_v35 = vld [vmem:[#allocation7 + $0x80] sm:$0xf]  ;;  %v6249_v36 = vld [vmem:[#allocation7 + $0x8c] sm:$0xf0]  ;;  %v4782_v38 = vor.u32 %v6349_v32, %v4781_v31  ;;  %1889 = vmatpush.bf16.msra.mxu1 %v4526_v33 }
  0x61   :  { %v4509_v37 = vld [vmem:[#allocation7 + $0x180] sm:$0xf]  ;;  %v6281_v39 = vld [vmem:[#allocation7 + $0x18c] sm:$0xf0]  ;;  %v4382_v44 = vor.u32 %v6249_v36, %v4381_v35  ;;  %1903 = vmatpush.bf16.msra.mxu2 %v4654_v34 }
  0x62   :  { %v4637_v40 = vld [vmem:[#allocation7 + $0x280] sm:$0xf]  ;;  %v6313_v41 = vld [vmem:[#allocation7 + $0x28c] sm:$0xf0]  ;;  %v4510_v45 = vor.u32 %v6281_v39, %v4509_v37  ;;  %1917 = vmatpush.bf16.msra.mxu3 %v4782_v38 }
  0x63   :  { %v4765_v42 = vld [vmem:[#allocation7 + $0x380] sm:$0xf]  ;;  %v6345_v43 = vld [vmem:[#allocation7 + $0x38c] sm:$0xf0]  ;;  %v4638_v46 = vor.u32 %v6313_v41, %v4637_v40  ;;  %1876 = vmatpush.bf16.msra.mxu0 %v4382_v44 }
  0x64   :  { %v4365_v47 = vld [vmem:[#allocation7 + $0x60] sm:$0xf]  ;;  %v6245_v48 = vld [vmem:[#allocation7 + $0x6c] sm:$0xf0]  ;;  %v4766_v50 = vor.u32 %v6345_v43, %v4765_v42  ;;  %1890 = vmatpush.bf16.msra.mxu1 %v4510_v45 }
  0x65   :  { %v4493_v49 = vld [vmem:[#allocation7 + $0x160] sm:$0xf]  ;;  %v6277_v51 = vld [vmem:[#allocation7 + $0x16c] sm:$0xf0]  ;;  %v4366_v56 = vor.u32 %v6245_v48, %v4365_v47  ;;  %1904 = vmatpush.bf16.msra.mxu2 %v4638_v46 }
  0x66   :  { %v4621_v52 = vld [vmem:[#allocation7 + $0x260] sm:$0xf]  ;;  %v6309_v53 = vld [vmem:[#allocation7 + $0x26c] sm:$0xf0]  ;;  %v4494_v57 = vor.u32 %v6277_v51, %v4493_v49  ;;  %1918 = vmatpush.bf16.msra.mxu3 %v4766_v50 }
  0x67   :  { %v4749_v54 = vld [vmem:[#allocation7 + $0x360] sm:$0xf]  ;;  %v6341_v55 = vld [vmem:[#allocation7 + $0x36c] sm:$0xf0]  ;;  %v4622_v58 = vor.u32 %v6309_v53, %v4621_v52  ;;  %1877 = vmatpush.bf16.msra.mxu0 %v4366_v56 }
  0x68   :  { %v4349_v59 = vld [vmem:[#allocation7 + $0x40] sm:$0xf]  ;;  %v6241_v60 = vld [vmem:[#allocation7 + $0x4c] sm:$0xf0]  ;;  %v4750_v62 = vor.u32 %v6341_v55, %v4749_v54  ;;  %1891 = vmatpush.bf16.msra.mxu1 %v4494_v57  ;;  %v4293_v54 = vld [vmem:[#allocation2 + $0x8] sm:$0xf] }
  0x69   :  { %v4477_v61 = vld [vmem:[#allocation7 + $0x140] sm:$0xf]  ;;  %v6273_v63 = vld [vmem:[#allocation7 + $0x14c] sm:$0xf0]  ;;  %v4350_v4 = vor.u32 %v6241_v60, %v4349_v59  ;;  %1905 = vmatpush.bf16.msra.mxu2 %v4622_v58  ;;  %v6224_v59 = vld [vmem:[#allocation2 + $0x24] sm:$0xf0] }
  0x6a   :  { %v4605_v0 = vld [vmem:[#allocation7 + $0x240] sm:$0xf]  ;;  %v6305_v1 = vld [vmem:[#allocation7 + $0x24c] sm:$0xf0]  ;;  %v4478_v5 = vor.u32 %v6273_v63, %v4477_v61  ;;  %1919 = vmatpush.bf16.msra.mxu3 %v4750_v62 }
  0x6b   :  { %v4733_v2 = vld [vmem:[#allocation7 + $0x340] sm:$0xf]  ;;  %v6337_v3 = vld [vmem:[#allocation7 + $0x34c] sm:$0xf0]  ;;  %v4606_v6 = vor.u32 %v6305_v1, %v4605_v0  ;;  %1878 = vmatpush.bf16.msra.mxu0 %v4350_v4  ;;  %v7323_v1 = vor.u32 %v6224_v59, %v4293_v54 }
  0x6c   :  { %v4333_v7 = vld [vmem:[#allocation7 + $0x20] sm:$0xf]  ;;  %v6237_v8 = vld [vmem:[#allocation7 + $0x2c] sm:$0xf0]  ;;  %v4734_v10 = vor.u32 %v6337_v3, %v4733_v2  ;;  %1892 = vmatpush.bf16.msra.mxu1 %v4478_v5 }
  0x6d   :  { %v4461_v9 = vld [vmem:[#allocation7 + $0x120] sm:$0xf]  ;;  %v6269_v11 = vld [vmem:[#allocation7 + $0x12c] sm:$0xf0]  ;;  %v4334_v16 = vor.u32 %v6237_v8, %v4333_v7  ;;  %1906 = vmatpush.bf16.msra.mxu2 %v4606_v6  ;;  %v6219_v6 = vld [vmem:[#allocation2 + $0x4] sm:$0xf] }
  0x6e   :  { %v4589_v12 = vld [vmem:[#allocation7 + $0x220] sm:$0xf]  ;;  %v6301_v13 = vld [vmem:[#allocation7 + $0x22c] sm:$0xf0]  ;;  %v4462_v19 = vor.u32 %v6269_v11, %v4461_v9  ;;  %1920 = vmatpush.bf16.msra.mxu3 %v4734_v10  ;;  %v4287_v7 = vld [vmem:[#allocation2 + $0x20] sm:$0xf0] }
  0x6f   :  { %v4717_v14 = vld [vmem:[#allocation7 + $0x320] sm:$0xf]  ;;  %v6333_v15 = vld [vmem:[#allocation7 + $0x32c] sm:$0xf0]  ;;  %v4590_v20 = vor.u32 %v6301_v13, %v4589_v12  ;;  %1879 = vmatpush.bf16.msra.mxu0 %v4334_v16  ;;  %v6220_v8 = vld [vmem:[#allocation2 + $0xc] sm:$0xf]  ;;  %v7327_v10 = vor.u32 %v6219_v6, %v4287_v7 }
  0x70   :  { %v4317_v17 = vld [vmem:[#allocation7] sm:$0xf]  ;;  %v6233_v18 = vld [vmem:[#allocation7 + $0xc] sm:$0xf0]  ;;  %v4718_v24 = vor.u32 %v6333_v15, %v4717_v14  ;;  %1893 = vmatpush.bf16.msra.mxu1 %v4462_v19  ;;  %v4295_v11 = vld [vmem:[#allocation2 + $0x28] sm:$0xf0] }
  0x71   :  { %v4445_v21 = vld [vmem:[#allocation7 + $0x100] sm:$0xf]  ;;  %v6265_v22 = vld [vmem:[#allocation7 + $0x10c] sm:$0xf0]  ;;  %v4318_v31 = vor.u32 %v6233_v18, %v4317_v17  ;;  %1907 = vmatpush.bf16.msra.mxu2 %v4590_v20  ;;  %v7329_v17 = vor.u32 %v6220_v8, %v4295_v11 }
  0x72   :  { %v4573_v23 = vld [vmem:[#allocation7 + $0x200] sm:$0xf]  ;;  %v6297_v25 = vld [vmem:[#allocation7 + $0x20c] sm:$0xf0]  ;;  %v4446_v35 = vor.u32 %v6265_v22, %v4445_v21  ;;  %1921 = vmatpush.bf16.msra.mxu3 %v4718_v24 }
  0x73   :  { %v4701_v26 = vld [vmem:[#allocation7 + $0x300] sm:$0xf]  ;;  %v6329_v27 = vld [vmem:[#allocation7 + $0x30c] sm:$0xf0]  ;;  %v4574_v36 = vor.u32 %v6297_v25, %v4573_v23  ;;  %1880 = vmatpush.bf16.msra.mxu0 %v4318_v31 }
  0x74   :  { %v4941_v28 = vld [vmem:[#allocation7 + $0x4e0] sm:$0xf]  ;;  %v6389_v29 = vld [vmem:[#allocation7 + $0x4ec] sm:$0xf0]  ;;  %v4702_v39 = vor.u32 %v6329_v27, %v4701_v26  ;;  %1894 = vmatpush.bf16.msra.mxu1 %v4446_v35 }
  0x75   :  { %v5069_v30 = vld [vmem:[#allocation7 + $0x5e0] sm:$0xf]  ;;  %v6421_v32 = vld [vmem:[#allocation7 + $0x5ec] sm:$0xf0]  ;;  %v4942_v40 = vor.u32 %v6389_v29, %v4941_v28  ;;  %1908 = vmatpush.bf16.msra.mxu2 %v4574_v36 }
  0x76   :  { %v5197_v33 = vld [vmem:[#allocation7 + $0x6e0] sm:$0xf]  ;;  %v6453_v34 = vld [vmem:[#allocation7 + $0x6ec] sm:$0xf0]  ;;  %v5070_v43 = vor.u32 %v6421_v32, %v5069_v30  ;;  %1922 = vmatpush.bf16.msra.mxu3 %v4702_v39 }
  0x77   :  { %v5325_v37 = vld [vmem:[#allocation7 + $0x7e0] sm:$0xf]  ;;  %v6485_v38 = vld [vmem:[#allocation7 + $0x7ec] sm:$0xf0]  ;;  %v5198_v44 = vor.u32 %v6453_v34, %v5197_v33  ;;  %1929 = vmatpush.bf16.msrb.mxu0 %v4942_v40  ;;  %1895 = vmatmul.bf16.vlgmr.msra.gmra.mxu1 %v7327_v10 }
  0x78   :  { %v4925_v41 = vld [vmem:[#allocation7 + $0x4c0] sm:$0xf]  ;;  %v6385_v42 = vld [vmem:[#allocation7 + $0x4cc] sm:$0xf0]  ;;  %v5326_v48 = vor.u32 %v6485_v38, %v5325_v37  ;;  %1943 = vmatpush.bf16.msrb.mxu1 %v5070_v43  ;;  %1909 = vmatmul.bf16.vlgmr.msra.gmra.mxu2 %v7323_v1 }
  0x79   :  { %v5053_v45 = vld [vmem:[#allocation7 + $0x5c0] sm:$0xf]  ;;  %v6417_v46 = vld [vmem:[#allocation7 + $0x5cc] sm:$0xf0]  ;;  %v4926_v55 = vor.u32 %v6385_v42, %v4925_v41  ;;  %1957 = vmatpush.bf16.msrb.mxu2 %v5198_v44  ;;  %1923 = vmatmul.bf16.vlgmr.msra.gmra.mxu3 %v7329_v17 }
  0x7a   :  { %v5181_v47 = vld [vmem:[#allocation7 + $0x6c0] sm:$0xf]  ;;  %v6449_v49 = vld [vmem:[#allocation7 + $0x6cc] sm:$0xf0]  ;;  %v5054_v60 = vor.u32 %v6417_v46, %v5053_v45  ;;  %1971 = vmatpush.bf16.msrb.mxu3 %v5326_v48 }
  0x7b   :  { %v5309_v50 = vld [vmem:[#allocation7 + $0x7c0] sm:$0xf]  ;;  %v6481_v51 = vld [vmem:[#allocation7 + $0x7cc] sm:$0xf0]  ;;  %v5182_v61 = vor.u32 %v6449_v49, %v5181_v47  ;;  %1930 = vmatpush.bf16.msrb.mxu0 %v4926_v55 }
  0x7c   :  { %v4285_v52 = vld [vmem:[#allocation2] sm:$0xf]  ;;  %v6381_v57 = vld [vmem:[#allocation7 + $0x4ac] sm:$0xf0]  ;;  %v5310_v2 = vor.u32 %v6481_v51, %v5309_v50  ;;  %1944 = vmatpush.bf16.msrb.mxu1 %v5054_v60 }
  0x7d   :  { %v6223_v53 = vld [vmem:[#allocation2 + $0x1c] sm:$0xf0]  ;;  %v6413_v63 = vld [vmem:[#allocation7 + $0x5ac] sm:$0xf0]  ;;  %1958 = vmatpush.bf16.msrb.mxu2 %v5182_v61 }
  0x7e   :  { %v4909_v56 = vld [vmem:[#allocation7 + $0x4a0] sm:$0xf]  ;;  %v7321_v58 = vor.u32 %v6223_v53, %v4285_v52  ;;  %v6445_v3 = vld [vmem:[#allocation7 + $0x6ac] sm:$0xf0]  ;;  %1972 = vmatpush.bf16.msrb.mxu3 %v5310_v2 }
  0x7f   :  { %v5037_v62 = vld [vmem:[#allocation7 + $0x5a0] sm:$0xf]  ;;  %v6477_v5 = vld [vmem:[#allocation7 + $0x7ac] sm:$0xf0]  ;;  %v4910_v9 = vor.u32 %v6381_v57, %v4909_v56 }
  0x80   :  { %v5165_v0 = vld [vmem:[#allocation7 + $0x6a0] sm:$0xf]  ;;  %1881 = vmatmul.bf16.vlgmr.msra.gmra.mxu0 %v7321_v58  ;;  %v5038_v12 = vor.u32 %v6413_v63, %v5037_v62  ;;  %v6377_v15 = vld [vmem:[#allocation7 + $0x48c] sm:$0xf0] }
  0x81   :  { %v5293_v4 = vld [vmem:[#allocation7 + $0x7a0] sm:$0xf]  ;;  %v5166_v13 = vor.u32 %v6445_v3, %v5165_v0  ;;  %v6409_v19 = vld [vmem:[#allocation7 + $0x58c] sm:$0xf0]  ;;  %1931 = vmatpush.bf16.msrb.mxu0 %v4910_v9  ;;  %v6259_v9 = vld [vmem:[#allocation7 + $0xe4] sm:$0xf] }
  0x82   :  { %v4893_v14 = vld [vmem:[#allocation7 + $0x480] sm:$0xf]  ;;  %v5294_v18 = vor.u32 %v6477_v5, %v5293_v4  ;;  %v6441_v21 = vld [vmem:[#allocation7 + $0x68c] sm:$0xf0]  ;;  %1945 = vmatpush.bf16.msrb.mxu1 %v5038_v12  ;;  %v4431_v12 = vld [vmem:[#allocation7 + $0xf0] sm:$0xf0] }
  0x83   :  { %v5021_v16 = vld [vmem:[#allocation7 + $0x580] sm:$0xf]  ;;  %v6473_v23 = vld [vmem:[#allocation7 + $0x78c] sm:$0xf0]  ;;  %v4894_v24 = vor.u32 %v6377_v15, %v4893_v14  ;;  %1959 = vmatpush.bf16.msrb.mxu2 %v5166_v13  ;;  %v6291_v13 = vld [vmem:[#allocation7 + $0x1e4] sm:$0xf] }
  0x84   :  { %v5149_v20 = vld [vmem:[#allocation7 + $0x680] sm:$0xf]  ;;  %v5022_v25 = vor.u32 %v6409_v19, %v5021_v16  ;;  %v6373_v28 = vld [vmem:[#allocation7 + $0x46c] sm:$0xf0]  ;;  %1973 = vmatpush.bf16.msrb.mxu3 %v5294_v18  ;;  %v4559_v14 = vld [vmem:[#allocation7 + $0x1f0] sm:$0xf0] }
  0x85   :  { %v5277_v22 = vld [vmem:[#allocation7 + $0x780] sm:$0xf]  ;;  %v5150_v26 = vor.u32 %v6441_v21, %v5149_v20  ;;  %v6405_v31 = vld [vmem:[#allocation7 + $0x56c] sm:$0xf0]  ;;  %1932 = vmatpush.bf16.msrb.mxu0 %v4894_v24  ;;  %v6323_v15 = vld [vmem:[#allocation7 + $0x2e4] sm:$0xf] }
  0x86   :  { %v4877_v27 = vld [vmem:[#allocation7 + $0x460] sm:$0xf]  ;;  %v5278_v30 = vor.u32 %v6473_v23, %v5277_v22  ;;  %v6437_v33 = vld [vmem:[#allocation7 + $0x66c] sm:$0xf0]  ;;  %1946 = vmatpush.bf16.msrb.mxu1 %v5022_v25  ;;  %v4687_v16 = vld [vmem:[#allocation7 + $0x2f0] sm:$0xf0] }
  0x87   :  { %v5005_v29 = vld [vmem:[#allocation7 + $0x560] sm:$0xf]  ;;  %v6469_v35 = vld [vmem:[#allocation7 + $0x76c] sm:$0xf0]  ;;  %v4878_v36 = vor.u32 %v6373_v28, %v4877_v27  ;;  %1960 = vmatpush.bf16.msrb.mxu2 %v5150_v26  ;;  %v6355_v18 = vld [vmem:[#allocation7 + $0x3e4] sm:$0xf] }
  0x88   :  { %v5133_v32 = vld [vmem:[#allocation7 + $0x660] sm:$0xf]  ;;  %v5006_v37 = vor.u32 %v6405_v31, %v5005_v29  ;;  %v6369_v40 = vld [vmem:[#allocation7 + $0x44c] sm:$0xf0]  ;;  %1974 = vmatpush.bf16.msrb.mxu3 %v5278_v30  ;;  %v4815_v20 = vld [vmem:[#allocation7 + $0x3f0] sm:$0xf0]  ;;  %v4434_v29 = vor.u32 %v6259_v9, %v4431_v12 }
  0x89   :  { %v5261_v34 = vld [vmem:[#allocation7 + $0x760] sm:$0xf]  ;;  %v5134_v38 = vor.u32 %v6437_v33, %v5133_v32  ;;  %v6401_v43 = vld [vmem:[#allocation7 + $0x54c] sm:$0xf0]  ;;  %1933 = vmatpush.bf16.msrb.mxu0 %v4878_v36  ;;  %v4309_v25 = vld [vmem:[#allocation2 + $0x18] sm:$0xf]  ;;  %v4562_v33 = vor.u32 %v6291_v13, %v4559_v14 }
  0x8a   :  { %v4861_v39 = vld [vmem:[#allocation7 + $0x440] sm:$0xf]  ;;  %v5262_v42 = vor.u32 %v6469_v35, %v5261_v34  ;;  %v6433_v45 = vld [vmem:[#allocation7 + $0x64c] sm:$0xf0]  ;;  %1947 = vmatpush.bf16.msrb.mxu1 %v5006_v37  ;;  %v6226_v26 = vld [vmem:[#allocation2 + $0x34] sm:$0xf0]  ;;  %v4690_v34 = vor.u32 %v6323_v15, %v4687_v16 }
  0x8b   :  { %v4989_v41 = vld [vmem:[#allocation7 + $0x540] sm:$0xf]  ;;  %v6465_v47 = vld [vmem:[#allocation7 + $0x74c] sm:$0xf0]  ;;  %v4862_v48 = vor.u32 %v6369_v40, %v4861_v39  ;;  %1961 = vmatpush.bf16.msrb.mxu2 %v5134_v38  ;;  %v6221_v27 = vld [vmem:[#allocation2 + $0x14] sm:$0xf]  ;;  %v4818_v38 = vor.u32 %v6355_v18, %v4815_v20 }
  0x8c   :  { %v5117_v44 = vld [vmem:[#allocation7 + $0x640] sm:$0xf]  ;;  %v4990_v50 = vor.u32 %v6401_v43, %v4989_v41  ;;  %v6365_v52 = vld [vmem:[#allocation7 + $0x42c] sm:$0xf0]  ;;  %1975 = vmatpush.bf16.msrb.mxu3 %v5262_v42  ;;  %v4303_v30 = vld [vmem:[#allocation2 + $0x30] sm:$0xf0]  ;;  %v7335_v43 = vor.u32 %v6226_v26, %v4309_v25 }
  0x8d   :  { %v5245_v46 = vld [vmem:[#allocation7 + $0x740] sm:$0xf]  ;;  %v5118_v51 = vor.u32 %v6433_v45, %v5117_v44  ;;  %v6397_v54 = vld [vmem:[#allocation7 + $0x52c] sm:$0xf0]  ;;  %1934 = vmatpush.bf16.msrb.mxu0 %v4862_v48  ;;  %v6222_v31 = vld [vmem:[#allocation2 + $0x1c] sm:$0xf]  ;;  %v7337_v44 = vor.u32 %v6221_v27, %v4303_v30 }
  0x8e   :  { %v4845_v49 = vld [vmem:[#allocation7 + $0x420] sm:$0xf]  ;;  %v5246_v55 = vor.u32 %v6465_v47, %v5245_v46  ;;  %v6429_v57 = vld [vmem:[#allocation7 + $0x62c] sm:$0xf0]  ;;  %1948 = vmatpush.bf16.msrb.mxu1 %v4990_v50  ;;  %v4311_v32 = vld [vmem:[#allocation2 + $0x38] sm:$0xf0] }
  0x8f   :  { %v4973_v53 = vld [vmem:[#allocation7 + $0x520] sm:$0xf]  ;;  %v6461_v60 = vld [vmem:[#allocation7 + $0x72c] sm:$0xf0]  ;;  %v4846_v63 = vor.u32 %v6365_v52, %v4845_v49  ;;  %1962 = vmatpush.bf16.msrb.mxu2 %v5118_v51  ;;  %v6255_v35 = vld [vmem:[#allocation7 + $0xc4] sm:$0xf]  ;;  %v7339_v47 = vor.u32 %v6222_v31, %v4311_v32 }
  0x90   :  { %v5101_v56 = vld [vmem:[#allocation7 + $0x620] sm:$0xf]  ;;  %v6361_v62 = vld [vmem:[#allocation7 + $0x40c] sm:$0xf0]  ;;  %v4974_v5 = vor.u32 %v6397_v54, %v4973_v53  ;;  %1976 = vmatpush.bf16.msrb.mxu3 %v5246_v55  ;;  %v4415_v36 = vld [vmem:[#allocation7 + $0xd0] sm:$0xf0] }
  0x91   :  { %v5229_v59 = vld [vmem:[#allocation7 + $0x720] sm:$0xf]  ;;  %v6393_v2 = vld [vmem:[#allocation7 + $0x50c] sm:$0xf0]  ;;  %v5102_v6 = vor.u32 %v6429_v57, %v5101_v56  ;;  %1935 = vmatpush.bf16.msrb.mxu0 %v4846_v63  ;;  %v6287_v37 = vld [vmem:[#allocation7 + $0x1c4] sm:$0xf]  ;;  %v4418_v48 = vor.u32 %v6255_v35, %v4415_v36 }
  0x92   :  { %v4829_v61 = vld [vmem:[#allocation7 + $0x400] sm:$0xf]  ;;  %v6425_v4 = vld [vmem:[#allocation7 + $0x60c] sm:$0xf0]  ;;  %v5230_v11 = vor.u32 %v6461_v60, %v5229_v59  ;;  %1949 = vmatpush.bf16.msrb.mxu1 %v4974_v5  ;;  %v4543_v40 = vld [vmem:[#allocation7 + $0x1d0] sm:$0xf0] }
  0x93   :  { %v4957_v0 = vld [vmem:[#allocation7 + $0x500] sm:$0xf]  ;;  %v6457_v8 = vld [vmem:[#allocation7 + $0x70c] sm:$0xf0]  ;;  %v4830_v19 = vor.u32 %v6361_v62, %v4829_v61  ;;  %1963 = vmatpush.bf16.msrb.mxu2 %v5102_v6  ;;  %v6319_v41 = vld [vmem:[#allocation7 + $0x2c4] sm:$0xf]  ;;  %v4546_v49 = vor.u32 %v6287_v37, %v4543_v40 }
  0x94   :  { %v5085_v3 = vld [vmem:[#allocation7 + $0x600] sm:$0xf]  ;;  %v4301_v21 = vld [vmem:[#allocation2 + $0x10] sm:$0xf]  ;;  %v4958_v23 = vor.u32 %v6393_v2, %v4957_v0  ;;  %1977 = vmatpush.bf16.msrb.mxu3 %v5230_v11  ;;  %v4671_v42 = vld [vmem:[#allocation7 + $0x2d0] sm:$0xf0] }
  0x95   :  { %v5213_v7 = vld [vmem:[#allocation7 + $0x700] sm:$0xf]  ;;  %v6225_v22 = vld [vmem:[#allocation2 + $0x2c] sm:$0xf0]  ;;  %v5086_v24 = vor.u32 %v6425_v4, %v5085_v3  ;;  %1936 = vmatpush.bf16.msrb.mxu0 %v4830_v19  ;;  %v6351_v45 = vld [vmem:[#allocation7 + $0x3c4] sm:$0xf]  ;;  %v4674_v50 = vor.u32 %v6319_v41, %v4671_v42 }
  0x96   :  { %v5214_v28 = vor.u32 %v6457_v8, %v5213_v7  ;;  %v7333_v39 = vor.u32 %v6225_v22, %v4301_v21  ;;  %1950 = vmatpush.bf16.msrb.mxu1 %v4958_v23  ;;  %v4799_v46 = vld [vmem:[#allocation7 + $0x3d0] sm:$0xf0]  ;;  %v6251_v51 = vld [vmem:[#allocation7 + $0xa4] sm:$0xf] }
  0x97   :  { %1964 = vmatpush.bf16.msrb.mxu2 %v5086_v24  ;;  %v4399_v52 = vld [vmem:[#allocation7 + $0xb0] sm:$0xf0]  ;;  %v6283_v53 = vld [vmem:[#allocation7 + $0x1a4] sm:$0xf]  ;;  %v4802_v54 = vor.u32 %v6351_v45, %v4799_v46 }
  0x98   :  { %1978 = vmatpush.bf16.msrb.mxu3 %v5214_v28  ;;  %1937 = vmatmul.bf16.vlgmr.msrb.gmra.mxu0 %v7333_v39  ;;  %v4527_v55 = vld [vmem:[#allocation7 + $0x1b0] sm:$0xf0]  ;;  %v6315_v56 = vld [vmem:[#allocation7 + $0x2a4] sm:$0xf]  ;;  %v4402_v61 = vor.u32 %v6251_v51, %v4399_v52 }
  0x99   :  { %1985 = vmatpush.bf16.msra.mxu0 %v4434_v29  ;;  %v4655_v57 = vld [vmem:[#allocation7 + $0x2b0] sm:$0xf0]  ;;  %1951 = vmatmul.bf16.vlgmr.msrb.gmra.mxu1 %v7337_v44  ;;  %v6347_v59 = vld [vmem:[#allocation7 + $0x3a4] sm:$0xf]  ;;  %v4530_v62 = vor.u32 %v6283_v53, %v4527_v55 }
  0x9a   :  { %1999 = vmatpush.bf16.msra.mxu1 %v4562_v33  ;;  %1965 = vmatmul.bf16.vlgmr.msrb.gmra.mxu2 %v7335_v43  ;;  %v4783_v60 = vld [vmem:[#allocation7 + $0x3b0] sm:$0xf0]  ;;  %v4658_v63 = vor.u32 %v6315_v56, %v4655_v57  ;;  %v6247_v0 = vld [vmem:[#allocation7 + $0x84] sm:$0xf] }
  0x9b   :  { %2013 = vmatpush.bf16.msra.mxu2 %v4690_v34  ;;  %1979 = vmatmul.bf16.vlgmr.msrb.gmra.mxu3 %v7339_v47  ;;  %v4383_v2 = vld [vmem:[#allocation7 + $0x90] sm:$0xf0]  ;;  %v6279_v3 = vld [vmem:[#allocation7 + $0x184] sm:$0xf]  ;;  %v4786_v4 = vor.u32 %v6347_v59, %v4783_v60 }
  0x9c   :  { %2027 = vmatpush.bf16.msra.mxu3 %v4818_v38  ;;  %v4511_v5 = vld [vmem:[#allocation7 + $0x190] sm:$0xf0]  ;;  %v6311_v6 = vld [vmem:[#allocation7 + $0x284] sm:$0xf]  ;;  %v4386_v11 = vor.u32 %v6247_v0, %v4383_v2 }
  0x9d   :  { %1986 = vmatpush.bf16.msra.mxu0 %v4418_v48  ;;  %v4639_v7 = vld [vmem:[#allocation7 + $0x290] sm:$0xf0]  ;;  %v6343_v8 = vld [vmem:[#allocation7 + $0x384] sm:$0xf]  ;;  %v4514_v12 = vor.u32 %v6279_v3, %v4511_v5 }
  0x9e   :  { %2000 = vmatpush.bf16.msra.mxu1 %v4546_v49  ;;  %v4767_v9 = vld [vmem:[#allocation7 + $0x390] sm:$0xf0]  ;;  %v4642_v13 = vor.u32 %v6311_v6, %v4639_v7  ;;  %v6243_v14 = vld [vmem:[#allocation7 + $0x64] sm:$0xf] }
  0x9f   :  { %2014 = vmatpush.bf16.msra.mxu2 %v4674_v50  ;;  %v4367_v15 = vld [vmem:[#allocation7 + $0x70] sm:$0xf0]  ;;  %v6275_v16 = vld [vmem:[#allocation7 + $0x164] sm:$0xf]  ;;  %v4770_v18 = vor.u32 %v6343_v8, %v4767_v9 }
  0xa0   :  { %2028 = vmatpush.bf16.msra.mxu3 %v4802_v54  ;;  %v4495_v19 = vld [vmem:[#allocation7 + $0x170] sm:$0xf0]  ;;  %v6307_v20 = vld [vmem:[#allocation7 + $0x264] sm:$0xf]  ;;  %v4370_v24 = vor.u32 %v6243_v14, %v4367_v15 }
  0xa1   :  { %1987 = vmatpush.bf16.msra.mxu0 %v4402_v61  ;;  %v4623_v21 = vld [vmem:[#allocation7 + $0x270] sm:$0xf0]  ;;  %v6339_v22 = vld [vmem:[#allocation7 + $0x364] sm:$0xf]  ;;  %v4498_v25 = vor.u32 %v6275_v16, %v4495_v19 }
  0xa2   :  { %2001 = vmatpush.bf16.msra.mxu1 %v4530_v62  ;;  %v4751_v23 = vld [vmem:[#allocation7 + $0x370] sm:$0xf0]  ;;  %v4626_v26 = vor.u32 %v6307_v20, %v4623_v21  ;;  %v6239_v27 = vld [vmem:[#allocation7 + $0x44] sm:$0xf] }
  0xa3   :  { %2015 = vmatpush.bf16.msra.mxu2 %v4658_v63  ;;  %v4351_v28 = vld [vmem:[#allocation7 + $0x50] sm:$0xf0]  ;;  %v6271_v29 = vld [vmem:[#allocation7 + $0x144] sm:$0xf]  ;;  %v4754_v30 = vor.u32 %v6339_v22, %v4751_v23 }
  0xa4   :  { %2029 = vmatpush.bf16.msra.mxu3 %v4786_v4  ;;  %v4479_v31 = vld [vmem:[#allocation7 + $0x150] sm:$0xf0]  ;;  %v6303_v32 = vld [vmem:[#allocation7 + $0x244] sm:$0xf]  ;;  %v4354_v36 = vor.u32 %v6239_v27, %v4351_v28 }
  0xa5   :  { %1988 = vmatpush.bf16.msra.mxu0 %v4386_v11  ;;  %v4607_v33 = vld [vmem:[#allocation7 + $0x250] sm:$0xf0]  ;;  %v6335_v34 = vld [vmem:[#allocation7 + $0x344] sm:$0xf]  ;;  %v4482_v37 = vor.u32 %v6271_v29, %v4479_v31 }
  0xa6   :  { %2002 = vmatpush.bf16.msra.mxu1 %v4514_v12  ;;  %v4735_v35 = vld [vmem:[#allocation7 + $0x350] sm:$0xf0]  ;;  %v4610_v38 = vor.u32 %v6303_v32, %v4607_v33  ;;  %v6235_v40 = vld [vmem:[#allocation7 + $0x24] sm:$0xf] }
  0xa7   :  { %2016 = vmatpush.bf16.msra.mxu2 %v4642_v13  ;;  %v4335_v41 = vld [vmem:[#allocation7 + $0x30] sm:$0xf0]  ;;  %v6267_v42 = vld [vmem:[#allocation7 + $0x124] sm:$0xf]  ;;  %v4738_v45 = vor.u32 %v6335_v34, %v4735_v35 }
  0xa8   :  { %2030 = vmatpush.bf16.msra.mxu3 %v4770_v18  ;;  %v4463_v46 = vld [vmem:[#allocation7 + $0x130] sm:$0xf0]  ;;  %v6299_v48 = vld [vmem:[#allocation7 + $0x224] sm:$0xf]  ;;  %v4338_v52 = vor.u32 %v6235_v40, %v4335_v41 }
  0xa9   :  { %1989 = vmatpush.bf16.msra.mxu0 %v4370_v24  ;;  %v4591_v49 = vld [vmem:[#allocation7 + $0x230] sm:$0xf0]  ;;  %v6331_v50 = vld [vmem:[#allocation7 + $0x324] sm:$0xf]  ;;  %v4466_v55 = vor.u32 %v6267_v42, %v4463_v46 }
  0xaa   :  { %2003 = vmatpush.bf16.msra.mxu1 %v4498_v25  ;;  %v4719_v51 = vld [vmem:[#allocation7 + $0x330] sm:$0xf0]  ;;  %v6231_v53 = vld [vmem:[#allocation7 + $0x4] sm:$0xf]  ;;  %v4594_v56 = vor.u32 %v6299_v48, %v4591_v49 }
  0xab   :  { %2017 = vmatpush.bf16.msra.mxu2 %v4626_v26  ;;  %v4319_v54 = vld [vmem:[#allocation7 + $0x10] sm:$0xf0]  ;;  %v6263_v57 = vld [vmem:[#allocation7 + $0x104] sm:$0xf]  ;;  %v4722_v61 = vor.u32 %v6331_v50, %v4719_v51 }
  0xac   :  { %2031 = vmatpush.bf16.msra.mxu3 %v4754_v30  ;;  %v4447_v59 = vld [vmem:[#allocation7 + $0x110] sm:$0xf0]  ;;  %v6295_v60 = vld [vmem:[#allocation7 + $0x204] sm:$0xf]  ;;  %v4322_v5 = vor.u32 %v6231_v53, %v4319_v54 }
  0xad   :  { %1990 = vmatpush.bf16.msra.mxu0 %v4354_v36  ;;  %v4575_v62 = vld [vmem:[#allocation7 + $0x210] sm:$0xf0]  ;;  %v6327_v63 = vld [vmem:[#allocation7 + $0x304] sm:$0xf]  ;;  %v4450_v9 = vor.u32 %v6263_v57, %v4447_v59 }
  0xae   :  { %2004 = vmatpush.bf16.msra.mxu1 %v4482_v37  ;;  %v4703_v0 = vld [vmem:[#allocation7 + $0x310] sm:$0xf0]  ;;  %v6387_v2 = vld [vmem:[#allocation7 + $0x4e4] sm:$0xf]  ;;  %v4578_v11 = vor.u32 %v6295_v60, %v4575_v62 }
  0xaf   :  { %2018 = vmatpush.bf16.msra.mxu2 %v4610_v38  ;;  %v4943_v3 = vld [vmem:[#allocation7 + $0x4f0] sm:$0xf0]  ;;  %v6419_v4 = vld [vmem:[#allocation7 + $0x5e4] sm:$0xf]  ;;  %v4706_v14 = vor.u32 %v6327_v63, %v4703_v0 }
  0xb0   :  { %2032 = vmatpush.bf16.msra.mxu3 %v4738_v45  ;;  %v5071_v6 = vld [vmem:[#allocation7 + $0x5f0] sm:$0xf0]  ;;  %v6451_v7 = vld [vmem:[#allocation7 + $0x6e4] sm:$0xf]  ;;  %v4946_v15 = vor.u32 %v6387_v2, %v4943_v3 }
  0xb1   :  { %1991 = vmatpush.bf16.msra.mxu0 %v4338_v52  ;;  %v5199_v8 = vld [vmem:[#allocation7 + $0x6f0] sm:$0xf0]  ;;  %v6483_v12 = vld [vmem:[#allocation7 + $0x7e4] sm:$0xf]  ;;  %v5074_v16 = vor.u32 %v6419_v4, %v5071_v6 }
  0xb2   :  { %2005 = vmatpush.bf16.msra.mxu1 %v4466_v55  ;;  %v5327_v13 = vld [vmem:[#allocation7 + $0x7f0] sm:$0xf0]  ;;  %v5202_v18 = vor.u32 %v6451_v7, %v5199_v8  ;;  %v6383_v19 = vld [vmem:[#allocation7 + $0x4c4] sm:$0xf] }
  0xb3   :  { %2019 = vmatpush.bf16.msra.mxu2 %v4594_v56  ;;  %v4927_v20 = vld [vmem:[#allocation7 + $0x4d0] sm:$0xf0]  ;;  %v6415_v21 = vld [vmem:[#allocation7 + $0x5c4] sm:$0xf]  ;;  %v5330_v22 = vor.u32 %v6483_v12, %v5327_v13 }
  0xb4   :  { %2033 = vmatpush.bf16.msra.mxu3 %v4722_v61  ;;  %v5055_v23 = vld [vmem:[#allocation7 + $0x5d0] sm:$0xf0]  ;;  %v6447_v24 = vld [vmem:[#allocation7 + $0x6c4] sm:$0xf]  ;;  %v4930_v28 = vor.u32 %v6383_v19, %v4927_v20 }
  0xb5   :  { %1992 = vmatpush.bf16.msra.mxu0 %v4322_v5  ;;  %v5183_v25 = vld [vmem:[#allocation7 + $0x6d0] sm:$0xf0]  ;;  %v6479_v26 = vld [vmem:[#allocation7 + $0x7c4] sm:$0xf]  ;;  %v5058_v29 = vor.u32 %v6415_v21, %v5055_v23 }
  0xb6   :  { %2006 = vmatpush.bf16.msra.mxu1 %v4450_v9  ;;  %v5311_v27 = vld [vmem:[#allocation7 + $0x7d0] sm:$0xf0]  ;;  %v5186_v30 = vor.u32 %v6447_v24, %v5183_v25  ;;  %v6379_v31 = vld [vmem:[#allocation7 + $0x4a4] sm:$0xf] }
  0xb7   :  { %2020 = vmatpush.bf16.msra.mxu2 %v4578_v11  ;;  %v4911_v32 = vld [vmem:[#allocation7 + $0x4b0] sm:$0xf0]  ;;  %v6411_v33 = vld [vmem:[#allocation7 + $0x5a4] sm:$0xf]  ;;  %v5314_v34 = vor.u32 %v6479_v26, %v5311_v27 }
  0xb8   :  { %2034 = vmatpush.bf16.msra.mxu3 %v4706_v14  ;;  %v5039_v35 = vld [vmem:[#allocation7 + $0x5b0] sm:$0xf0]  ;;  %v6443_v36 = vld [vmem:[#allocation7 + $0x6a4] sm:$0xf]  ;;  %1993 = vmatmul.bf16.vlgmr.msra.gmra.mxu0 %v7321_v58  ;;  %v4914_v41 = vor.u32 %v6379_v31, %v4911_v32 }
  0xb9   :  { %2041 = vmatpush.bf16.msrb.mxu0 %v4946_v15  ;;  %v5167_v37 = vld [vmem:[#allocation7 + $0x6b0] sm:$0xf0]  ;;  %v6475_v38 = vld [vmem:[#allocation7 + $0x7a4] sm:$0xf]  ;;  %2007 = vmatmul.bf16.vlgmr.msra.gmra.mxu1 %v7327_v10  ;;  %v5042_v42 = vor.u32 %v6411_v33, %v5039_v35 }
  0xba   :  { %2055 = vmatpush.bf16.msrb.mxu1 %v5074_v16  ;;  %v5295_v40 = vld [vmem:[#allocation7 + $0x7b0] sm:$0xf0]  ;;  %2021 = vmatmul.bf16.vlgmr.msra.gmra.mxu2 %v7323_v1  ;;  %v5170_v45 = vor.u32 %v6443_v36, %v5167_v37  ;;  %v6375_v46 = vld [vmem:[#allocation7 + $0x484] sm:$0xf] }
  0xbb   :  { %2069 = vmatpush.bf16.msrb.mxu2 %v5202_v18  ;;  %2035 = vmatmul.bf16.vlgmr.msra.gmra.mxu3 %v7329_v17  ;;  %v4895_v48 = vld [vmem:[#allocation7 + $0x490] sm:$0xf0]  ;;  %v6407_v49 = vld [vmem:[#allocation7 + $0x584] sm:$0xf]  ;;  %v5298_v50 = vor.u32 %v6475_v38, %v5295_v40 }
  0xbc   :  { %2083 = vmatpush.bf16.msrb.mxu3 %v5330_v22  ;;  %v5023_v51 = vld [vmem:[#allocation7 + $0x590] sm:$0xf0]  ;;  %v6439_v52 = vld [vmem:[#allocation7 + $0x684] sm:$0xf]  ;;  %v4898_v56 = vor.u32 %v6375_v46, %v4895_v48  ;;  %v4437_v48 = vld [vmem:[#allocation7 + $0xe8] sm:$0xf] }
  0xbd   :  { %2042 = vmatpush.bf16.msrb.mxu0 %v4930_v28  ;;  %v5151_v53 = vld [vmem:[#allocation7 + $0x690] sm:$0xf0]  ;;  %v6471_v54 = vld [vmem:[#allocation7 + $0x784] sm:$0xf]  ;;  %v5026_v57 = vor.u32 %v6407_v49, %v5023_v51  ;;  %v6262_v49 = vld [vmem:[#allocation7 + $0xf4] sm:$0xf0] }
  0xbe   :  { %2056 = vmatpush.bf16.msrb.mxu1 %v5058_v29  ;;  %v5279_v55 = vld [vmem:[#allocation7 + $0x790] sm:$0xf0]  ;;  %v5154_v59 = vor.u32 %v6439_v52, %v5151_v53  ;;  %v6371_v60 = vld [vmem:[#allocation7 + $0x464] sm:$0xf]  ;;  %v6294_v52 = vld [vmem:[#allocation7 + $0x1f4] sm:$0xf0] }
  0xbf   :  { %2070 = vmatpush.bf16.msrb.mxu2 %v5186_v30  ;;  %v4879_v61 = vld [vmem:[#allocation7 + $0x470] sm:$0xf0]  ;;  %v6403_v62 = vld [vmem:[#allocation7 + $0x564] sm:$0xf]  ;;  %v5282_v63 = vor.u32 %v6471_v54, %v5279_v55  ;;  %v4693_v53 = vld [vmem:[#allocation7 + $0x2e8] sm:$0xf] }
  0xc0   :  { %2084 = vmatpush.bf16.msrb.mxu3 %v5314_v34  ;;  %v5007_v0 = vld [vmem:[#allocation7 + $0x570] sm:$0xf0]  ;;  %v6435_v2 = vld [vmem:[#allocation7 + $0x664] sm:$0xf]  ;;  %v4882_v6 = vor.u32 %v6371_v60, %v4879_v61  ;;  %v6326_v54 = vld [vmem:[#allocation7 + $0x2f4] sm:$0xf0]  ;;  %v4438_v61 = vor.u32 %v6262_v49, %v4437_v48 }
  0xc1   :  { %2043 = vmatpush.bf16.msrb.mxu0 %v4914_v41  ;;  %v5135_v3 = vld [vmem:[#allocation7 + $0x670] sm:$0xf0]  ;;  %v6467_v4 = vld [vmem:[#allocation7 + $0x764] sm:$0xf]  ;;  %v5010_v7 = vor.u32 %v6403_v62, %v5007_v0  ;;  %v4421_v0 = vld [vmem:[#allocation7 + $0xc8] sm:$0xf] }
  0xc2   :  { %2057 = vmatpush.bf16.msrb.mxu1 %v5042_v42  ;;  %v5263_v5 = vld [vmem:[#allocation7 + $0x770] sm:$0xf0]  ;;  %v5138_v8 = vor.u32 %v6435_v2, %v5135_v3  ;;  %v6367_v9 = vld [vmem:[#allocation7 + $0x444] sm:$0xf]  ;;  %v6258_v2 = vld [vmem:[#allocation7 + $0xd4] sm:$0xf0] }
  0xc3   :  { %2071 = vmatpush.bf16.msrb.mxu2 %v5170_v45  ;;  %v4863_v11 = vld [vmem:[#allocation7 + $0x450] sm:$0xf0]  ;;  %v6399_v12 = vld [vmem:[#allocation7 + $0x544] sm:$0xf]  ;;  %v5266_v13 = vor.u32 %v6467_v4, %v5263_v5  ;;  %v4549_v3 = vld [vmem:[#allocation7 + $0x1c8] sm:$0xf] }
  0xc4   :  { %2085 = vmatpush.bf16.msrb.mxu3 %v5298_v50  ;;  %v4991_v14 = vld [vmem:[#allocation7 + $0x550] sm:$0xf0]  ;;  %v6431_v15 = vld [vmem:[#allocation7 + $0x644] sm:$0xf]  ;;  %v4866_v20 = vor.u32 %v6367_v9, %v4863_v11  ;;  %v4565_v50 = vld [vmem:[#allocation7 + $0x1e8] sm:$0xf]  ;;  %v4422_v11 = vor.u32 %v6258_v2, %v4421_v0 }
  0xc5   :  { %2044 = vmatpush.bf16.msrb.mxu0 %v4898_v56  ;;  %v5119_v16 = vld [vmem:[#allocation7 + $0x650] sm:$0xf0]  ;;  %v6463_v18 = vld [vmem:[#allocation7 + $0x744] sm:$0xf]  ;;  %v4994_v21 = vor.u32 %v6399_v12, %v4991_v14  ;;  %v4566_v62 = vor.u32 %v6294_v52, %v4565_v50  ;;  %v6290_v5 = vld [vmem:[#allocation7 + $0x1d4] sm:$0xf0] }
  0xc6   :  { %2058 = vmatpush.bf16.msrb.mxu1 %v5026_v57  ;;  %v5247_v19 = vld [vmem:[#allocation7 + $0x750] sm:$0xf0]  ;;  %v5122_v22 = vor.u32 %v6431_v15, %v5119_v16  ;;  %v6363_v23 = vld [vmem:[#allocation7 + $0x424] sm:$0xf]  ;;  %v4821_v57 = vld [vmem:[#allocation7 + $0x3e8] sm:$0xf]  ;;  %v4550_v12 = vor.u32 %v6290_v5, %v4549_v3 }
  0xc7   :  { %2072 = vmatpush.bf16.msrb.mxu2 %v5154_v59  ;;  %v4847_v24 = vld [vmem:[#allocation7 + $0x430] sm:$0xf0]  ;;  %v6395_v25 = vld [vmem:[#allocation7 + $0x524] sm:$0xf]  ;;  %v5250_v26 = vor.u32 %v6463_v18, %v5247_v19  ;;  %v6358_v59 = vld [vmem:[#allocation7 + $0x3f4] sm:$0xf0] }
  0xc8   :  { %2086 = vmatpush.bf16.msrb.mxu3 %v5282_v63  ;;  %v4975_v27 = vld [vmem:[#allocation7 + $0x530] sm:$0xf0]  ;;  %v6427_v28 = vld [vmem:[#allocation7 + $0x624] sm:$0xf]  ;;  %v4850_v32 = vor.u32 %v6363_v23, %v4847_v24  ;;  %v4694_v63 = vor.u32 %v6326_v54, %v4693_v53  ;;  %v4822_v4 = vor.u32 %v6358_v59, %v4821_v57  ;;  %v6354_v9 = vld [vmem:[#allocation7 + $0x3d4] sm:$0xf0] }
  0xc9   :  { %2045 = vmatpush.bf16.msrb.mxu0 %v4882_v6  ;;  %v5103_v29 = vld [vmem:[#allocation7 + $0x630] sm:$0xf0]  ;;  %v6459_v30 = vld [vmem:[#allocation7 + $0x724] sm:$0xf]  ;;  %v4978_v35 = vor.u32 %v6395_v25, %v4975_v27  ;;  %v4677_v6 = vld [vmem:[#allocation7 + $0x2c8] sm:$0xf] }
  0xca   :  { %2059 = vmatpush.bf16.msrb.mxu1 %v5010_v7  ;;  %v5231_v31 = vld [vmem:[#allocation7 + $0x730] sm:$0xf0]  ;;  %v6359_v33 = vld [vmem:[#allocation7 + $0x404] sm:$0xf]  ;;  %v5106_v36 = vor.u32 %v6427_v28, %v5103_v29  ;;  %v6322_v7 = vld [vmem:[#allocation7 + $0x2d4] sm:$0xf0] }
  0xcb   :  { %2073 = vmatpush.bf16.msrb.mxu2 %v5138_v8  ;;  %v4831_v34 = vld [vmem:[#allocation7 + $0x410] sm:$0xf0]  ;;  %v6391_v37 = vld [vmem:[#allocation7 + $0x504] sm:$0xf]  ;;  %v5234_v41 = vor.u32 %v6459_v30, %v5231_v31  ;;  %v4805_v8 = vld [vmem:[#allocation7 + $0x3c8] sm:$0xf] }
  0xcc   :  { %2087 = vmatpush.bf16.msrb.mxu3 %v5266_v13  ;;  %v4959_v38 = vld [vmem:[#allocation7 + $0x510] sm:$0xf0]  ;;  %v6423_v40 = vld [vmem:[#allocation7 + $0x604] sm:$0xf]  ;;  %v4834_v51 = vor.u32 %v6359_v33, %v4831_v34  ;;  %v4678_v13 = vor.u32 %v6322_v7, %v4677_v6  ;;  %v4405_v14 = vld [vmem:[#allocation7 + $0xa8] sm:$0xf]  ;;  %v4806_v18 = vor.u32 %v6354_v9, %v4805_v8 }
  0xcd   :  { %2046 = vmatpush.bf16.msrb.mxu0 %v4866_v20  ;;  %v5087_v42 = vld [vmem:[#allocation7 + $0x610] sm:$0xf0]  ;;  %v6455_v45 = vld [vmem:[#allocation7 + $0x704] sm:$0xf]  ;;  %v4962_v55 = vor.u32 %v6391_v37, %v4959_v38  ;;  %v6254_v15 = vld [vmem:[#allocation7 + $0xb4] sm:$0xf0] }
  0xce   :  { %2060 = vmatpush.bf16.msrb.mxu1 %v4994_v21  ;;  %v5215_v46 = vld [vmem:[#allocation7 + $0x710] sm:$0xf0]  ;;  %v5090_v56 = vor.u32 %v6423_v40, %v5087_v42  ;;  %v4533_v16 = vld [vmem:[#allocation7 + $0x1a8] sm:$0xf]  ;;  %v6286_v19 = vld [vmem:[#allocation7 + $0x1b4] sm:$0xf0]  ;;  %v4406_v24 = vor.u32 %v6254_v15, %v4405_v14 }
  0xcf   :  { %2074 = vmatpush.bf16.msrb.mxu2 %v5122_v22  ;;  %v5218_v60 = vor.u32 %v6455_v45, %v5215_v46  ;;  %v4661_v20 = vld [vmem:[#allocation7 + $0x2a8] sm:$0xf]  ;;  %v6318_v21 = vld [vmem:[#allocation7 + $0x2b4] sm:$0xf0]  ;;  %v4534_v25 = vor.u32 %v6286_v19, %v4533_v16 }
  0xd0   :  { %2088 = vmatpush.bf16.msrb.mxu3 %v5250_v26  ;;  %v4789_v22 = vld [vmem:[#allocation7 + $0x3a8] sm:$0xf]  ;;  %v6350_v23 = vld [vmem:[#allocation7 + $0x3b4] sm:$0xf0]  ;;  %v4662_v26 = vor.u32 %v6318_v21, %v4661_v20 }
  0xd1   :  { %2047 = vmatpush.bf16.msrb.mxu0 %v4850_v32  ;;  %v4389_v27 = vld [vmem:[#allocation7 + $0x88] sm:$0xf]  ;;  %v6250_v28 = vld [vmem:[#allocation7 + $0x94] sm:$0xf0]  ;;  %v4790_v30 = vor.u32 %v6350_v23, %v4789_v22 }
  0xd2   :  { %2061 = vmatpush.bf16.msrb.mxu1 %v4978_v35  ;;  %v4517_v29 = vld [vmem:[#allocation7 + $0x188] sm:$0xf]  ;;  %v6282_v31 = vld [vmem:[#allocation7 + $0x194] sm:$0xf0] }
  0xd3   :  { %2075 = vmatpush.bf16.msrb.mxu2 %v5106_v36  ;;  %v4645_v32 = vld [vmem:[#allocation7 + $0x288] sm:$0xf]  ;;  %v6314_v33 = vld [vmem:[#allocation7 + $0x294] sm:$0xf0]  ;;  %v4390_v36 = vor.u32 %v6250_v28, %v4389_v27  ;;  %v4518_v37 = vor.u32 %v6282_v31, %v4517_v29 }
  0xd4   :  { %2089 = vmatpush.bf16.msrb.mxu3 %v5234_v41  ;;  %v4773_v34 = vld [vmem:[#allocation7 + $0x388] sm:$0xf]  ;;  %v6346_v35 = vld [vmem:[#allocation7 + $0x394] sm:$0xf0]  ;;  %v4646_v38 = vor.u32 %v6314_v33, %v4645_v32 }
  0xd5   :  { %2048 = vmatpush.bf16.msrb.mxu0 %v4834_v51  ;;  %v4373_v40 = vld [vmem:[#allocation7 + $0x68] sm:$0xf]  ;;  %v6246_v41 = vld [vmem:[#allocation7 + $0x74] sm:$0xf0]  ;;  %v4774_v45 = vor.u32 %v6346_v35, %v4773_v34 }
  0xd6   :  { %2062 = vmatpush.bf16.msrb.mxu1 %v4962_v55  ;;  %v4501_v42 = vld [vmem:[#allocation7 + $0x168] sm:$0xf]  ;;  %v6278_v46 = vld [vmem:[#allocation7 + $0x174] sm:$0xf0]  ;;  %v4374_v52 = vor.u32 %v6246_v41, %v4373_v40 }
  0xd7   :  { %2076 = vmatpush.bf16.msrb.mxu2 %v5090_v56  ;;  %v4629_v48 = vld [vmem:[#allocation7 + $0x268] sm:$0xf]  ;;  %v6310_v49 = vld [vmem:[#allocation7 + $0x274] sm:$0xf0]  ;;  %v4502_v53 = vor.u32 %v6278_v46, %v4501_v42 }
  0xd8   :  { %2090 = vmatpush.bf16.msrb.mxu3 %v5218_v60  ;;  %2049 = vmatmul.bf16.vlgmr.msrb.gmra.mxu0 %v7333_v39  ;;  %v4757_v50 = vld [vmem:[#allocation7 + $0x368] sm:$0xf]  ;;  %v6342_v51 = vld [vmem:[#allocation7 + $0x374] sm:$0xf0]  ;;  %v4630_v54 = vor.u32 %v6310_v49, %v4629_v48 }
  0xd9   :  { %2097 = vmatpush.bf16.msra.mxu0 %v4438_v61  ;;  %2063 = vmatmul.bf16.vlgmr.msrb.gmra.mxu1 %v7337_v44  ;;  %v4357_v55 = vld [vmem:[#allocation7 + $0x48] sm:$0xf]  ;;  %v6242_v56 = vld [vmem:[#allocation7 + $0x54] sm:$0xf0]  ;;  %v4758_v59 = vor.u32 %v6342_v51, %v4757_v50 }
  0xda   :  { %2111 = vmatpush.bf16.msra.mxu1 %v4566_v62  ;;  %2077 = vmatmul.bf16.vlgmr.msrb.gmra.mxu2 %v7335_v43  ;;  %v4485_v57 = vld [vmem:[#allocation7 + $0x148] sm:$0xf]  ;;  %v6274_v60 = vld [vmem:[#allocation7 + $0x154] sm:$0xf0]  ;;  %v4358_v2 = vor.u32 %v6242_v56, %v4357_v55 }
  0xdb   :  { %2125 = vmatpush.bf16.msra.mxu2 %v4694_v63  ;;  %2091 = vmatmul.bf16.vlgmr.msrb.gmra.mxu3 %v7339_v47  ;;  %v4613_v61 = vld [vmem:[#allocation7 + $0x248] sm:$0xf]  ;;  %v6306_v62 = vld [vmem:[#allocation7 + $0x254] sm:$0xf0]  ;;  %v4486_v3 = vor.u32 %v6274_v60, %v4485_v57 }
  0xdc   :  { %2139 = vmatpush.bf16.msra.mxu3 %v4822_v4  ;;  %v4741_v63 = vld [vmem:[#allocation7 + $0x348] sm:$0xf]  ;;  %v6338_v0 = vld [vmem:[#allocation7 + $0x354] sm:$0xf0]  ;;  %v4614_v4 = vor.u32 %v6306_v62, %v4613_v61 }
  0xdd   :  { %2098 = vmatpush.bf16.msra.mxu0 %v4422_v11  ;;  %v4341_v5 = vld [vmem:[#allocation7 + $0x28] sm:$0xf]  ;;  %v6238_v6 = vld [vmem:[#allocation7 + $0x34] sm:$0xf0]  ;;  %v4742_v8 = vor.u32 %v6338_v0, %v4741_v63 }
  0xde   :  { %2112 = vmatpush.bf16.msra.mxu1 %v4550_v12  ;;  %v4469_v7 = vld [vmem:[#allocation7 + $0x128] sm:$0xf]  ;;  %v6270_v9 = vld [vmem:[#allocation7 + $0x134] sm:$0xf0]  ;;  %v4342_v15 = vor.u32 %v6238_v6, %v4341_v5 }
  0xdf   :  { %2126 = vmatpush.bf16.msra.mxu2 %v4678_v13  ;;  %v4597_v11 = vld [vmem:[#allocation7 + $0x228] sm:$0xf]  ;;  %v6302_v12 = vld [vmem:[#allocation7 + $0x234] sm:$0xf0]  ;;  %v4470_v19 = vor.u32 %v6270_v9, %v4469_v7 }
  0xe0   :  { %2140 = vmatpush.bf16.msra.mxu3 %v4806_v18  ;;  %v4725_v13 = vld [vmem:[#allocation7 + $0x328] sm:$0xf]  ;;  %v6334_v14 = vld [vmem:[#allocation7 + $0x334] sm:$0xf0]  ;;  %v4598_v20 = vor.u32 %v6302_v12, %v4597_v11 }
  0xe1   :  { %2099 = vmatpush.bf16.msra.mxu0 %v4406_v24  ;;  %v4325_v16 = vld [vmem:[#allocation7 + $0x8] sm:$0xf]  ;;  %v6234_v18 = vld [vmem:[#allocation7 + $0x14] sm:$0xf0]  ;;  %v4726_v24 = vor.u32 %v6334_v14, %v4725_v13 }
  0xe2   :  { %2113 = vmatpush.bf16.msra.mxu1 %v4534_v25  ;;  %v4453_v21 = vld [vmem:[#allocation7 + $0x108] sm:$0xf]  ;;  %v6266_v22 = vld [vmem:[#allocation7 + $0x114] sm:$0xf0]  ;;  %v4326_v31 = vor.u32 %v6234_v18, %v4325_v16 }
  0xe3   :  { %2127 = vmatpush.bf16.msra.mxu2 %v4662_v26  ;;  %v4581_v23 = vld [vmem:[#allocation7 + $0x208] sm:$0xf]  ;;  %v6298_v25 = vld [vmem:[#allocation7 + $0x214] sm:$0xf0]  ;;  %v4454_v35 = vor.u32 %v6266_v22, %v4453_v21 }
  0xe4   :  { %2141 = vmatpush.bf16.msra.mxu3 %v4790_v30  ;;  %v4709_v26 = vld [vmem:[#allocation7 + $0x308] sm:$0xf]  ;;  %v6330_v27 = vld [vmem:[#allocation7 + $0x314] sm:$0xf0] }
  0xe5   :  { %2100 = vmatpush.bf16.msra.mxu0 %v4390_v36  ;;  %v4949_v28 = vld [vmem:[#allocation7 + $0x4e8] sm:$0xf]  ;;  %v6390_v29 = vld [vmem:[#allocation7 + $0x4f4] sm:$0xf0]  ;;  %v4582_v36 = vor.u32 %v6298_v25, %v4581_v23  ;;  %v4710_v40 = vor.u32 %v6330_v27, %v4709_v26 }
  0xe6   :  { %2114 = vmatpush.bf16.msra.mxu1 %v4518_v37  ;;  %v5077_v30 = vld [vmem:[#allocation7 + $0x5e8] sm:$0xf]  ;;  %v6422_v32 = vld [vmem:[#allocation7 + $0x5f4] sm:$0xf0]  ;;  %v4950_v41 = vor.u32 %v6390_v29, %v4949_v28 }
  0xe7   :  { %2128 = vmatpush.bf16.msra.mxu2 %v4646_v38  ;;  %v5205_v33 = vld [vmem:[#allocation7 + $0x6e8] sm:$0xf]  ;;  %v6454_v34 = vld [vmem:[#allocation7 + $0x6f4] sm:$0xf0]  ;;  %v5078_v42 = vor.u32 %v6422_v32, %v5077_v30 }
  0xe8   :  { %2142 = vmatpush.bf16.msra.mxu3 %v4774_v45  ;;  %v5333_v37 = vld [vmem:[#allocation7 + $0x7e8] sm:$0xf]  ;;  %v6486_v38 = vld [vmem:[#allocation7 + $0x7f4] sm:$0xf0]  ;;  %v5206_v45 = vor.u32 %v6454_v34, %v5205_v33 }
  0xe9   :  { %2101 = vmatpush.bf16.msra.mxu0 %v4374_v52  ;;  %v4933_v46 = vld [vmem:[#allocation7 + $0x4c8] sm:$0xf]  ;;  %v6386_v48 = vld [vmem:[#allocation7 + $0x4d4] sm:$0xf0]  ;;  %v5334_v50 = vor.u32 %v6486_v38, %v5333_v37 }
  0xea   :  { %2115 = vmatpush.bf16.msra.mxu1 %v4502_v53  ;;  %v5061_v49 = vld [vmem:[#allocation7 + $0x5c8] sm:$0xf]  ;;  %v6418_v51 = vld [vmem:[#allocation7 + $0x5d4] sm:$0xf0]  ;;  %v4934_v56 = vor.u32 %v6386_v48, %v4933_v46 }
  0xeb   :  { %2129 = vmatpush.bf16.msra.mxu2 %v4630_v54  ;;  %v5189_v52 = vld [vmem:[#allocation7 + $0x6c8] sm:$0xf]  ;;  %v6450_v53 = vld [vmem:[#allocation7 + $0x6d4] sm:$0xf0]  ;;  %v5062_v57 = vor.u32 %v6418_v51, %v5061_v49 }
  0xec   :  { %2143 = vmatpush.bf16.msra.mxu3 %v4758_v59  ;;  %v5317_v54 = vld [vmem:[#allocation7 + $0x7c8] sm:$0xf]  ;;  %v6482_v55 = vld [vmem:[#allocation7 + $0x7d4] sm:$0xf0]  ;;  %v5190_v59 = vor.u32 %v6450_v53, %v5189_v52 }
  0xed   :  { %2102 = vmatpush.bf16.msra.mxu0 %v4358_v2  ;;  %v4917_v60 = vld [vmem:[#allocation7 + $0x4a8] sm:$0xf]  ;;  %v6382_v61 = vld [vmem:[#allocation7 + $0x4b4] sm:$0xf0]  ;;  %v5318_v63 = vor.u32 %v6482_v55, %v5317_v54 }
  0xee   :  { %2116 = vmatpush.bf16.msra.mxu1 %v4486_v3  ;;  %v5045_v62 = vld [vmem:[#allocation7 + $0x5a8] sm:$0xf]  ;;  %v6414_v0 = vld [vmem:[#allocation7 + $0x5b4] sm:$0xf0]  ;;  %v4918_v6 = vor.u32 %v6382_v61, %v4917_v60 }
  0xef   :  { %2130 = vmatpush.bf16.msra.mxu2 %v4614_v4  ;;  %v5173_v2 = vld [vmem:[#allocation7 + $0x6a8] sm:$0xf]  ;;  %v6446_v3 = vld [vmem:[#allocation7 + $0x6b4] sm:$0xf0]  ;;  %v5046_v7 = vor.u32 %v6414_v0, %v5045_v62 }
  0xf0   :  { %2144 = vmatpush.bf16.msra.mxu3 %v4742_v8  ;;  %v5301_v4 = vld [vmem:[#allocation7 + $0x7a8] sm:$0xf]  ;;  %v6478_v5 = vld [vmem:[#allocation7 + $0x7b4] sm:$0xf0]  ;;  %v5174_v8 = vor.u32 %v6446_v3, %v5173_v2 }
  0xf1   :  { %2103 = vmatpush.bf16.msra.mxu0 %v4342_v15  ;;  %v4901_v9 = vld [vmem:[#allocation7 + $0x488] sm:$0xf]  ;;  %v6378_v11 = vld [vmem:[#allocation7 + $0x494] sm:$0xf0]  ;;  %v5302_v13 = vor.u32 %v6478_v5, %v5301_v4 }
  0xf2   :  { %2117 = vmatpush.bf16.msra.mxu1 %v4470_v19  ;;  %v5029_v12 = vld [vmem:[#allocation7 + $0x588] sm:$0xf]  ;;  %v6410_v14 = vld [vmem:[#allocation7 + $0x594] sm:$0xf0] }
  0xf3   :  { %2131 = vmatpush.bf16.msra.mxu2 %v4598_v20  ;;  %v5157_v15 = vld [vmem:[#allocation7 + $0x688] sm:$0xf]  ;;  %v6442_v16 = vld [vmem:[#allocation7 + $0x694] sm:$0xf0]  ;;  %v4902_v20 = vor.u32 %v6378_v11, %v4901_v9  ;;  %v5030_v21 = vor.u32 %v6410_v14, %v5029_v12  ;;  %v6260_v11 = vld [vmem:[#allocation7 + $0xec] sm:$0xf] }
  0xf4   :  { %2145 = vmatpush.bf16.msra.mxu3 %v4726_v24  ;;  %v5285_v18 = vld [vmem:[#allocation7 + $0x788] sm:$0xf]  ;;  %v6474_v19 = vld [vmem:[#allocation7 + $0x794] sm:$0xf0]  ;;  %v5158_v22 = vor.u32 %v6442_v16, %v5157_v15  ;;  %v4439_v12 = vld [vmem:[#allocation7 + $0xf8] sm:$0xf0] }
  0xf5   :  { %2104 = vmatpush.bf16.msra.mxu0 %v4326_v31  ;;  %v4885_v23 = vld [vmem:[#allocation7 + $0x468] sm:$0xf]  ;;  %v6374_v24 = vld [vmem:[#allocation7 + $0x474] sm:$0xf0]  ;;  %v5286_v26 = vor.u32 %v6474_v19, %v5285_v18  ;;  %v4567_v15 = vld [vmem:[#allocation7 + $0x1f8] sm:$0xf0] }
  0xf6   :  { %2118 = vmatpush.bf16.msra.mxu1 %v4454_v35  ;;  %v5013_v25 = vld [vmem:[#allocation7 + $0x568] sm:$0xf]  ;;  %v6406_v27 = vld [vmem:[#allocation7 + $0x574] sm:$0xf0]  ;;  %v4886_v32 = vor.u32 %v6374_v24, %v4885_v23  ;;  %v6324_v16 = vld [vmem:[#allocation7 + $0x2ec] sm:$0xf]  ;;  %v4442_v24 = vor.u32 %v6260_v11, %v4439_v12 }
  0xf7   :  { %2132 = vmatpush.bf16.msra.mxu2 %v4582_v36  ;;  %v5141_v28 = vld [vmem:[#allocation7 + $0x668] sm:$0xf]  ;;  %v6438_v29 = vld [vmem:[#allocation7 + $0x674] sm:$0xf0]  ;;  %v5014_v33 = vor.u32 %v6406_v27, %v5013_v25  ;;  %v4695_v18 = vld [vmem:[#allocation7 + $0x2f8] sm:$0xf0] }
  0xf8   :  { %2146 = vmatpush.bf16.msra.mxu3 %v4710_v40  ;;  %2105 = vmatmul.bf16.vlgmr.msra.gmra.mxu0 %v7321_v58  ;;  %v5269_v30 = vld [vmem:[#allocation7 + $0x768] sm:$0xf]  ;;  %v6470_v31 = vld [vmem:[#allocation7 + $0x774] sm:$0xf0]  ;;  %v5142_v34 = vor.u32 %v6438_v29, %v5141_v28  ;;  %v6256_v27 = vld [vmem:[#allocation7 + $0xcc] sm:$0xf] }
  0xf9   :  { %2153 = vmatpush.bf16.msrb.mxu0 %v4950_v41  ;;  %2119 = vmatmul.bf16.vlgmr.msra.gmra.mxu1 %v7327_v10  ;;  %v4869_v35 = vld [vmem:[#allocation7 + $0x448] sm:$0xf]  ;;  %v6370_v36 = vld [vmem:[#allocation7 + $0x454] sm:$0xf0]  ;;  %v5270_v38 = vor.u32 %v6470_v31, %v5269_v30  ;;  %v4423_v28 = vld [vmem:[#allocation7 + $0xd8] sm:$0xf0] }
  0xfa   :  { %2167 = vmatpush.bf16.msrb.mxu1 %v5078_v42  ;;  %2133 = vmatmul.bf16.vlgmr.msra.gmra.mxu2 %v7323_v1  ;;  %v4997_v37 = vld [vmem:[#allocation7 + $0x548] sm:$0xf]  ;;  %v6402_v40 = vld [vmem:[#allocation7 + $0x554] sm:$0xf0]  ;;  %v4870_v48 = vor.u32 %v6370_v36, %v4869_v35  ;;  %v6288_v29 = vld [vmem:[#allocation7 + $0x1cc] sm:$0xf]  ;;  %v4426_v36 = vor.u32 %v6256_v27, %v4423_v28 }
  0xfb   :  { %2181 = vmatpush.bf16.msrb.mxu2 %v5206_v45  ;;  %2147 = vmatmul.bf16.vlgmr.msra.gmra.mxu3 %v7329_v17  ;;  %v5125_v41 = vld [vmem:[#allocation7 + $0x648] sm:$0xf]  ;;  %v6434_v42 = vld [vmem:[#allocation7 + $0x654] sm:$0xf0]  ;;  %v4998_v49 = vor.u32 %v6402_v40, %v4997_v37  ;;  %v4551_v31 = vld [vmem:[#allocation7 + $0x1d8] sm:$0xf0] }
  0xfc   :  { %2195 = vmatpush.bf16.msrb.mxu3 %v5334_v50  ;;  %v5253_v45 = vld [vmem:[#allocation7 + $0x748] sm:$0xf]  ;;  %v6466_v46 = vld [vmem:[#allocation7 + $0x754] sm:$0xf0]  ;;  %v5126_v50 = vor.u32 %v6434_v42, %v5125_v41  ;;  %v4807_v35 = vld [vmem:[#allocation7 + $0x3d8] sm:$0xf0]  ;;  %v4554_v37 = vor.u32 %v6288_v29, %v4551_v31 }
  0xfd   :  { %2154 = vmatpush.bf16.msrb.mxu0 %v4934_v56  ;;  %v4853_v51 = vld [vmem:[#allocation7 + $0x428] sm:$0xf]  ;;  %v6366_v52 = vld [vmem:[#allocation7 + $0x434] sm:$0xf0]  ;;  %v5254_v54 = vor.u32 %v6466_v46, %v5253_v45  ;;  %v6252_v40 = vld [vmem:[#allocation7 + $0xac] sm:$0xf] }
  0xfe   :  { %2168 = vmatpush.bf16.msrb.mxu1 %v5062_v57  ;;  %v4981_v53 = vld [vmem:[#allocation7 + $0x528] sm:$0xf]  ;;  %v6398_v55 = vld [vmem:[#allocation7 + $0x534] sm:$0xf0]  ;;  %v4854_v61 = vor.u32 %v6366_v52, %v4853_v51  ;;  %v4407_v41 = vld [vmem:[#allocation7 + $0xb8] sm:$0xf0] }
  0xff   :  { %2182 = vmatpush.bf16.msrb.mxu2 %v5190_v59  ;;  %v5109_v56 = vld [vmem:[#allocation7 + $0x628] sm:$0xf]  ;;  %v6430_v57 = vld [vmem:[#allocation7 + $0x634] sm:$0xf0]  ;;  %v4982_v0 = vor.u32 %v6398_v55, %v4981_v53  ;;  %v6284_v42 = vld [vmem:[#allocation7 + $0x1ac] sm:$0xf]  ;;  %v4410_v52 = vor.u32 %v6252_v40, %v4407_v41 }
 0x100   :  { %2196 = vmatpush.bf16.msrb.mxu3 %v5318_v63  ;;  %v5237_v59 = vld [vmem:[#allocation7 + $0x728] sm:$0xf]  ;;  %v6462_v60 = vld [vmem:[#allocation7 + $0x734] sm:$0xf0]  ;;  %v5110_v2 = vor.u32 %v6430_v57, %v5109_v56  ;;  %v4535_v46 = vld [vmem:[#allocation7 + $0x1b8] sm:$0xf0] }
 0x101   :  { %2155 = vmatpush.bf16.msrb.mxu0 %v4918_v6  ;;  %v4837_v62 = vld [vmem:[#allocation7 + $0x408] sm:$0xf]  ;;  %v6362_v63 = vld [vmem:[#allocation7 + $0x414] sm:$0xf0]  ;;  %v5238_v6 = vor.u32 %v6462_v60, %v5237_v59  ;;  %v4791_v51 = vld [vmem:[#allocation7 + $0x3b8] sm:$0xf0]  ;;  %v4538_v53 = vor.u32 %v6284_v42, %v4535_v46 }
 0x102   :  { %2169 = vmatpush.bf16.msrb.mxu1 %v5046_v7  ;;  %v4965_v3 = vld [vmem:[#allocation7 + $0x508] sm:$0xf]  ;;  %v6394_v4 = vld [vmem:[#allocation7 + $0x514] sm:$0xf0]  ;;  %v4838_v14 = vor.u32 %v6362_v63, %v4837_v62  ;;  %v6248_v55 = vld [vmem:[#allocation7 + $0x8c] sm:$0xf] }
 0x103   :  { %2183 = vmatpush.bf16.msrb.mxu2 %v5174_v8  ;;  %v5093_v5 = vld [vmem:[#allocation7 + $0x608] sm:$0xf]  ;;  %v6426_v7 = vld [vmem:[#allocation7 + $0x614] sm:$0xf0]  ;;  %v4966_v19 = vor.u32 %v6394_v4, %v4965_v3  ;;  %v4391_v56 = vld [vmem:[#allocation7 + $0x98] sm:$0xf0]  ;;  %v7361_v3 = vpop.f32.mrf.mxu0 }
 0x104   :  { %2197 = vmatpush.bf16.msrb.mxu3 %v5302_v13  ;;  %v5221_v8 = vld [vmem:[#allocation7 + $0x708] sm:$0xf]  ;;  %v6458_v9 = vld [vmem:[#allocation7 + $0x714] sm:$0xf0]  ;;  %v6292_v13 = vld [vmem:[#allocation7 + $0x1ec] sm:$0xf] }
 0x105   :  { %2156 = vmatpush.bf16.msrb.mxu0 %v4902_v20  ;;  %v5094_v20 = vor.u32 %v6426_v7, %v5093_v5  ;;  %v5222_v23 = vor.u32 %v6458_v9, %v5221_v8  ;;  %v4570_v25 = vor.u32 %v6292_v13, %v4567_v15  ;;  %v6280_v57 = vld [vmem:[#allocation7 + $0x18c] sm:$0xf]  ;;  %v4519_v60 = vld [vmem:[#allocation7 + $0x198] sm:$0xf0]  ;;  %v7363_v9 = vpop.f32.mrf.mxu1 }
 0x106   :  { %2170 = vmatpush.bf16.msrb.mxu1 %v5030_v21  ;;  %v6356_v21 = vld [vmem:[#allocation7 + $0x3ec] sm:$0xf]  ;;  %v4647_v62 = vld [vmem:[#allocation7 + $0x298] sm:$0xf0]  ;;  %v4522_v4 = vor.u32 %v6280_v57, %v4519_v60 }
 0x107   :  { %2184 = vmatpush.bf16.msrb.mxu2 %v5158_v22  ;;  %v4823_v22 = vld [vmem:[#allocation7 + $0x3f8] sm:$0xf0]  ;;  %v6344_v63 = vld [vmem:[#allocation7 + $0x38c] sm:$0xf] }
 0x108   :  { %2198 = vmatpush.bf16.msrb.mxu3 %v5286_v26  ;;  %v4698_v26 = vor.u32 %v6324_v16, %v4695_v18  ;;  %v4826_v30 = vor.u32 %v6356_v21, %v4823_v22  ;;  %v4375_v7 = vld [vmem:[#allocation7 + $0x78] sm:$0xf0]  ;;  %v6276_v8 = vld [vmem:[#allocation7 + $0x16c] sm:$0xf] }
 0x109   :  { %2157 = vmatpush.bf16.msrb.mxu0 %v4886_v32  ;;  %v6320_v32 = vld [vmem:[#allocation7 + $0x2cc] sm:$0xf]  ;;  %v4503_v12 = vld [vmem:[#allocation7 + $0x178] sm:$0xf0] }
 0x10a   :  { %2171 = vmatpush.bf16.msrb.mxu1 %v5014_v33  ;;  %v4679_v33 = vld [vmem:[#allocation7 + $0x2d8] sm:$0xf0]  ;;  %v6308_v13 = vld [vmem:[#allocation7 + $0x26c] sm:$0xf] }
 0x10b   :  { %2185 = vmatpush.bf16.msrb.mxu2 %v5142_v34  ;;  %v6352_v34 = vld [vmem:[#allocation7 + $0x3cc] sm:$0xf]  ;;  %v4759_v16 = vld [vmem:[#allocation7 + $0x378] sm:$0xf0] }
 0x10c   :  { %2199 = vmatpush.bf16.msrb.mxu3 %v5270_v38  ;;  %v4682_v38 = vor.u32 %v6320_v32, %v4679_v33  ;;  %v4810_v45 = vor.u32 %v6352_v34, %v4807_v35  ;;  %v6340_v15 = vld [vmem:[#allocation7 + $0x36c] sm:$0xf]  ;;  %v4359_v22 = vld [vmem:[#allocation7 + $0x58] sm:$0xf0]  ;;  %v7367_v32 = vpop.f32.mrf.mxu3 }
 0x10d   :  { %2158 = vmatpush.bf16.msrb.mxu0 %v4870_v48  ;;  %v6316_v48 = vld [vmem:[#allocation7 + $0x2ac] sm:$0xf]  ;;  %v4615_v27 = vld [vmem:[#allocation7 + $0x258] sm:$0xf0] }
 0x10e   :  { %2172 = vmatpush.bf16.msrb.mxu1 %v4998_v49  ;;  %v4663_v49 = vld [vmem:[#allocation7 + $0x2b8] sm:$0xf0]  ;;  %v6240_v21 = vld [vmem:[#allocation7 + $0x4c] sm:$0xf] }
 0x10f   :  { %2186 = vmatpush.bf16.msrb.mxu2 %v5126_v50  ;;  %v6348_v50 = vld [vmem:[#allocation7 + $0x3ac] sm:$0xf]  ;;  %v4743_v29 = vld [vmem:[#allocation7 + $0x358] sm:$0xf0]  ;;  %v4362_v31 = vor.u32 %v6240_v21, %v4359_v22 }
 0x110   :  { %2200 = vmatpush.bf16.msrb.mxu3 %v5254_v54  ;;  %v4666_v54 = vor.u32 %v6316_v48, %v4663_v49  ;;  %v4794_v59 = vor.u32 %v6348_v50, %v4791_v51  ;;  %v6336_v28 = vld [vmem:[#allocation7 + $0x34c] sm:$0xf]  ;;  %v4471_v40 = vld [vmem:[#allocation7 + $0x138] sm:$0xf0]  ;;  %v7371_v49 = vpop.f32.mrf.mxu1 }
 0x111   :  { %2159 = vmatpush.bf16.msrb.mxu0 %v4854_v61  ;;  %v6312_v61 = vld [vmem:[#allocation7 + $0x28c] sm:$0xf]  ;;  %v4599_v42 = vld [vmem:[#allocation7 + $0x238] sm:$0xf0] }
 0x112   :  { %2173 = vmatpush.bf16.msrb.mxu1 %v4982_v0  ;;  %v4775_v0 = vld [vmem:[#allocation7 + $0x398] sm:$0xf0]  ;;  %v4650_v5 = vor.u32 %v6312_v61, %v4647_v62  ;;  %v6236_v35 = vld [vmem:[#allocation7 + $0x2c] sm:$0xf] }
 0x113   :  { %2187 = vmatpush.bf16.msrb.mxu2 %v5110_v2  ;;  %v4394_v2 = vor.u32 %v6248_v55, %v4391_v56  ;;  %v4778_v11 = vor.u32 %v6344_v63, %v4775_v0  ;;  %v6300_v41 = vld [vmem:[#allocation7 + $0x22c] sm:$0xf]  ;;  %v4727_v48 = vld [vmem:[#allocation7 + $0x338] sm:$0xf0] }
 0x114   :  { %2201 = vmatpush.bf16.msrb.mxu3 %v5238_v6  ;;  %v6244_v6 = vld [vmem:[#allocation7 + $0x6c] sm:$0xf]  ;;  %v4455_v56 = vld [vmem:[#allocation7 + $0x118] sm:$0xf0] }
 0x115   :  { %2160 = vmatpush.bf16.msrb.mxu0 %v4838_v14  ;;  %v4631_v14 = vld [vmem:[#allocation7 + $0x278] sm:$0xf0]  ;;  %v4378_v18 = vor.u32 %v6244_v6, %v4375_v7  ;;  %v6332_v46 = vld [vmem:[#allocation7 + $0x32c] sm:$0xf] }
 0x116   :  { %2174 = vmatpush.bf16.msrb.mxu1 %v4966_v19  ;;  %v4506_v19 = vor.u32 %v6276_v8, %v4503_v12  ;;  %v6232_v51 = vld [vmem:[#allocation7 + $0xc] sm:$0xf]  ;;  %v4583_v60 = vld [vmem:[#allocation7 + $0x218] sm:$0xf0] }
 0x117   :  { %2188 = vmatpush.bf16.msrb.mxu2 %v5094_v20  ;;  %v4634_v20 = vor.u32 %v6308_v13, %v4631_v14  ;;  %v6264_v55 = vld [vmem:[#allocation7 + $0x10c] sm:$0xf]  ;;  %v4711_v62 = vld [vmem:[#allocation7 + $0x318] sm:$0xf0] }
 0x118   :  { %2202 = vmatpush.bf16.msrb.mxu3 %v5222_v23  ;;  %2161 = vmatmul.bf16.vlgmr.msrb.gmra.mxu0 %v7333_v39  ;;  %v6272_v23 = vld [vmem:[#allocation7 + $0x14c] sm:$0xf]  ;;  %v4951_v0 = vld [vmem:[#allocation7 + $0x4f8] sm:$0xf0]  ;;  %v4458_v8 = vor.u32 %v6264_v55, %v4455_v56 }
 0x119   :  { %2209 = vmatpush.bf16.msra.mxu0 %v4442_v24  ;;  %2175 = vmatmul.bf16.vlgmr.msrb.gmra.mxu1 %v7337_v44  ;;  %v4762_v24 = vor.u32 %v6340_v15, %v4759_v16  ;;  %v6296_v57 = vld [vmem:[#allocation7 + $0x20c] sm:$0xf]  ;;  %v5207_v7 = vld [vmem:[#allocation7 + $0x6f8] sm:$0xf0] }
 0x11a   :  { %2223 = vmatpush.bf16.msra.mxu1 %v4570_v25  ;;  %2189 = vmatmul.bf16.vlgmr.msrb.gmra.mxu2 %v7335_v43  ;;  %v4487_v25 = vld [vmem:[#allocation7 + $0x158] sm:$0xf0]  ;;  %v6328_v61 = vld [vmem:[#allocation7 + $0x30c] sm:$0xf] }
 0x11b   :  { %2237 = vmatpush.bf16.msra.mxu2 %v4698_v26  ;;  %2203 = vmatmul.bf16.vlgmr.msrb.gmra.mxu3 %v7339_v47  ;;  %v6304_v26 = vld [vmem:[#allocation7 + $0x24c] sm:$0xf]  ;;  %v4490_v33 = vor.u32 %v6272_v23, %v4487_v25  ;;  %v5335_v13 = vld [vmem:[#allocation7 + $0x7f8] sm:$0xf0]  ;;  %v4714_v15 = vor.u32 %v6328_v61, %v4711_v62 }
 0x11c   :  { %2251 = vmatpush.bf16.msra.mxu3 %v4826_v30  ;;  %v7365_v30 = vpop.f32.mrf.mxu2  ;;  %v4618_v34 = vor.u32 %v6304_v26, %v4615_v27  ;;  %v6388_v63 = vld [vmem:[#allocation7 + $0x4ec] sm:$0xf]  ;;  %v4935_v22 = vld [vmem:[#allocation7 + $0x4d8] sm:$0xf0] }
 0x11d   :  { %2210 = vmatpush.bf16.msra.mxu0 %v4426_v36  ;;  %v4343_v36 = vld [vmem:[#allocation7 + $0x38] sm:$0xf0]  ;;  %v6452_v6 = vld [vmem:[#allocation7 + $0x6ec] sm:$0xf]  ;;  %v4954_v16 = vor.u32 %v6388_v63, %v4951_v0 }
 0x11e   :  { %2224 = vmatpush.bf16.msra.mxu1 %v4554_v37  ;;  %v6268_v37 = vld [vmem:[#allocation7 + $0x12c] sm:$0xf]  ;;  %v4346_v50 = vor.u32 %v6236_v35, %v4343_v36  ;;  %v5063_v25 = vld [vmem:[#allocation7 + $0x5d8] sm:$0xf0] }
 0x11f   :  { %2238 = vmatpush.bf16.msra.mxu2 %v4682_v38  ;;  %v4746_v38 = vor.u32 %v6336_v28, %v4743_v29  ;;  %v6484_v12 = vld [vmem:[#allocation7 + $0x7ec] sm:$0xf]  ;;  %v5191_v27 = vld [vmem:[#allocation7 + $0x6d8] sm:$0xf0] }
 0x120   :  { %2252 = vmatpush.bf16.msra.mxu3 %v4810_v45  ;;  %v7369_v45 = vpop.f32.mrf.mxu0  ;;  %v6384_v21 = vld [vmem:[#allocation7 + $0x4cc] sm:$0xf]  ;;  %v4903_v56 = vld [vmem:[#allocation7 + $0x498] sm:$0xf0] }
 0x121   :  { %2211 = vmatpush.bf16.msra.mxu0 %v4410_v52  ;;  %v4327_v52 = vld [vmem:[#allocation7 + $0x18] sm:$0xf0]  ;;  %v6416_v23 = vld [vmem:[#allocation7 + $0x5cc] sm:$0xf] }
 0x122   :  { %2225 = vmatpush.bf16.msra.mxu1 %v4538_v53  ;;  %v4474_v53 = vor.u32 %v6268_v37, %v4471_v40  ;;  %v6448_v26 = vld [vmem:[#allocation7 + $0x6cc] sm:$0xf]  ;;  %v5066_v35 = vor.u32 %v6416_v23, %v5063_v25  ;;  %v5159_v61 = vld [vmem:[#allocation7 + $0x698] sm:$0xf0] }
 0x123   :  { %2239 = vmatpush.bf16.msra.mxu2 %v4666_v54  ;;  %v4602_v54 = vor.u32 %v6300_v41, %v4599_v42  ;;  %v6480_v29 = vld [vmem:[#allocation7 + $0x7cc] sm:$0xf]  ;;  %v5194_v36 = vor.u32 %v6448_v26, %v5191_v27  ;;  %v5047_v42 = vld [vmem:[#allocation7 + $0x5b8] sm:$0xf0] }
 0x124   :  { %2253 = vmatpush.bf16.msra.mxu3 %v4794_v59  ;;  %v4730_v59 = vor.u32 %v6332_v46, %v4727_v48  ;;  %v7373_v14 = vpop.f32.mrf.mxu2  ;;  %v6380_v37 = vld [vmem:[#allocation7 + $0x4ac] sm:$0xf]  ;;  %v5175_v48 = vld [vmem:[#allocation7 + $0x6b8] sm:$0xf0] }
 0x125   :  { %2212 = vmatpush.bf16.msra.mxu0 %v4394_v2  ;;  %v6420_v2 = vld [vmem:[#allocation7 + $0x5ec] sm:$0xf]  ;;  %v5287_v63 = vld [vmem:[#allocation7 + $0x798] sm:$0xf0] }
 0x126   :  { %2226 = vmatpush.bf16.msra.mxu1 %v4522_v4  ;;  %v4330_v4 = vor.u32 %v6232_v51, %v4327_v52  ;;  %v6412_v40 = vld [vmem:[#allocation7 + $0x5ac] sm:$0xf]  ;;  %v5303_v51 = vld [vmem:[#allocation7 + $0x7b8] sm:$0xf0] }
 0x127   :  { %2240 = vmatpush.bf16.msra.mxu2 %v4650_v5  ;;  %v5079_v5 = vld [vmem:[#allocation7 + $0x5f8] sm:$0xf0]  ;;  %v6444_v46 = vld [vmem:[#allocation7 + $0x6ac] sm:$0xf] }
 0x128   :  { %2254 = vmatpush.bf16.msra.mxu3 %v4778_v11  ;;  %v4586_v11 = vor.u32 %v6296_v57, %v4583_v60  ;;  %v7377_v28 = vpop.f32.mrf.mxu0  ;;  %v6376_v55 = vld [vmem:[#allocation7 + $0x48c] sm:$0xf]  ;;  %v4999_v27 = vld [vmem:[#allocation7 + $0x558] sm:$0xf0] }
 0x129   :  { %2213 = vmatpush.bf16.msra.mxu0 %v4378_v18  ;;  %v7375_v18 = vpop.f32.mrf.mxu3  ;;  %v6440_v60 = vld [vmem:[#allocation7 + $0x68c] sm:$0xf] }
 0x12a   :  { %2227 = vmatpush.bf16.msra.mxu1 %v4506_v19  ;;  %v5082_v19 = vor.u32 %v6420_v2, %v5079_v5  ;;  %v6372_v5 = vld [vmem:[#allocation7 + $0x46c] sm:$0xf] }
 0x12b   :  { %2241 = vmatpush.bf16.msra.mxu2 %v4634_v20  ;;  %v5210_v20 = vor.u32 %v6452_v6, %v5207_v7  ;;  %v4887_v6 = vld [vmem:[#allocation7 + $0x478] sm:$0xf0]  ;;  %v6404_v7 = vld [vmem:[#allocation7 + $0x56c] sm:$0xf] }
 0x12c   :  { %2255 = vmatpush.bf16.msra.mxu3 %v4762_v24  ;;  %v5338_v24 = vor.u32 %v6484_v12, %v5335_v13  ;;  %v7385_v57 = vpop.f32.mrf.mxu2  ;;  %v5015_v12 = vld [vmem:[#allocation7 + $0x578] sm:$0xf0]  ;;  %v6436_v13 = vld [vmem:[#allocation7 + $0x66c] sm:$0xf] }
 0x12d   :  { %2214 = vmatpush.bf16.msra.mxu0 %v4362_v31  ;;  %v5319_v31 = vld [vmem:[#allocation7 + $0x7d8] sm:$0xf0]  ;;  %v6368_v23 = vld [vmem:[#allocation7 + $0x44c] sm:$0xf] }
 0x12e   :  { %2228 = vmatpush.bf16.msra.mxu1 %v4490_v33  ;;  %v7379_v33 = vpop.f32.mrf.mxu1  ;;  %v5322_v41 = vor.u32 %v6480_v29, %v5319_v31  ;;  %v6400_v25 = vld [vmem:[#allocation7 + $0x54c] sm:$0xf]  ;;  %v5127_v31 = vld [vmem:[#allocation7 + $0x658] sm:$0xf0] }
 0x12f   :  { %2242 = vmatpush.bf16.msra.mxu2 %v4618_v34  ;;  %v4938_v34 = vor.u32 %v6384_v21, %v4935_v22  ;;  %v5018_v21 = vor.u32 %v6404_v7, %v5015_v12  ;;  %v6432_v29 = vld [vmem:[#allocation7 + $0x64c] sm:$0xf]  ;;  %v5223_v12 = vld [vmem:[#allocation7 + $0x718] sm:$0xf0] }
 0x130   :  { %2256 = vmatpush.bf16.msra.mxu3 %v4746_v38  ;;  %v4919_v38 = vld [vmem:[#allocation7 + $0x4b8] sm:$0xf0]  ;;  %v7389_v0 = vpop.f32.mrf.mxu0  ;;  %v6456_v7 = vld [vmem:[#allocation7 + $0x70c] sm:$0xf] }
 0x131   :  { %2215 = vmatpush.bf16.msra.mxu0 %v4346_v50  ;;  %v6476_v50 = vld [vmem:[#allocation7 + $0x7ac] sm:$0xf]  ;;  %v4922_v52 = vor.u32 %v6380_v37, %v4919_v38  ;;  %v7387_v62 = vpop.f32.mrf.mxu3 }
 0x132   :  { %2229 = vmatpush.bf16.msra.mxu1 %v4474_v53  ;;  %v5050_v53 = vor.u32 %v6412_v40, %v5047_v42  ;;  %v5002_v40 = vor.u32 %v6400_v25, %v4999_v27  ;;  %v5226_v25 = vor.u32 %v6456_v7, %v5223_v12  ;;  %v7417_v12 = vld [vmem:[#allocation10] sm:$0xf] }
 0x133   :  { %2243 = vmatpush.bf16.msra.mxu2 %v4602_v54  ;;  %v5178_v54 = vor.u32 %v6444_v46, %v5175_v48  ;;  %v6364_v46 = vld [vmem:[#allocation7 + $0x42c] sm:$0xf]  ;;  %v4855_v48 = vld [vmem:[#allocation7 + $0x438] sm:$0xf0] }
 0x134   :  { %2257 = vmatpush.bf16.msra.mxu3 %v4730_v59  ;;  %v5306_v59 = vor.u32 %v6476_v50, %v5303_v51  ;;  %v6396_v50 = vld [vmem:[#allocation7 + $0x52c] sm:$0xf] }
 0x135   :  { %2216 = vmatpush.bf16.msra.mxu0 %v4330_v4  ;;  %v5162_v4 = vor.u32 %v6440_v60, %v5159_v61  ;;  %v6360_v60 = vld [vmem:[#allocation7 + $0x40c] sm:$0xf] }
 0x136   :  { %2230 = vmatpush.bf16.msra.mxu1 %v4458_v8  ;;  %v7391_v8 = vpop.f32.mrf.mxu1 }
 0x137   :  { %2244 = vmatpush.bf16.msra.mxu2 %v4586_v11 }
 0x138   :  { %2258 = vmatpush.bf16.msra.mxu3 %v4714_v15  ;;  %2217 = vmatmul.bf16.vlgmr.msra.gmra.mxu0 %v7321_v58  ;;  %v6472_v58 = vld [vmem:[#allocation7 + $0x78c] sm:$0xf]  ;;  %v5143_v15 = vld [vmem:[#allocation7 + $0x678] sm:$0xf0]  ;;  %v1994_v42 = vpop.f32.mrf.mxu0 }
 0x139   :  { %2265 = vmatpush.bf16.msrb.mxu0 %v4954_v16  ;;  %2231 = vmatmul.bf16.vlgmr.msra.gmra.mxu1 %v7327_v10  ;;  %v4906_v10 = vor.u32 %v6376_v55, %v4903_v56  ;;  %v5290_v11 = vor.u32 %v6472_v58, %v5287_v63  ;;  %v6468_v16 = vld [vmem:[#allocation7 + $0x76c] sm:$0xf]  ;;  %v5146_v22 = vor.u32 %v6436_v13, %v5143_v15  ;;  %v7395_v38 = vpop.f32.mrf.mxu3  ;;  %v4839_v63 = vld [vmem:[#allocation7 + $0x418] sm:$0xf0] }
 0x13a   :  { %2279 = vmatpush.bf16.msrb.mxu1 %v5082_v19  ;;  %2245 = vmatmul.bf16.vlgmr.msra.gmra.mxu2 %v7323_v1  ;;  %v6408_v1 = vld [vmem:[#allocation7 + $0x58c] sm:$0xf]  ;;  %v5271_v19 = vld [vmem:[#allocation7 + $0x778] sm:$0xf0]  ;;  %v4842_v15 = vor.u32 %v6360_v60, %v4839_v63 }
 0x13b   :  { %2293 = vmatpush.bf16.msrb.mxu2 %v5210_v20  ;;  %2259 = vmatmul.bf16.vlgmr.msra.gmra.mxu3 %v7329_v17  ;;  %v5031_v17 = vld [vmem:[#allocation7 + $0x598] sm:$0xf0]  ;;  %v4890_v20 = vor.u32 %v6372_v5, %v4887_v6  ;;  %v5274_v26 = vor.u32 %v6468_v16, %v5271_v19  ;;  %v6460_v56 = vld [vmem:[#allocation7 + $0x72c] sm:$0xf]  ;;  %v5461_v16 = vld [vmem:[#allocation11 + $0xf0] sm:$0xf] }
 0x13c   :  { %2307 = vmatpush.bf16.msrb.mxu3 %v5338_v24  ;;  %v5034_v2 = vor.u32 %v6408_v1, %v5031_v17  ;;  %v4871_v24 = vld [vmem:[#allocation7 + $0x458] sm:$0xf0]  ;;  %v4858_v17 = vor.u32 %v6364_v46, %v4855_v48  ;;  %v6424_v5 = vld [vmem:[#allocation7 + $0x60c] sm:$0xf]  ;;  %v6518_v19 = vld [vmem:[#allocation11 + $0xf4] sm:$0xf0] }
 0x13d   :  { %2266 = vmatpush.bf16.msrb.mxu0 %v4938_v34  ;;  %v6464_v34 = vld [vmem:[#allocation7 + $0x74c] sm:$0xf]  ;;  %v4874_v37 = vor.u32 %v6368_v23, %v4871_v24  ;;  %v5239_v1 = vld [vmem:[#allocation7 + $0x738] sm:$0xf0]  ;;  %v5381_v46 = vld [vmem:[#allocation11 + $0x50] sm:$0xf] }
 0x13e   :  { %2280 = vmatpush.bf16.msrb.mxu1 %v5066_v35  ;;  %v5255_v35 = vld [vmem:[#allocation7 + $0x758] sm:$0xf0]  ;;  %v2008_v55 = vpop.f32.mrf.mxu1  ;;  %v6498_v48 = vld [vmem:[#allocation11 + $0x54] sm:$0xf0] }
 0x13f   :  { %2294 = vmatpush.bf16.msrb.mxu2 %v5194_v36  ;;  %v7393_v36 = vpop.f32.mrf.mxu2  ;;  %v5258_v51 = vor.u32 %v6464_v34, %v5255_v35  ;;  %v5095_v6 = vld [vmem:[#allocation7 + $0x618] sm:$0xf0]  ;;  %v2009_v24 = vadd.f32 %v2008_v55, %v1994_v42  ;;  %v5453_v34 = vld [vmem:[#allocation11 + $0xe0] sm:$0xf]  ;;  %v6516_v35 = vld [vmem:[#allocation11 + $0xe4] sm:$0xf0] }
 0x140   :  { %2308 = vmatpush.bf16.msrb.mxu3 %v5322_v41  ;;  %v5130_v41 = vor.u32 %v6432_v29, %v5127_v31  ;;  %v1996_v27 = vpop.f32.mrf.mxu0  ;;  %v5389_v29 = vld [vmem:[#allocation11 + $0x60] sm:$0xf] }
 0x141   :  { %2267 = vmatpush.bf16.msrb.mxu0 %v4922_v52  ;;  %v4983_v52 = vld [vmem:[#allocation7 + $0x538] sm:$0xf0]  ;;  %v2036_v23 = vpop.f32.mrf.mxu3 }
 0x142   :  { %2281 = vmatpush.bf16.msrb.mxu1 %v5050_v53  ;;  %v6428_v53 = vld [vmem:[#allocation7 + $0x62c] sm:$0xf]  ;;  %v4986_v61 = vor.u32 %v6396_v50, %v4983_v52  ;;  %v5445_v50 = vld [vmem:[#allocation11 + $0xd0] sm:$0xf] }
 0x143   :  { %2295 = vmatpush.bf16.msrb.mxu2 %v5178_v54  ;;  %v5111_v54 = vld [vmem:[#allocation7 + $0x638] sm:$0xf0] }
 0x144   :  { %2309 = vmatpush.bf16.msrb.mxu3 %v5306_v59  ;;  %v1897_v59 = vadd.f32 %v7363_v9, %v7361_v3  ;;  %v5114_v58 = vor.u32 %v6428_v53, %v5111_v54  ;;  %v5397_v3 = vld [vmem:[#allocation11 + $0x70] sm:$0xf]  ;;  %v6502_v9 = vld [vmem:[#allocation11 + $0x74] sm:$0xf0] }
 0x145   :  { %2268 = vmatpush.bf16.msrb.mxu0 %v4906_v10  ;;  %v6392_v10 = vld [vmem:[#allocation7 + $0x50c] sm:$0xf] }
 0x146   :  { %2282 = vmatpush.bf16.msrb.mxu1 %v5034_v2  ;;  %v4967_v2 = vld [vmem:[#allocation7 + $0x518] sm:$0xf0]  ;;  %v1911_v13 = vadd.f32 %v7365_v30, %v1897_v59  ;;  %v6500_v30 = vld [vmem:[#allocation11 + $0x64] sm:$0xf0] }
 0x147   :  { %2296 = vmatpush.bf16.msrb.mxu2 %v5162_v4  ;;  %v5242_v4 = vor.u32 %v6460_v56, %v5239_v1  ;;  %v5373_v56 = vld [vmem:[#allocation11 + $0x40] sm:$0xf]  ;;  %v6496_v1 = vld [vmem:[#allocation11 + $0x44] sm:$0xf0] }
 0x148   :  { %2310 = vmatpush.bf16.msrb.mxu3 %v5290_v11  ;;  %v1899_v11 = vadd.f32 %v7371_v49, %v7369_v45  ;;  %v5462_v49 = vor.u32 %v6518_v19, %v5461_v16  ;;  %v1925_v31 = vadd.f32 %v7367_v32, %v1911_v13  ;;  %v6512_v59 = vld [vmem:[#allocation11 + $0xc4] sm:$0xf0]  ;;  %v5421_v19 = vld [vmem:[#allocation11 + $0xa0] sm:$0xf] }
 0x149   :  { %2269 = vmatpush.bf16.msrb.mxu0 %v4890_v20  ;;  %v2022_v20 = vpop.f32.mrf.mxu2  ;;  %v2038_v55 = vpop.f32.mrf.mxu3  ;;  %v6492_v13 = vld [vmem:[#allocation11 + $0x24] sm:$0xf0] }
 0x14a   :  { %2283 = vmatpush.bf16.msrb.mxu1 %v5018_v21  ;;  %v4970_v21 = vor.u32 %v6392_v10, %v4967_v2  ;;  %v1913_v45 = vadd.f32 %v7373_v14, %v1899_v11  ;;  %v5454_v14 = vor.u32 %v6516_v35, %v5453_v34  ;;  %v1939_v32 = vadd.f32 %v7377_v28, %v1925_v31  ;;  %v5365_v10 = vld [vmem:[#allocation11 + $0x30] sm:$0xf]  ;;  %v6494_v2 = vld [vmem:[#allocation11 + $0x34] sm:$0xf0] }
 0x14b   :  { %2297 = vmatpush.bf16.msrb.mxu2 %v5146_v22  ;;  %v5098_v22 = vor.u32 %v6424_v5, %v5095_v6  ;;  %v5429_v5 = vld [vmem:[#allocation11 + $0xb0] sm:$0xf]  ;;  %v7415_v6 = vld [vmem:[#allocation8] sm:$0xf]  ;;  %v5366_v11 = vor.u32 %v6494_v2, %v5365_v10  ;;  %v6499_v2 = vld [vmem:[#allocation11 + $0x64] sm:$0xf] }
 0x14c   :  { %2311 = vmatpush.bf16.msrb.mxu3 %v5274_v26  ;;  %v5398_v26 = vor.u32 %v6502_v9, %v5397_v3  ;;  %v1927_v42 = vadd.f32 %v7375_v18, %v1913_v45  ;;  %v5382_v18 = vor.u32 %v6498_v48, %v5381_v46  ;;  %v1953_v28 = vadd.f32 %v7379_v33, %v1939_v32  ;;  %v6510_v33 = vld [vmem:[#allocation11 + $0xb4] sm:$0xf0]  ;;  %v5357_v9 = vld [vmem:[#allocation11 + $0x20] sm:$0xf]  ;;  %v5525_v35 = vld [vmem:[#allocation11 + $0x170] sm:$0xf] }
 0x14d   :  { %2270 = vmatpush.bf16.msrb.mxu0 %v4874_v37  ;;  %v2010_v37 = vpop.f32.mrf.mxu1  ;;  %v6506_v34 = vld [vmem:[#allocation11 + $0x94] sm:$0xf0]  ;;  %v5341_v46 = vld [vmem:[#allocation11] sm:$0xf]  ;;  %v6488_v48 = vld [vmem:[#allocation11 + $0x4] sm:$0xf0] }
 0x14e   :  { %2284 = vmatpush.bf16.msrb.mxu1 %v5002_v40  ;;  %v2023_v40 = vadd.f32 %v2022_v20, %v2009_v24  ;;  %v1941_v52 = vadd.f32 %v7389_v0, %v1927_v42  ;;  %v6508_v20 = vld [vmem:[#allocation11 + $0xa4] sm:$0xf0] }
 0x14f   :  { %2298 = vmatpush.bf16.msrb.mxu2 %v5130_v41  ;;  %v5390_v41 = vor.u32 %v6500_v30, %v5389_v29  ;;  %v6490_v29 = vld [vmem:[#allocation11 + $0x14] sm:$0xf0] }
 0x150   :  { %2312 = vmatpush.bf16.msrb.mxu3 %v5258_v51  ;;  %v6514_v51 = vld [vmem:[#allocation11 + $0xd4] sm:$0xf0]  ;;  %v2037_v53 = vadd.f32 %v2036_v23, %v2023_v40 }
 0x151   :  { %2271 = vmatpush.bf16.msrb.mxu0 %v4858_v17  ;;  %v2024_v54 = vpop.f32.mrf.mxu2  ;;  %v2011_v17 = vadd.f32 %v2010_v37, %v1996_v27  ;;  %v5349_v27 = vld [vmem:[#allocation11 + $0x10] sm:$0xf]  ;;  %v6534_v37 = vld [vmem:[#allocation11 + $0x174] sm:$0xf0] }
 0x152   :  { %2285 = vmatpush.bf16.msrb.mxu1 %v4986_v61  ;;  %v5526_v42 = vor.u32 %v6534_v37, %v5525_v35  ;;  %v6511_v37 = vld [vmem:[#allocation11 + $0xc4] sm:$0xf] }
 0x153   :  { %2299 = vmatpush.bf16.msrb.mxu2 %v5114_v58  ;;  %v2025_v7 = vadd.f32 %v2024_v54, %v2011_v17  ;;  %v6517_v17 = vld [vmem:[#allocation11 + $0xf4] sm:$0xf] }
 0x154   :  { %2313 = vmatpush.bf16.msrb.mxu3 %v5242_v4  ;;  %v1967_v4 = vadd.f32 %v7385_v57, %v1953_v28  ;;  %v2323_v57 = vperm.slane %v7415_v6, 0 }
 0x155   :  { %2272 = vmatpush.bf16.msrb.mxu0 %v4842_v15  ;;  %v2050_v60 = vpop.f32.mrf.mxu0 }
 0x156   :  { %2286 = vmatpush.bf16.msrb.mxu1 %v4970_v21  ;;  %v2051_v0 = vadd.f32 %v2050_v60, %v2037_v53  ;;  %v2064_v61 = vpop.f32.mrf.mxu1  ;;  %v1981_v15 = vadd.f32 %v7387_v62, %v1967_v4  ;;  %v2039_v21 = vadd.f32 %v2038_v55, %v2025_v7  ;;  %v5413_v62 = vld [vmem:[#allocation11 + $0x90] sm:$0xf]  ;;  %v6504_v53 = vld [vmem:[#allocation11 + $0x84] sm:$0xf0]  ;;  %v5399_v55 = vld [vmem:[#allocation11 + $0x78] sm:$0xf0] }
 0x157   :  { %2300 = vmatpush.bf16.msrb.mxu2 %v5098_v22  ;;  %v5463_v60 = vld [vmem:[#allocation11 + $0xf8] sm:$0xf0]  ;;  %v6530_v7 = vld [vmem:[#allocation11 + $0x154] sm:$0xf0] }
 0x158   :  { %2314 = vmatpush.bf16.msrb.mxu3 %v5226_v25  ;;  %2273 = vmatmul.bf16.vlgmr.msrb.gmra.mxu0 %v7333_v39  ;;  %v5446_v39 = vor.u32 %v6514_v51, %v5445_v50  ;;  %v2341_v25 = vperm.slane %v7417_v12, 0  ;;  %v2331_v30 = vmul.f32 %v2323_v57, %v1981_v15  ;;  %v5414_v51 = vor.u32 %v6506_v34, %v5413_v62  ;;  %v5375_v34 = vld [vmem:[#allocation11 + $0x48] sm:$0xf0] }
 0x159   :  { %2753 = vmatpush.bf16.msra.mxu0 %v5398_v26  ;;  %2287 = vmatmul.bf16.vlgmr.msrb.gmra.mxu1 %v7337_v44  ;;  %v5437_v44 = vld [vmem:[#allocation11 + $0xc0] sm:$0xf]  ;;  %v5358_v26 = vor.u32 %v6492_v13, %v5357_v9  ;;  %v5466_v4 = vor.u32 %v6517_v17, %v5463_v60  ;;  %v5455_v9 = vld [vmem:[#allocation11 + $0xe8] sm:$0xf0]  ;;  %v5351_v17 = vld [vmem:[#allocation11 + $0x18] sm:$0xf0] }
 0x15a   :  { %2767 = vmatpush.bf16.msra.mxu1 %v5462_v49  ;;  %2301 = vmatmul.bf16.vlgmr.msrb.gmra.mxu2 %v7335_v43  ;;  %v1955_v43 = vadd.f32 %v7391_v8, %v1941_v52  ;;  %v5438_v63 = vor.u32 %v6512_v59, %v5437_v44  ;;  %v2065_v8 = vadd.f32 %v2064_v61, %v2051_v0  ;;  %v5405_v52 = vld [vmem:[#allocation11 + $0x80] sm:$0xf]  ;;  %v2342_v44 = vperm.slane %v7417_v12, 1 }
 0x15b   :  { %2315 = vmatmul.bf16.vlgmr.msrb.gmra.mxu3 %v7339_v47  ;;  %v5374_v47 = vor.u32 %v6496_v1, %v5373_v56  ;;  %v5422_v49 = vor.u32 %v6508_v20, %v5421_v19  ;;  %2781 = vmatpush.bf16.msra.mxu2 %v5526_v42  ;;  %v2349_v54 = vadd.f32 %v2341_v25, %v2331_v30  ;;  %v5517_v56 = vld [vmem:[#allocation11 + $0x160] sm:$0xf]  ;;  %v6532_v1 = vld [vmem:[#allocation11 + $0x164] sm:$0xf0]  ;;  %v6497_v19 = vld [vmem:[#allocation11 + $0x54] sm:$0xf] }
 0x15c   :  { %v1969_v58 = vadd.f32 %v7393_v36, %v1955_v43  ;;  %v5430_v36 = vor.u32 %v6510_v33, %v5429_v5  ;;  %v5518_v0 = vor.u32 %v6532_v1, %v5517_v56  ;;  %v5391_v5 = vld [vmem:[#allocation11 + $0x68] sm:$0xf0]  ;;  %v5509_v33 = vld [vmem:[#allocation11 + $0x150] sm:$0xf]  ;;  %v5501_v20 = vld [vmem:[#allocation11 + $0x140] sm:$0xf] }
 0x15d   :  { %2754 = vmatpush.bf16.msra.mxu0 %v5390_v41  ;;  %v2078_v16 = vpop.f32.mrf.mxu2  ;;  %v2052_v23 = vpop.f32.mrf.mxu0  ;;  %v2324_v41 = vperm.slane %v7415_v6, 1  ;;  %v5510_v13 = vor.u32 %v6530_v7, %v5509_v33  ;;  %v6493_v42 = vld [vmem:[#allocation11 + $0x34] sm:$0xf]  ;;  %v6522_v56 = vld [vmem:[#allocation11 + $0x114] sm:$0xf0] }
 0x15e   :  { %2768 = vmatpush.bf16.msra.mxu1 %v5454_v14  ;;  %v1983_v3 = vadd.f32 %v7395_v38, %v1969_v58  ;;  %v2079_v22 = vadd.f32 %v2078_v16, %v2065_v8  ;;  %v2092_v24 = vpop.f32.mrf.mxu3  ;;  %v2053_v45 = vadd.f32 %v2052_v23, %v2039_v21  ;;  %v2066_v31 = vpop.f32.mrf.mxu1  ;;  %v5350_v14 = vor.u32 %v6490_v29, %v5349_v27  ;;  %v6528_v21 = vld [vmem:[#allocation11 + $0x144] sm:$0xf0]  ;;  %v5383_v23 = vld [vmem:[#allocation11 + $0x58] sm:$0xf0]  ;;  %v6526_v27 = vld [vmem:[#allocation11 + $0x134] sm:$0xf0] }
 0x15f   :  { %2782 = vmatpush.bf16.msra.mxu2 %v5518_v0  ;;  %v2357_v8 = vmax.f32 %v2349_v54, 0.0  ;;  %v5394_v16 = vor.u32 %v6499_v2, %v5391_v5  ;;  %v5386_v62 = vor.u32 %v6497_v19, %v5383_v23  ;;  %v6507_v1 = vld [vmem:[#allocation11 + $0xa4] sm:$0xf]  ;;  %v6505_v0 = vld [vmem:[#allocation11 + $0x94] sm:$0xf] }
 0x160   :  { %v2335_v38 = vmul.f32 %v2323_v57, %v1983_v3  ;;  %v2093_v40 = vadd.f32 %v2092_v24, %v2079_v22  ;;  %v2067_v50 = vadd.f32 %v2066_v31, %v2053_v45  ;;  %v6513_v24 = vld [vmem:[#allocation11 + $0xd4] sm:$0xf]  ;;  %v6495_v31 = vld [vmem:[#allocation11 + $0x44] sm:$0xf] }
 0x161   :  { %2755 = vmatpush.bf16.msra.mxu0 %v5382_v18  ;;  %v6501_v18 = vld [vmem:[#allocation11 + $0x74] sm:$0xf] }
 0x162   :  { %2769 = vmatpush.bf16.msra.mxu1 %v5446_v39  ;;  %v2353_v32 = vadd.f32 %v2341_v25, %v2335_v38  ;;  %v2332_v28 = vmul.f32 %v2324_v41, %v2093_v40  ;;  %v5402_v10 = vor.u32 %v6501_v18, %v5399_v55  ;;  %v5447_v25 = vld [vmem:[#allocation11 + $0xd8] sm:$0xf0]  ;;  %v5439_v40 = vld [vmem:[#allocation11 + $0xc8] sm:$0xf0]  ;;  %v6491_v18 = vld [vmem:[#allocation11 + $0x24] sm:$0xf] }
 0x163   :  { %2783 = vmatpush.bf16.msra.mxu2 %v5510_v13  ;;  %v5450_v30 = vor.u32 %v6513_v24, %v5447_v25  ;;  %v5477_v55 = vld [vmem:[#allocation11 + $0x110] sm:$0xf]  ;;  %v6533_v2 = vld [vmem:[#allocation11 + $0x174] sm:$0xf]  ;;  %v6531_v13 = vld [vmem:[#allocation11 + $0x164] sm:$0xf] }
 0x164   :  { %v2361_v61 = vmax.f32 %v2353_v32, 0.0  ;;  %v6524_v32 = vld [vmem:[#allocation11 + $0x124] sm:$0xf0]  ;;  %v6529_v23 = vld [vmem:[#allocation11 + $0x154] sm:$0xf] }
 0x165   :  { %2756 = vmatpush.bf16.msra.mxu0 %v5374_v47  ;;  %v2080_v39 = vpop.f32.mrf.mxu2  ;;  %v5342_v47 = vor.u32 %v6488_v48, %v5341_v46  ;;  %v5367_v46 = vld [vmem:[#allocation11 + $0x38] sm:$0xf0]  ;;  %v5485_v48 = vld [vmem:[#allocation11 + $0x120] sm:$0xf] }
 0x166   :  { %2770 = vmatpush.bf16.msra.mxu1 %v5438_v63  ;;  %v2081_v59 = vadd.f32 %v2080_v39, %v2067_v50  ;;  %v2094_v43 = vpop.f32.mrf.mxu3  ;;  %v5406_v63 = vor.u32 %v6504_v53, %v5405_v52  ;;  %v7425_v57 = vpack.c.bf16 %v2361_v61, %v2357_v8  ;;  %v6509_v50 = vld [vmem:[#allocation11 + $0xb4] sm:$0xf]  ;;  %v5486_v52 = vor.u32 %v6524_v32, %v5485_v48  ;;  %v5359_v39 = vld [vmem:[#allocation11 + $0x28] sm:$0xf0]  ;;  %v6520_v61 = vld [vmem:[#allocation11 + $0x104] sm:$0xf0] }
 0x167   :  { %v5370_v53 = vor.u32 %v6493_v42, %v5367_v46  ;;  %v5511_v24 = vld [vmem:[#allocation11 + $0x158] sm:$0xf0]  ;;  %v6548_v48 = vld [vmem:[#allocation11 + $0x1e4] sm:$0xf0]  ;;  %v6523_v32 = vld [vmem:[#allocation11 + $0x124] sm:$0xf] }
 0x168   :  { %v2095_v58 = vadd.f32 %v2094_v43, %v2081_v59  ;;  %v5362_v59 = vor.u32 %v6491_v18, %v5359_v39  ;;  %v6489_v43 = vld [vmem:[#allocation11 + $0x14] sm:$0xf] }
 0x169   :  { %2757 = vmatpush.bf16.msra.mxu0 %v5366_v11  ;;  %v2350_v11 = vadd.f32 %v2342_v44, %v2332_v28  ;;  %v5423_v28 = vld [vmem:[#allocation11 + $0xa8] sm:$0xf0]  ;;  %v5354_v7 = vor.u32 %v6489_v43, %v5351_v17  ;;  %v5565_v17 = vld [vmem:[#allocation11 + $0x1c0] sm:$0xf] }
 0x16a   :  { %2771 = vmatpush.bf16.msra.mxu1 %v5430_v36  ;;  %v2336_v3 = vmul.f32 %v2324_v41, %v2095_v58  ;;  %v6515_v36 = vld [vmem:[#allocation11 + $0xe4] sm:$0xf]  ;;  %v5378_v41 = vor.u32 %v6495_v31, %v5375_v34  ;;  %v5426_v60 = vor.u32 %v6507_v1, %v5423_v28  ;;  %v5589_v31 = vld [vmem:[#allocation11 + $0x1f0] sm:$0xf]  ;;  %v6550_v34 = vld [vmem:[#allocation11 + $0x1f4] sm:$0xf0] }
 0x16b   :  { %v5458_v22 = vor.u32 %v6515_v36, %v5455_v9  ;;  %v2358_v38 = vmax.f32 %v2350_v11, 0.0  ;;  %v6487_v11 = vld [vmem:[#allocation11 + $0x4] sm:$0xf]  ;;  %v5407_v9 = vld [vmem:[#allocation11 + $0x88] sm:$0xf0] }
 0x16c   :  { %v2354_v15 = vadd.f32 %v2342_v44, %v2336_v3  ;;  %v5478_v44 = vor.u32 %v6522_v56, %v5477_v55  ;;  %v5343_v3 = vld [vmem:[#allocation11 + $0x8] sm:$0xf0]  ;;  %v6503_v36 = vld [vmem:[#allocation11 + $0x84] sm:$0xf]  ;;  %v6521_v56 = vld [vmem:[#allocation11 + $0x114] sm:$0xf] }
 0x16d   :  { %2758 = vmatpush.bf16.msra.mxu0 %v5358_v26  ;;  %v5502_v26 = vor.u32 %v6528_v21, %v5501_v20  ;;  %v5346_v19 = vor.u32 %v6487_v11, %v5343_v3  ;;  %v5410_v20 = vor.u32 %v6503_v36, %v5407_v9  ;;  %v5479_v1 = vld [vmem:[#allocation11 + $0x118] sm:$0xf0]  ;;  %v2325_v9 = vperm.slane %v7415_v6, 2 }
 0x16e   :  { %2772 = vmatpush.bf16.msra.mxu1 %v5422_v49  ;;  %v2362_v45 = vmax.f32 %v2354_v15, 0.0  ;;  %v5493_v49 = vld [vmem:[#allocation11 + $0x130] sm:$0xf]  ;;  %v5519_v15 = vld [vmem:[#allocation11 + $0x168] sm:$0xf0]  ;;  %v5482_v43 = vor.u32 %v6521_v56, %v5479_v1 }
 0x16f   :  { %2784 = vmatpush.bf16.msra.mxu2 %v5502_v26  ;;  %v5494_v35 = vor.u32 %v6526_v27, %v5493_v49  ;;  %v5514_v26 = vor.u32 %v6529_v23, %v5511_v24  ;;  %v6527_v49 = vld [vmem:[#allocation11 + $0x144] sm:$0xf]  ;;  %v5503_v27 = vld [vmem:[#allocation11 + $0x148] sm:$0xf0]  ;;  %v2343_v24 = vperm.slane %v7417_v12, 2 }
 0x170   :  { %v7428_v29 = vpack.c.bf16 %v2362_v45, %v2358_v38  ;;  %v5797_v56 = vld [vmem:[#allocation13 + $0x170] sm:$0xf]  ;;  %v6598_v1 = vld [vmem:[#allocation13 + $0x174] sm:$0xf0] }
 0x171   :  { %2759 = vmatpush.bf16.msra.mxu0 %v5350_v14  ;;  %v5442_v14 = vor.u32 %v6511_v37, %v5439_v40  ;;  %v6525_v37 = vld [vmem:[#allocation11 + $0x134] sm:$0xf]  ;;  %v5495_v40 = vld [vmem:[#allocation11 + $0x138] sm:$0xf0] }
 0x172   :  { %2773 = vmatpush.bf16.msra.mxu1 %v5414_v51  ;;  %v5431_v51 = vld [vmem:[#allocation11 + $0xb8] sm:$0xf0]  ;;  %v5498_v46 = vor.u32 %v6525_v37, %v5495_v40 }
 0x173   :  { %2785 = vmatpush.bf16.msra.mxu2 %v5494_v35  ;;  %v5434_v54 = vor.u32 %v6509_v50, %v5431_v51  ;;  %v5590_v35 = vor.u32 %v6550_v34, %v5589_v31  ;;  %v5487_v50 = vld [vmem:[#allocation11 + $0x128] sm:$0xf0]  ;;  %v6549_v31 = vld [vmem:[#allocation11 + $0x1f4] sm:$0xf]  ;;  %v5591_v34 = vld [vmem:[#allocation11 + $0x1f8] sm:$0xf0] }
 0x174   :  { %v5594_v40 = vor.u32 %v6549_v31, %v5591_v34  ;;  %v6578_v31 = vld [vmem:[#allocation13 + $0xd4] sm:$0xf0]  ;;  %v5773_v34 = vld [vmem:[#allocation13 + $0x140] sm:$0xf] }
 0x175   :  { %2760 = vmatpush.bf16.msra.mxu0 %v5342_v47  ;;  %v5469_v47 = vld [vmem:[#allocation11 + $0x100] sm:$0xf]  ;;  %v2106_v58 = vpop.f32.mrf.mxu0  ;;  %2795 = vmatpush.bf16.msra.mxu3 %v5590_v35 }
 0x176   :  { %2774 = vmatpush.bf16.msra.mxu1 %v5406_v63  ;;  %v5415_v63 = vld [vmem:[#allocation11 + $0x98] sm:$0xf0]  ;;  %v2120_v5 = vpop.f32.mrf.mxu1 }
 0x177   :  { %2786 = vmatpush.bf16.msra.mxu2 %v5486_v52  ;;  %v5418_v8 = vor.u32 %v6505_v0, %v5415_v63  ;;  %v2121_v25 = vadd.f32 %v2120_v5, %v2106_v58  ;;  %v5471_v58 = vld [vmem:[#allocation11 + $0x108] sm:$0xf0]  ;;  %v5557_v63 = vld [vmem:[#allocation11 + $0x1b0] sm:$0xf] }
 0x178   :  { %2761 = vmatmul.bf16.vlgmr.msra.gmra.mxu0 %v7425_v57 }
 0x179   :  { %2809 = vmatpush.bf16.msrb.mxu0 %v5402_v10  ;;  %2775 = vmatmul.bf16.vlgmr.msra.gmra.mxu1 %v7428_v29  ;;  %v5470_v10 = vor.u32 %v6520_v61, %v5469_v47  ;;  %v6519_v61 = vld [vmem:[#allocation11 + $0x104] sm:$0xf] }
 0x17a   :  { %2823 = vmatpush.bf16.msrb.mxu1 %v5466_v4  ;;  %v5527_v4 = vld [vmem:[#allocation11 + $0x178] sm:$0xf0] }
 0x17b   :  { %2787 = vmatpush.bf16.msra.mxu2 %v5478_v44  ;;  %v5530_v33 = vor.u32 %v6533_v2, %v5527_v4 }
 0x17d   :  { %2810 = vmatpush.bf16.msrb.mxu0 %v5394_v16  ;;  %v5522_v16 = vor.u32 %v6531_v13, %v5519_v15  ;;  %v2134_v21 = vpop.f32.mrf.mxu2  ;;  %v2108_v38 = vpop.f32.mrf.mxu0  ;;  %v5549_v13 = vld [vmem:[#allocation11 + $0x1a0] sm:$0xf]  ;;  %v6540_v15 = vld [vmem:[#allocation11 + $0x1a4] sm:$0xf0] }
 0x17e   :  { %2824 = vmatpush.bf16.msrb.mxu1 %v5458_v22  ;;  %v2148_v22 = vpop.f32.mrf.mxu3  ;;  %v2122_v45 = vpop.f32.mrf.mxu1 }
 0x17f   :  { %2788 = vmatpush.bf16.msra.mxu2 %v5470_v10  ;;  %v2123_v18 = vadd.f32 %v2122_v45, %v2108_v38 }
 0x181   :  { %2811 = vmatpush.bf16.msrb.mxu0 %v5386_v62  ;;  %v2135_v62 = vadd.f32 %v2134_v21, %v2121_v25  ;;  %v5541_v21 = vld [vmem:[#allocation11 + $0x190] sm:$0xf] }
 0x182   :  { %2825 = vmatpush.bf16.msrb.mxu1 %v5450_v30  ;;  %v5506_v30 = vor.u32 %v6527_v49, %v5503_v27  ;;  %v5533_v49 = vld [vmem:[#allocation11 + $0x180] sm:$0xf]  ;;  %v6536_v27 = vld [vmem:[#allocation11 + $0x184] sm:$0xf0] }
 0x183   :  { %2837 = vmatpush.bf16.msrb.mxu2 %v5530_v33  ;;  %v2149_v42 = vadd.f32 %v2148_v22, %v2135_v62  ;;  %v5474_v33 = vor.u32 %v6519_v61, %v5471_v58  ;;  %v6538_v22 = vld [vmem:[#allocation11 + $0x194] sm:$0xf0]  ;;  %v5534_v37 = vor.u32 %v6536_v27, %v5533_v49  ;;  %v5653_v49 = vld [vmem:[#allocation13 + $0x50] sm:$0xf] }
 0x184   :  { %v5542_v45 = vor.u32 %v6538_v22, %v5541_v21  ;;  %v6594_v21 = vld [vmem:[#allocation13 + $0x154] sm:$0xf0] }
 0x185   :  { %2812 = vmatpush.bf16.msrb.mxu0 %v5378_v41  ;;  %v5581_v41 = vld [vmem:[#allocation11 + $0x1e0] sm:$0xf]  ;;  %v6562_v27 = vld [vmem:[#allocation13 + $0x54] sm:$0xf0] }
 0x186   :  { %2826 = vmatpush.bf16.msrb.mxu1 %v5442_v14  ;;  %v2136_v14 = vpop.f32.mrf.mxu2  ;;  %v2150_v51 = vpop.f32.mrf.mxu3  ;;  %v5582_v52 = vor.u32 %v6548_v48, %v5581_v41  ;;  %v5583_v48 = vld [vmem:[#allocation11 + $0x1e8] sm:$0xf0] }
 0x187   :  { %2838 = vmatpush.bf16.msrb.mxu2 %v5522_v16  ;;  %v2137_v44 = vadd.f32 %v2136_v14, %v2123_v18 }
 0x188   :  { %2796 = vmatpush.bf16.msra.mxu3 %v5582_v52 }
 0x189   :  { %2813 = vmatpush.bf16.msrb.mxu0 %v5370_v53  ;;  %v6546_v53 = vld [vmem:[#allocation11 + $0x1d4] sm:$0xf0]  ;;  %v2151_v10 = vadd.f32 %v2150_v51, %v2137_v44  ;;  %v5575_v51 = vld [vmem:[#allocation11 + $0x1d8] sm:$0xf0]  ;;  %v5798_v44 = vor.u32 %v6598_v1, %v5797_v56  ;;  %v5637_v1 = vld [vmem:[#allocation13 + $0x30] sm:$0xf] }
 0x18a   :  { %2827 = vmatpush.bf16.msrb.mxu1 %v5434_v54  ;;  %v5490_v54 = vor.u32 %v6523_v32, %v5487_v50  ;;  %v6545_v50 = vld [vmem:[#allocation11 + $0x1d4] sm:$0xf] }
 0x18b   :  { %2839 = vmatpush.bf16.msrb.mxu2 %v5514_v26  ;;  %v5578_v52 = vor.u32 %v6545_v50, %v5575_v51  ;;  %v6560_v50 = vld [vmem:[#allocation13 + $0x44] sm:$0xf0]  ;;  %v5709_v51 = vld [vmem:[#allocation13 + $0xc0] sm:$0xf] }
 0x18d   :  { %2814 = vmatpush.bf16.msrb.mxu0 %v5362_v59 }
 0x18e   :  { %2828 = vmatpush.bf16.msrb.mxu1 %v5426_v60  ;;  %v6544_v60 = vld [vmem:[#allocation11 + $0x1c4] sm:$0xf0] }
 0x18f   :  { %2840 = vmatpush.bf16.msrb.mxu2 %v5506_v30  ;;  %v5566_v0 = vor.u32 %v6544_v60, %v5565_v17  ;;  %v5669_v60 = vld [vmem:[#allocation13 + $0x70] sm:$0xf] }
 0x191   :  { %2815 = vmatpush.bf16.msrb.mxu0 %v5354_v7  ;;  %v6542_v7 = vld [vmem:[#allocation11 + $0x1b4] sm:$0xf0] }
 0x192   :  { %2829 = vmatpush.bf16.msrb.mxu1 %v5418_v8  ;;  %v5558_v11 = vor.u32 %v6542_v7, %v5557_v63  ;;  %v6582_v63 = vld [vmem:[#allocation13 + $0xf4] sm:$0xf0]  ;;  %v6537_v7 = vld [vmem:[#allocation11 + $0x194] sm:$0xf] }
 0x193   :  { %2841 = vmatpush.bf16.msrb.mxu2 %v5498_v46  ;;  %v6547_v46 = vld [vmem:[#allocation11 + $0x1e4] sm:$0xf] }
 0x194   :  { %v5586_v32 = vor.u32 %v6547_v46, %v5583_v48 }
 0x195   :  { %2816 = vmatpush.bf16.msrb.mxu0 %v5346_v19  ;;  %v5550_v19 = vor.u32 %v6540_v15, %v5549_v13  ;;  %v6564_v13 = vld [vmem:[#allocation13 + $0x64] sm:$0xf0]  ;;  %v5725_v15 = vld [vmem:[#allocation13 + $0xe0] sm:$0xf] }
 0x196   :  { %2830 = vmatpush.bf16.msrb.mxu1 %v5410_v20  ;;  %v2176_v55 = vpop.f32.mrf.mxu1 }
 0x197   :  { %2842 = vmatpush.bf16.msrb.mxu2 %v5490_v54  ;;  %v5559_v54 = vld [vmem:[#allocation11 + $0x1b8] sm:$0xf0] }
 0x198   :  { %2817 = vmatmul.bf16.vlgmr.msrb.gmra.mxu0 %v7425_v57  ;;  %v5573_v57 = vld [vmem:[#allocation11 + $0x1d0] sm:$0xf] }
 0x199   :  { %2831 = vmatmul.bf16.vlgmr.msrb.gmra.mxu1 %v7428_v29  ;;  %v2162_v29 = vpop.f32.mrf.mxu0  ;;  %v5574_v28 = vor.u32 %v6546_v53, %v5573_v57  ;;  %v6543_v57 = vld [vmem:[#allocation11 + $0x1c4] sm:$0xf]  ;;  %v5567_v53 = vld [vmem:[#allocation11 + $0x1c8] sm:$0xf0] }
 0x19a   :  { %v2163_v39 = vadd.f32 %v2162_v29, %v2149_v42  ;;  %v5570_v18 = vor.u32 %v6543_v57, %v5567_v53  ;;  %v6541_v29 = vld [vmem:[#allocation11 + $0x1b4] sm:$0xf]  ;;  %v6576_v57 = vld [vmem:[#allocation13 + $0xc4] sm:$0xf0]  ;;  %v5765_v53 = vld [vmem:[#allocation13 + $0x130] sm:$0xf] }
 0x19b   :  { %2797 = vmatpush.bf16.msra.mxu3 %v5574_v28  ;;  %2843 = vmatpush.bf16.msrb.mxu2 %v5482_v43  ;;  %v5551_v43 = vld [vmem:[#allocation11 + $0x1a8] sm:$0xf0] }
 0x19c   :  { %v2177_v59 = vadd.f32 %v2176_v55, %v2163_v39  ;;  %v5562_v55 = vor.u32 %v6541_v29, %v5559_v54  ;;  %v5710_v54 = vor.u32 %v6576_v57, %v5709_v51  ;;  %v6581_v57 = vld [vmem:[#allocation13 + $0xf4] sm:$0xf] }
 0x19d   :  { %v2190_v47 = vpop.f32.mrf.mxu2 }
 0x19e   :  { %v2191_v2 = vadd.f32 %v2190_v47, %v2177_v59  ;;  %v2204_v5 = vpop.f32.mrf.mxu3  ;;  %v2178_v3 = vpop.f32.mrf.mxu1  ;;  %v6539_v59 = vld [vmem:[#allocation11 + $0x1a4] sm:$0xf]  ;;  %v5733_v47 = vld [vmem:[#allocation13 + $0xf0] sm:$0xf] }
 0x19f   :  { %2798 = vmatpush.bf16.msra.mxu3 %v5566_v0  ;;  %2844 = vmatpush.bf16.msrb.mxu2 %v5474_v33  ;;  %v5554_v17 = vor.u32 %v6539_v59, %v5551_v43  ;;  %v6566_v0 = vld [vmem:[#allocation13 + $0x74] sm:$0xf0] }
 0x1a0   :  { %v2205_v36 = vadd.f32 %v2204_v5, %v2191_v2  ;;  %v5670_v58 = vor.u32 %v6566_v0, %v5669_v60  ;;  %v6596_v2 = vld [vmem:[#allocation13 + $0x164] sm:$0xf0]  ;;  %v5734_v5 = vor.u32 %v6582_v63, %v5733_v47  ;;  %v6574_v43 = vld [vmem:[#allocation13 + $0xb4] sm:$0xf0] }
 0x1a1   :  { %v2164_v4 = vpop.f32.mrf.mxu0  ;;  %v6588_v60 = vld [vmem:[#allocation13 + $0x124] sm:$0xf0] }
 0x1a2   :  { %v2165_v8 = vadd.f32 %v2164_v4, %v2151_v10  ;;  %v2333_v23 = vmul.f32 %v2325_v9, %v2205_v36  ;;  %v5789_v10 = vld [vmem:[#allocation13 + $0x160] sm:$0xf]  ;;  %3295 = vmatpush.bf16.msra.mxu0 %v5670_v58  ;;  %3309 = vmatpush.bf16.msra.mxu1 %v5734_v5 }
 0x1a3   :  { %2799 = vmatpush.bf16.msra.mxu3 %v5558_v11  ;;  %v5790_v33 = vor.u32 %v6596_v2, %v5789_v10  ;;  %v5629_v5 = vld [vmem:[#allocation13 + $0x20] sm:$0xf] }
 0x1a4   :  { %v2179_v16 = vadd.f32 %v2178_v3, %v2165_v8  ;;  %v2351_v62 = vadd.f32 %v2343_v24, %v2333_v23  ;;  %v5543_v8 = vld [vmem:[#allocation11 + $0x198] sm:$0xf0] }
 0x1a5   :  { %v2192_v20 = vpop.f32.mrf.mxu2  ;;  %v5546_v11 = vor.u32 %v6537_v7, %v5543_v8  ;;  %v5693_v7 = vld [vmem:[#allocation13 + $0xa0] sm:$0xf] }
 0x1a6   :  { %v2193_v25 = vadd.f32 %v2192_v20, %v2179_v16  ;;  %v2206_v26 = vpop.f32.mrf.mxu3  ;;  %v2359_v41 = vmax.f32 %v2351_v62, 0.0  ;;  %v5781_v20 = vld [vmem:[#allocation13 + $0x150] sm:$0xf] }
 0x1a7   :  { %2800 = vmatpush.bf16.msra.mxu3 %v5550_v19  ;;  %v6580_v19 = vld [vmem:[#allocation13 + $0xe4] sm:$0xf0]  ;;  %v5782_v23 = vor.u32 %v6594_v21, %v5781_v20  ;;  %v5717_v62 = vld [vmem:[#allocation13 + $0xd0] sm:$0xf]  ;;  %v6554_v21 = vld [vmem:[#allocation13 + $0x14] sm:$0xf0] }
 0x1a8   :  { %v2207_v38 = vadd.f32 %v2206_v26, %v2193_v25  ;;  %v5726_v22 = vor.u32 %v6580_v19, %v5725_v15  ;;  %v5535_v25 = vld [vmem:[#allocation11 + $0x188] sm:$0xf0]  ;;  %v5621_v20 = vld [vmem:[#allocation13 + $0x10] sm:$0xf] }
 0x1aa   :  { %v2337_v30 = vmul.f32 %v2325_v9, %v2207_v38  ;;  %v5661_v9 = vld [vmem:[#allocation13 + $0x60] sm:$0xf]  ;;  %3310 = vmatpush.bf16.msra.mxu1 %v5726_v22  ;;  %v5685_v22 = vld [vmem:[#allocation13 + $0x90] sm:$0xf] }
 0x1ab   :  { %2801 = vmatpush.bf16.msra.mxu3 %v5542_v45  ;;  %v5662_v16 = vor.u32 %v6564_v13, %v5661_v9 }
 0x1ac   :  { %v2355_v35 = vadd.f32 %v2343_v24, %v2337_v30  ;;  %v6535_v24 = vld [vmem:[#allocation11 + $0x184] sm:$0xf]  ;;  %v5654_v30 = vor.u32 %v6562_v27, %v5653_v49 }
 0x1ad   :  { %3296 = vmatpush.bf16.msra.mxu0 %v5662_v16  ;;  %v5538_v38 = vor.u32 %v6535_v24, %v5535_v25  ;;  %v2326_v16 = vperm.slane %v7415_v6, 3  ;;  %v5622_v24 = vor.u32 %v6554_v21, %v5621_v20  ;;  %v6570_v25 = vld [vmem:[#allocation13 + $0x94] sm:$0xf0]  ;;  %v5775_v21 = vld [vmem:[#allocation13 + $0x148] sm:$0xf0] }
 0x1ae   :  { %v2363_v42 = vmax.f32 %v2355_v35, 0.0  ;;  %v6592_v35 = vld [vmem:[#allocation13 + $0x144] sm:$0xf0]  ;;  %v5686_v49 = vor.u32 %v6570_v25, %v5685_v22  ;;  %v5845_v22 = vld [vmem:[#allocation13 + $0x1d0] sm:$0xf] }
 0x1af   :  { %2802 = vmatpush.bf16.msra.mxu3 %v5534_v37  ;;  %v5718_v37 = vor.u32 %v6578_v31, %v5717_v62  ;;  %v6597_v62 = vld [vmem:[#allocation13 + $0x174] sm:$0xf]  ;;  %v5597_v25 = vld [vmem:[#allocation5] sm:$0xf] }
 0x1b0   :  { %v2367_v14 = vpack.c.bf16 %v2363_v42, %v2359_v41 }
 0x1b1   :  { %3297 = vmatpush.bf16.msra.mxu0 %v5654_v30  ;;  %3311 = vmatpush.bf16.msra.mxu1 %v5718_v37  ;;  %v5799_v30 = vld [vmem:[#allocation13 + $0x178] sm:$0xf0] }
 0x1b2   :  { %2789 = vmatmul.bf16.vlgmr.msra.gmra.mxu2 %v2367_v14  ;;  %v5802_v6 = vor.u32 %v6597_v62, %v5799_v30  ;;  %v6559_v30 = vld [vmem:[#allocation13 + $0x44] sm:$0xf] }
 0x1b3   :  { %2851 = vmatpush.bf16.msrb.mxu3 %v5594_v40  ;;  %3323 = vmatpush.bf16.msra.mxu2 %v5798_v44  ;;  %v5774_v40 = vor.u32 %v6592_v35, %v5773_v34  ;;  %v5701_v44 = vld [vmem:[#allocation13 + $0xb0] sm:$0xf]  ;;  %v2344_v35 = vperm.slane %v7417_v12, 3  ;;  %v6595_v12 = vld [vmem:[#allocation13 + $0x164] sm:$0xf] }
 0x1b4   :  { %v5702_v47 = vor.u32 %v6574_v43, %v5701_v44  ;;  %v6563_v44 = vld [vmem:[#allocation13 + $0x64] sm:$0xf] }
 0x1b5   :  { %v2218_v39 = vpop.f32.mrf.mxu0  ;;  %3312 = vmatpush.bf16.msra.mxu1 %v5710_v54  ;;  %v5791_v54 = vld [vmem:[#allocation13 + $0x168] sm:$0xf0]  ;;  %v6579_v43 = vld [vmem:[#allocation13 + $0xe4] sm:$0xf] }
 0x1b6   :  { %v2232_v28 = vpop.f32.mrf.mxu1 }
 0x1b7   :  { %2852 = vmatpush.bf16.msrb.mxu3 %v5586_v32  ;;  %v2233_v3 = vadd.f32 %v2232_v28, %v2218_v39  ;;  %3324 = vmatpush.bf16.msra.mxu2 %v5790_v33  ;;  %v5645_v32 = vld [vmem:[#allocation13 + $0x40] sm:$0xf]  ;;  %v6558_v28 = vld [vmem:[#allocation13 + $0x34] sm:$0xf0]  ;;  %v6556_v33 = vld [vmem:[#allocation13 + $0x24] sm:$0xf0] }
 0x1b8   :  { %v5638_v59 = vor.u32 %v6558_v28, %v5637_v1  ;;  %v5630_v8 = vor.u32 %v6556_v33, %v5629_v5  ;;  %v6614_v1 = vld [vmem:[#allocation13 + $0x1f4] sm:$0xf0]  ;;  %v5794_v28 = vor.u32 %v6595_v12, %v5791_v54  ;;  %v6612_v5 = vld [vmem:[#allocation13 + $0x1e4] sm:$0xf0]  ;;  %v5605_v33 = vld [vmem:[#allocation5 + $0x8] sm:$0xf] }
 0x1b9   :  { %3313 = vmatpush.bf16.msra.mxu1 %v5702_v47  ;;  %v6593_v47 = vld [vmem:[#allocation13 + $0x154] sm:$0xf]  ;;  %v5829_v54 = vld [vmem:[#allocation13 + $0x1b0] sm:$0xf] }
 0x1bb   :  { %2853 = vmatpush.bf16.msrb.mxu3 %v5578_v52  ;;  %3325 = vmatpush.bf16.msra.mxu2 %v5782_v23  ;;  %v5646_v52 = vor.u32 %v6560_v50, %v5645_v32  ;;  %v6565_v32 = vld [vmem:[#allocation13 + $0x74] sm:$0xf] }
 0x1bd   :  { %v2246_v61 = vpop.f32.mrf.mxu2  ;;  %v2220_v36 = vpop.f32.mrf.mxu0  ;;  %3298 = vmatpush.bf16.msra.mxu0 %v5646_v52  ;;  %v5671_v52 = vld [vmem:[#allocation13 + $0x78] sm:$0xf0] }
 0x1be   :  { %v2260_v4 = vpop.f32.mrf.mxu3  ;;  %v2234_v26 = vpop.f32.mrf.mxu1  ;;  %v2247_v45 = vadd.f32 %v2246_v61, %v2233_v3  ;;  %v5749_v3 = vld [vmem:[#allocation13 + $0x110] sm:$0xf] }
 0x1bf   :  { %2854 = vmatpush.bf16.msrb.mxu3 %v5570_v18  ;;  %3326 = vmatpush.bf16.msra.mxu2 %v5774_v40  ;;  %v6590_v18 = vld [vmem:[#allocation13 + $0x134] sm:$0xf0]  ;;  %v5613_v40 = vld [vmem:[#allocation13] sm:$0xf] }
 0x1c0   :  { %v2261_v42 = vadd.f32 %v2260_v4, %v2247_v45  ;;  %v5766_v39 = vor.u32 %v6590_v18, %v5765_v53  ;;  %v5735_v53 = vld [vmem:[#allocation13 + $0xf8] sm:$0xf0]  ;;  %v5674_v18 = vor.u32 %v6565_v32, %v5671_v52  ;;  %v6557_v32 = vld [vmem:[#allocation13 + $0x34] sm:$0xf] }
 0x1c1   :  { %3299 = vmatpush.bf16.msra.mxu0 %v5638_v59  ;;  %v5663_v59 = vld [vmem:[#allocation13 + $0x68] sm:$0xf0] }
 0x1c2   :  { %2845 = vmatmul.bf16.vlgmr.msrb.gmra.mxu2 %v2367_v14  ;;  %v2235_v14 = vadd.f32 %v2234_v26, %v2220_v36  ;;  %v6586_v36 = vld [vmem:[#allocation13 + $0x114] sm:$0xf0]  ;;  %v5741_v26 = vld [vmem:[#allocation13 + $0x100] sm:$0xf] }
 0x1c3   :  { %2855 = vmatpush.bf16.msrb.mxu3 %v5562_v55  ;;  %3327 = vmatpush.bf16.msra.mxu2 %v5766_v39  ;;  %v5750_v15 = vor.u32 %v6586_v36, %v5749_v3  ;;  %v5655_v3 = vld [vmem:[#allocation13 + $0x58] sm:$0xf0] }
 0x1c5   :  { %v2248_v41 = vpop.f32.mrf.mxu2  ;;  %3300 = vmatpush.bf16.msra.mxu0 %v5630_v8  ;;  %v6230_v8 = vld [vmem:[#allocation5 + $0x14] sm:$0xf0] }
 0x1c6   :  { %v2262_v46 = vpop.f32.mrf.mxu3  ;;  %v2249_v56 = vadd.f32 %v2248_v41, %v2235_v14  ;;  %v6552_v41 = vld [vmem:[#allocation13 + $0x4] sm:$0xf0] }
 0x1c7   :  { %2856 = vmatpush.bf16.msrb.mxu3 %v5554_v17  ;;  %v5757_v17 = vld [vmem:[#allocation13 + $0x120] sm:$0xf]  ;;  %v5614_v14 = vor.u32 %v6552_v41, %v5613_v40  ;;  %v5767_v40 = vld [vmem:[#allocation13 + $0x138] sm:$0xf0] }
 0x1c8   :  { %v5758_v61 = vor.u32 %v6588_v60, %v5757_v17  ;;  %v2263_v63 = vadd.f32 %v2262_v46, %v2249_v56  ;;  %v5677_v46 = vld [vmem:[#allocation13 + $0x80] sm:$0xf]  ;;  %v5861_v56 = vld [vmem:[#allocation13 + $0x1f0] sm:$0xf]  ;;  %v5666_v60 = vor.u32 %v6563_v44, %v5663_v59  ;;  %v5695_v59 = vld [vmem:[#allocation13 + $0xa8] sm:$0xf0] }
 0x1c9   :  { %3301 = vmatpush.bf16.msra.mxu0 %v5622_v24  ;;  %v5837_v41 = vld [vmem:[#allocation13 + $0x1c0] sm:$0xf] }
 0x1ca   :  { %3328 = vmatpush.bf16.msra.mxu2 %v5758_v61  ;;  %v5783_v61 = vld [vmem:[#allocation13 + $0x158] sm:$0xf0] }
 0x1cb   :  { %2857 = vmatpush.bf16.msrb.mxu3 %v5546_v11  ;;  %v6572_v11 = vld [vmem:[#allocation13 + $0xa4] sm:$0xf0] }
 0x1cc   :  { %v5694_v13 = vor.u32 %v6572_v11, %v5693_v7  ;;  %v5862_v7 = vor.u32 %v6614_v1, %v5861_v56  ;;  %v6561_v11 = vld [vmem:[#allocation13 + $0x54] sm:$0xf]  ;;  %v6555_v56 = vld [vmem:[#allocation13 + $0x24] sm:$0xf]  ;;  %v5631_v1 = vld [vmem:[#allocation13 + $0x28] sm:$0xf0] }
 0x1cd   :  { %3302 = vmatpush.bf16.msra.mxu0 %v5614_v14  ;;  %v5634_v44 = vor.u32 %v6555_v56, %v5631_v1  ;;  %v6599_v1 = vld [vmem:[#allocation13 + $0x184] sm:$0xf] }
 0x1ce   :  { %3314 = vmatpush.bf16.msra.mxu1 %v5694_v13  ;;  %3329 = vmatpush.bf16.msra.mxu2 %v5750_v15  ;;  %v5658_v13 = vor.u32 %v6561_v11, %v5655_v3  ;;  %v6577_v15 = vld [vmem:[#allocation13 + $0xd4] sm:$0xf]  ;;  %v5743_v11 = vld [vmem:[#allocation13 + $0x108] sm:$0xf0] }
 0x1cf   :  { %2858 = vmatpush.bf16.msrb.mxu3 %v5538_v38  ;;  %v6584_v38 = vld [vmem:[#allocation13 + $0x104] sm:$0xf0] }
 0x1d0   :  { %v5742_v27 = vor.u32 %v6584_v38, %v5741_v26  ;;  %v6229_v38 = vld [vmem:[#allocation5 + $0xc] sm:$0xf0] }
 0x1d1   :  { %3351 = vmatpush.bf16.msrb.mxu0 %v5674_v18  ;;  %v5759_v18 = vld [vmem:[#allocation13 + $0x128] sm:$0xf0] }
 0x1d2   :  { %3315 = vmatpush.bf16.msra.mxu1 %v5686_v49  ;;  %3330 = vmatpush.bf16.msra.mxu2 %v5742_v27  ;;  %v5599_v49 = vld [vmem:[#allocation5 + $0x10] sm:$0xf0]  ;;  %v7443_v27 = vor.u32 %v6229_v38, %v5597_v25  ;;  %v5805_v38 = vld [vmem:[#allocation13 + $0x180] sm:$0xf] }
 0x1d4   :  { %3303 = vmatmul.bf16.vlgmr.msra.gmra.mxu0 %v7443_v27 }
 0x1d5   :  { %v2274_v48 = vpop.f32.mrf.mxu0  ;;  %3352 = vmatpush.bf16.msrb.mxu0 %v5666_v60 }
 0x1d6   :  { %v2275_v29 = vadd.f32 %v2274_v48, %v2261_v42  ;;  %v2288_v55 = vpop.f32.mrf.mxu1  ;;  %3379 = vmatpush.bf16.msrb.mxu2 %v5802_v6  ;;  %v6568_v48 = vld [vmem:[#allocation13 + $0x84] sm:$0xf0]  ;;  %v6575_v6 = vld [vmem:[#allocation13 + $0xc4] sm:$0xf] }
 0x1d7   :  { %v5678_v51 = vor.u32 %v6568_v48, %v5677_v46 }
 0x1d8   :  { %v2289_v0 = vadd.f32 %v2288_v55, %v2275_v29  ;;  %v5738_v29 = vor.u32 %v6581_v57, %v5735_v53  ;;  %v5703_v57 = vld [vmem:[#allocation13 + $0xb8] sm:$0xf0]  ;;  %v6587_v53 = vld [vmem:[#allocation13 + $0x124] sm:$0xf] }
 0x1d9   :  { %3316 = vmatpush.bf16.msra.mxu1 %v5678_v51  ;;  %3353 = vmatpush.bf16.msrb.mxu0 %v5658_v13  ;;  %v6573_v51 = vld [vmem:[#allocation13 + $0xb4] sm:$0xf]  ;;  %v5762_v12 = vor.u32 %v6587_v53, %v5759_v18 }
 0x1da   :  { %3380 = vmatpush.bf16.msrb.mxu2 %v5794_v28  ;;  %v6571_v28 = vld [vmem:[#allocation13 + $0xa4] sm:$0xf]  ;;  %v6605_v53 = vld [vmem:[#allocation13 + $0x1b4] sm:$0xf] }
 0x1db   :  { %v5698_v60 = vor.u32 %v6571_v28, %v5695_v59  ;;  %v5807_v28 = vld [vmem:[#allocation13 + $0x188] sm:$0xf0] }
 0x1dd   :  { %v2302_v58 = vpop.f32.mrf.mxu2  ;;  %v2276_v4 = vpop.f32.mrf.mxu0  ;;  %3365 = vmatpush.bf16.msrb.mxu1 %v5738_v29  ;;  %v5706_v29 = vor.u32 %v6573_v51, %v5703_v57  ;;  %v5839_v57 = vld [vmem:[#allocation13 + $0x1c8] sm:$0xf0] }
 0x1de   :  { %v2303_v10 = vadd.f32 %v2302_v58, %v2289_v0  ;;  %v2316_v2 = vpop.f32.mrf.mxu3  ;;  %v2277_v9 = vadd.f32 %v2276_v4, %v2263_v63  ;;  %v2290_v23 = vpop.f32.mrf.mxu1  ;;  %v5727_v0 = vld [vmem:[#allocation13 + $0xe8] sm:$0xf0]  ;;  %v5786_v63 = vor.u32 %v6593_v47, %v5783_v61  ;;  %v5853_v4 = vld [vmem:[#allocation13 + $0x1e0] sm:$0xf]  ;;  %v6604_v61 = vld [vmem:[#allocation13 + $0x1a4] sm:$0xf0] }
 0x1df   :  { %v5730_v58 = vor.u32 %v6579_v43, %v5727_v0  ;;  %v5854_v26 = vor.u32 %v6612_v5, %v5853_v4  ;;  %v6585_v43 = vld [vmem:[#allocation13 + $0x114] sm:$0xf]  ;;  %v5821_v47 = vld [vmem:[#allocation13 + $0x1a0] sm:$0xf] }
 0x1e0   :  { %v2317_v19 = vadd.f32 %v2316_v2, %v2303_v10  ;;  %v2291_v45 = vadd.f32 %v2290_v23, %v2277_v9  ;;  %3381 = vmatpush.bf16.msrb.mxu2 %v5786_v63  ;;  %v7439_v9 = vor.u32 %v6230_v8, %v5605_v33  ;;  %v6610_v23 = vld [vmem:[#allocation13 + $0x1d4] sm:$0xf0]  ;;  %v6569_v4 = vld [vmem:[#allocation13 + $0x94] sm:$0xf]  ;;  %v6583_v8 = vld [vmem:[#allocation13 + $0x104] sm:$0xf] }
 0x1e1   :  { %3366 = vmatpush.bf16.msrb.mxu1 %v5730_v58  ;;  %v5846_v48 = vor.u32 %v6610_v23, %v5845_v22  ;;  %v5746_v13 = vor.u32 %v6583_v8, %v5743_v11  ;;  %v6602_v22 = vld [vmem:[#allocation13 + $0x194] sm:$0xf0]  ;;  %v6053_v11 = vld [vmem:[#allocation19 + $0x70] sm:$0xf] }
 0x1e2   :  { %v2334_v34 = vmul.f32 %v2326_v16, %v2317_v19  ;;  %v6591_v19 = vld [vmem:[#allocation13 + $0x144] sm:$0xf]  ;;  %3331 = vmatmul.bf16.vlgmr.msra.gmra.mxu2 %v7439_v9  ;;  %v6630_v8 = vld [vmem:[#allocation14 + $0x78] sm:$0xff] }
 0x1e3   :  { %v5778_v24 = vor.u32 %v6591_v19, %v5775_v21  ;;  %v5615_v19 = vld [vmem:[#allocation13 + $0x8] sm:$0xf0]  ;;  %v5813_v21 = vld [vmem:[#allocation13 + $0x190] sm:$0xf] }
 0x1e4   :  { %v2352_v39 = vadd.f32 %v2344_v35, %v2334_v34 }
 0x1e5   :  { %v2304_v31 = vpop.f32.mrf.mxu2  ;;  %3382 = vmatpush.bf16.msrb.mxu2 %v5778_v24  ;;  %v5679_v24 = vld [vmem:[#allocation13 + $0x88] sm:$0xf0] }
 0x1e6   :  { %v2305_v37 = vadd.f32 %v2304_v31, %v2291_v45  ;;  %v2318_v42 = vpop.f32.mrf.mxu3  ;;  %v2360_v10 = vmax.f32 %v2352_v39, 0.0  ;;  %v6227_v45 = vld [vmem:[#allocation5 + $0x4] sm:$0xf]  ;;  %v5647_v31 = vld [vmem:[#allocation13 + $0x48] sm:$0xf0] }
 0x1e7   :  { %v7445_v62 = vor.u32 %v6227_v45, %v5599_v49  ;;  %v5650_v34 = vor.u32 %v6559_v30, %v5647_v31  ;;  %v6606_v39 = vld [vmem:[#allocation13 + $0x1b4] sm:$0xf0]  ;;  %v6600_v45 = vld [vmem:[#allocation13 + $0x184] sm:$0xf0]  ;;  %v6613_v49 = vld [vmem:[#allocation13 + $0x1f4] sm:$0xf] }
 0x1e8   :  { %v2319_v50 = vadd.f32 %v2318_v42, %v2305_v37  ;;  %v6589_v37 = vld [vmem:[#allocation13 + $0x134] sm:$0xf]  ;;  %v6608_v42 = vld [vmem:[#allocation13 + $0x1c4] sm:$0xf0]  ;;  %v5830_v63 = vor.u32 %v6606_v39, %v5829_v54  ;;  %v5863_v30 = vld [vmem:[#allocation13 + $0x1f8] sm:$0xf0] }
 0x1e9   :  { %3317 = vmatmul.bf16.vlgmr.msra.gmra.mxu1 %v7445_v62  ;;  %v5770_v46 = vor.u32 %v6589_v37, %v5767_v40  ;;  %3354 = vmatpush.bf16.msrb.mxu0 %v5650_v34  ;;  %v6228_v34 = vld [vmem:[#allocation5 + $0xc] sm:$0xf]  ;;  %v5866_v37 = vor.u32 %v6613_v49, %v5863_v30  ;;  %v5855_v40 = vld [vmem:[#allocation13 + $0x1e8] sm:$0xf0]  ;;  %v6601_v39 = vld [vmem:[#allocation13 + $0x194] sm:$0xf] }
 0x1ea   :  { %v2338_v55 = vmul.f32 %v2326_v16, %v2319_v50  ;;  %v5719_v16 = vld [vmem:[#allocation13 + $0xd8] sm:$0xf0]  ;;  %v6029_v49 = vld [vmem:[#allocation19 + $0x40] sm:$0xf]  ;;  %v6640_v30 = vld [vmem:[#allocation19 + $0x44] sm:$0xf0] }
 0x1eb   :  { %v5722_v20 = vor.u32 %v6577_v15, %v5719_v16  ;;  %v5639_v50 = vld [vmem:[#allocation13 + $0x38] sm:$0xf0]  ;;  %3383 = vmatpush.bf16.msrb.mxu2 %v5770_v46  ;;  %v5822_v15 = vor.u32 %v6604_v61, %v5821_v47  ;;  %v6551_v16 = vld [vmem:[#allocation13 + $0x4] sm:$0xf]  ;;  %v6609_v46 = vld [vmem:[#allocation13 + $0x1d4] sm:$0xf] }
 0x1ec   :  { %v2356_v17 = vadd.f32 %v2344_v35, %v2338_v55  ;;  %v5711_v35 = vld [vmem:[#allocation13 + $0xc8] sm:$0xf0]  ;;  %v5642_v52 = vor.u32 %v6557_v32, %v5639_v50  ;;  %v5838_v55 = vor.u32 %v6608_v42, %v5837_v41  ;;  %v5618_v23 = vor.u32 %v6551_v16, %v5615_v19  ;;  %v6621_v47 = vld [vmem:[#allocation14 + $0x30] sm:$0xff]  ;;  %v6045_v16 = vld [vmem:[#allocation19 + $0x60] sm:$0xf] }
 0x1ed   :  { %3367 = vmatpush.bf16.msrb.mxu1 %v5722_v20  ;;  %v5714_v14 = vor.u32 %v6575_v6, %v5711_v35  ;;  %v6567_v20 = vld [vmem:[#allocation13 + $0x84] sm:$0xf]  ;;  %v5806_v6 = vor.u32 %v6600_v45, %v5805_v38  ;;  %v5607_v35 = vld [vmem:[#allocation5 + $0x18] sm:$0xf0]  ;;  %v6620_v61 = vld [vmem:[#allocation14 + $0x28] sm:$0xff] }
 0x1ee   :  { %v2364_v2 = vmax.f32 %v2356_v17, 0.0  ;;  %3355 = vmatpush.bf16.msrb.mxu0 %v5642_v52  ;;  %v5751_v17 = vld [vmem:[#allocation13 + $0x118] sm:$0xf0]  ;;  %v5682_v25 = vor.u32 %v6567_v20, %v5679_v24  ;;  %v5610_v41 = vor.u32 %v6228_v34, %v5607_v35  ;;  %v6607_v52 = vld [vmem:[#allocation13 + $0x1c4] sm:$0xf] }
 0x1ef   :  { %3384 = vmatpush.bf16.msrb.mxu2 %v5762_v12  ;;  %v5754_v0 = vor.u32 %v6585_v43, %v5751_v17  ;;  %v5823_v12 = vld [vmem:[#allocation13 + $0x1a8] sm:$0xf0]  ;;  %v6642_v24 = vld [vmem:[#allocation19 + $0x54] sm:$0xf0]  ;;  %v6627_v45 = vld [vmem:[#allocation14 + $0x60] sm:$0xff] }
 0x1f0   :  { %v7437_v36 = vpack.c.bf16 %v2364_v2, %v2360_v10  ;;  %v6553_v10 = vld [vmem:[#allocation13 + $0x14] sm:$0xf]  ;;  %v5623_v2 = vld [vmem:[#allocation13 + $0x18] sm:$0xf0]  ;;  %v6644_v19 = vld [vmem:[#allocation19 + $0x64] sm:$0xf0] }
 0x1f1   :  { %3368 = vmatpush.bf16.msrb.mxu1 %v5714_v14  ;;  %v5626_v33 = vor.u32 %v6553_v10, %v5623_v2  ;;  %v6618_v10 = vld [vmem:[#allocation14 + $0x18] sm:$0xff]  ;;  %v6617_v2 = vld [vmem:[#allocation14 + $0x10] sm:$0xff]  ;;  %v6046_v20 = vor.u32 %v6644_v19, %v6045_v16 }
 0x1f2   :  { %2803 = vmatmul.bf16.vlgmr.msra.gmra.mxu3 %v7437_v36  ;;  %3356 = vmatpush.bf16.msrb.mxu0 %v5634_v44  ;;  %v5810_v44 = vor.u32 %v6599_v1, %v5807_v28  ;;  %v5997_v1 = vld [vmem:[#allocation19] sm:$0xf]  ;;  %v6632_v28 = vld [vmem:[#allocation19 + $0x4] sm:$0xf0]  ;;  %v6101_v16 = vld [vmem:[#allocation19 + $0xd0] sm:$0xf] }
 0x1f3   :  { %3337 = vmatpush.bf16.msra.mxu3 %v5862_v7  ;;  %3385 = vmatpush.bf16.msrb.mxu2 %v5754_v0  ;;  %v5687_v7 = vld [vmem:[#allocation13 + $0x98] sm:$0xf0] }
 0x1f4   :  { %v5690_v3 = vor.u32 %v6569_v4, %v5687_v7  ;;  %v6622_v0 = vld [vmem:[#allocation14 + $0x38] sm:$0xff]  ;;  %v6616_v4 = vld [vmem:[#allocation14 + $0x8] sm:$0xff]  ;;  %v6615_v7 = vld [vmem:[#allocation14] sm:$0xff] }
 0x1f5   :  { %3369 = vmatpush.bf16.msrb.mxu1 %v5706_v29  ;;  %v7449_v58 = vpop.f32.mrf.mxu0  ;;  %v6603_v29 = vld [vmem:[#allocation13 + $0x1a4] sm:$0xf]  ;;  %v6658_v19 = vld [vmem:[#allocation19 + $0xd4] sm:$0xf0] }
 0x1f6   :  { %v7451_v5 = vpop.f32.mrf.mxu1  ;;  %3357 = vmatpush.bf16.msrb.mxu0 %v5626_v33  ;;  %v5826_v54 = vor.u32 %v6603_v29, %v5823_v12 }
 0x1f7   :  { %3338 = vmatpush.bf16.msra.mxu3 %v5854_v26  ;;  %3386 = vmatpush.bf16.msrb.mxu2 %v5746_v13  ;;  %v5814_v26 = vor.u32 %v6602_v22, %v5813_v21  ;;  %v6628_v22 = vld [vmem:[#allocation14 + $0x68] sm:$0xff] }
 0x1f9   :  { %3370 = vmatpush.bf16.msrb.mxu1 %v5698_v60 }
 0x1fa   :  { %3387 = vmatmul.bf16.vlgmr.msrb.gmra.mxu2 %v7439_v9  ;;  %3358 = vmatpush.bf16.msrb.mxu0 %v5618_v23  ;;  %v6611_v9 = vld [vmem:[#allocation13 + $0x1e4] sm:$0xf]  ;;  %v6037_v23 = vld [vmem:[#allocation19 + $0x50] sm:$0xf] }
 0x1fb   :  { %3339 = vmatpush.bf16.msra.mxu3 %v5846_v48  ;;  %v5858_v42 = vor.u32 %v6611_v9, %v5855_v40  ;;  %v5847_v48 = vld [vmem:[#allocation13 + $0x1d8] sm:$0xf0]  ;;  %v6021_v40 = vld [vmem:[#allocation19 + $0x30] sm:$0xf] }
 0x1fc   :  { %v5850_v51 = vor.u32 %v6609_v46, %v5847_v48  ;;  %v6626_v9 = vld [vmem:[#allocation14 + $0x58] sm:$0xff]  ;;  %v6636_v46 = vld [vmem:[#allocation19 + $0x24] sm:$0xf0] }
 0x1fd   :  { %3371 = vmatpush.bf16.msrb.mxu1 %v5690_v3  ;;  %3359 = vmatmul.bf16.vlgmr.msrb.gmra.mxu0 %v7443_v27  ;;  %v5842_v27 = vor.u32 %v6607_v52, %v5839_v57  ;;  %v6646_v3 = vld [vmem:[#allocation19 + $0x74] sm:$0xf0] }
 0x1fe   :  { %v7457_v31 = vpop.f32.mrf.mxu1  ;;  %3561 = vmatpush.bf16.msra.mxu0 %v6622_v0  ;;  %v6054_v13 = vor.u32 %v6646_v3, %v6053_v11 }
 0x1ff   :  { %3340 = vmatpush.bf16.msra.mxu3 %v5838_v55  ;;  %v5815_v55 = vld [vmem:[#allocation13 + $0x198] sm:$0xf0] }
 0x200   :  { %v5818_v56 = vor.u32 %v6601_v39, %v5815_v55 }
 0x201   :  { %3372 = vmatpush.bf16.msrb.mxu1 %v5682_v25  ;;  %v6038_v25 = vor.u32 %v6642_v24, %v6037_v23 }
 0x202   :  { %2859 = vmatmul.bf16.vlgmr.msrb.gmra.mxu3 %v7437_v36  ;;  %v7455_v36 = vpop.f32.mrf.mxu0  ;;  %3562 = vmatpush.bf16.msra.mxu0 %v6621_v47 }
 0x203   :  { %3341 = vmatpush.bf16.msra.mxu3 %v5830_v63  ;;  %v6619_v63 = vld [vmem:[#allocation14 + $0x20] sm:$0xff] }
 0x204   :  { %3373 = vmatmul.bf16.vlgmr.msrb.gmra.mxu1 %v7445_v62  ;;  %v5831_v62 = vld [vmem:[#allocation13 + $0x1b8] sm:$0xf0] }
 0x205   :  { %v5834_v18 = vor.u32 %v6605_v53, %v5831_v62  ;;  %3575 = vmatpush.bf16.msra.mxu1 %v6630_v8  ;;  %v6005_v62 = vld [vmem:[#allocation19 + $0x10] sm:$0xf]  ;;  %v6660_v8 = vld [vmem:[#allocation19 + $0xe4] sm:$0xf0] }
 0x206   :  { %3563 = vmatpush.bf16.msra.mxu0 %v6620_v61 }
 0x207   :  { %3342 = vmatpush.bf16.msra.mxu3 %v5822_v15  ;;  %v6629_v15 = vld [vmem:[#allocation14 + $0x70] sm:$0xff] }
 0x209   :  { %3576 = vmatpush.bf16.msra.mxu1 %v6629_v15 }
 0x20a   :  { %3564 = vmatpush.bf16.msra.mxu0 %v6619_v63 }
 0x20b   :  { %3343 = vmatpush.bf16.msra.mxu3 %v5814_v26 }
 0x20d   :  { %3577 = vmatpush.bf16.msra.mxu1 %v6628_v22 }
 0x20e   :  { %3565 = vmatpush.bf16.msra.mxu0 %v6618_v10 }
 0x20f   :  { %3344 = vmatpush.bf16.msra.mxu3 %v5806_v6  ;;  %v6030_v6 = vor.u32 %v6640_v30, %v6029_v49 }
 0x211   :  { %3578 = vmatpush.bf16.msra.mxu1 %v6627_v45  ;;  %v6656_v45 = vld [vmem:[#allocation19 + $0xc4] sm:$0xf0] }
 0x212   :  { %3345 = vmatmul.bf16.vlgmr.msra.gmra.mxu3 %v5610_v41  ;;  %3566 = vmatpush.bf16.msra.mxu0 %v6617_v2  ;;  %v7488_v2 = vld [vmem:[%s7551_s10] sm:$0x3] }
 0x213   :  { %3393 = vmatpush.bf16.msrb.mxu3 %v5866_v37 }
 0x215   :  { %v2818_v14 = vpop.f32.mrf.mxu0  ;;  %3579 = vmatpush.bf16.msra.mxu1 %v6626_v9 }
 0x216   :  { %v2832_v32 = vpop.f32.mrf.mxu1  ;;  %3567 = vmatpush.bf16.msra.mxu0 %v6616_v4 }
 0x217   :  { %v2833_v50 = vadd.f32 %v2832_v32, %v2818_v14  ;;  %3394 = vmatpush.bf16.msrb.mxu3 %v5858_v42  ;;  %v6013_v14 = vld [vmem:[#allocation19 + $0x20] sm:$0xf] }
 0x21a   :  { %3568 = vmatpush.bf16.msra.mxu0 %v6615_v7  ;;  %v6109_v7 = vld [vmem:[#allocation19 + $0xe0] sm:$0xf] }
 0x21b   :  { %3395 = vmatpush.bf16.msrb.mxu3 %v5850_v51  ;;  %v6014_v51 = vor.u32 %v6636_v46, %v6013_v14  ;;  %v6110_v11 = vor.u32 %v6660_v8, %v6109_v7 }
 0x21d   :  { %v7469_v26 = vpop.f32.mrf.mxu0 }
 0x21e   :  { %3920 = vmatpush.bf16.msrb.mxu0 %v6054_v13  ;;  %v7471_v38 = vpop.f32.mrf.mxu1  ;;  %v3419_v13 = vperm.slane %v7488_v2, 0 }
 0x21f   :  { %3396 = vmatpush.bf16.msrb.mxu3 %v5842_v27  ;;  %v6624_v27 = vld [vmem:[#allocation14 + $0x48] sm:$0xff] }
 0x222   :  { %3921 = vmatpush.bf16.msrb.mxu0 %v6046_v20  ;;  %v6102_v20 = vor.u32 %v6658_v19, %v6101_v16  ;;  %v3420_v16 = vperm.slane %v7488_v2, 1 }
 0x223   :  { %3397 = vmatpush.bf16.msrb.mxu3 %v5834_v18  ;;  %v6634_v18 = vld [vmem:[#allocation19 + $0x14] sm:$0xf0] }
 0x224   :  { %v6006_v29 = vor.u32 %v6634_v18, %v6005_v62  ;;  %v6069_v62 = vld [vmem:[#allocation19 + $0x90] sm:$0xf]  ;;  %v6650_v18 = vld [vmem:[#allocation19 + $0x94] sm:$0xf0] }
 0x226   :  { %3922 = vmatpush.bf16.msrb.mxu0 %v6038_v25  ;;  %v6093_v25 = vld [vmem:[#allocation19 + $0xc0] sm:$0xf] }
 0x227   :  { %3398 = vmatpush.bf16.msrb.mxu3 %v5826_v54  ;;  %v7482_v54 = vld [vmem:[%s7550_s9] sm:$0x3]  ;;  %v6094_v30 = vor.u32 %v6656_v45, %v6093_v25 }
 0x228   :  { %v3409_v63 = vperm.slane %v7482_v54, 0  ;;  %v3410_v8 = vperm.slane %v7482_v54, 1 }
 0x22a   :  { %3923 = vmatpush.bf16.msrb.mxu0 %v6030_v6  ;;  %v2779_v6 = vadd.f32 %v7457_v31, %v7455_v36 }
 0x22b   :  { %3399 = vmatpush.bf16.msrb.mxu3 %v5818_v56  ;;  %v6623_v56 = vld [vmem:[#allocation14 + $0x40] sm:$0xff] }
 0x22f   :  { %3400 = vmatpush.bf16.msrb.mxu3 %v5810_v44  ;;  %v5998_v44 = vor.u32 %v6632_v28, %v5997_v1  ;;  %v6648_v1 = vld [vmem:[#allocation19 + $0x84] sm:$0xf0] }
 0x232   :  { %3401 = vmatmul.bf16.vlgmr.msrb.gmra.mxu3 %v5610_v41  ;;  %v6638_v41 = vld [vmem:[#allocation19 + $0x34] sm:$0xf0] }
 0x233   :  { %v6022_v42 = vor.u32 %v6638_v41, %v6021_v40  ;;  %v6085_v40 = vld [vmem:[#allocation19 + $0xb0] sm:$0xf]  ;;  %v6654_v41 = vld [vmem:[#allocation19 + $0xb4] sm:$0xf0] }
 0x235   :  { %v7461_v59 = vpop.f32.mrf.mxu2  ;;  %3924 = vmatpush.bf16.msrb.mxu0 %v6022_v42  ;;  %v2777_v42 = vadd.f32 %v7451_v5, %v7449_v58 }
 0x237   :  { %v2791_v36 = vadd.f32 %v7461_v59, %v2777_v42  ;;  %v6070_v59 = vor.u32 %v6650_v18, %v6069_v62  ;;  %v5975_v62 = vld [vmem:[#allocation20 + $0x58] sm:$0xf0]  ;;  %v5965_v18 = vld [vmem:[#allocation20 + $0x40] sm:$0xf] }
 0x239   :  { %3925 = vmatpush.bf16.msrb.mxu0 %v6014_v51  ;;  %v6652_v51 = vld [vmem:[#allocation19 + $0xa4] sm:$0xf0] }
 0x23d   :  { %v7463_v43 = vpop.f32.mrf.mxu2  ;;  %3926 = vmatpush.bf16.msrb.mxu0 %v6006_v29  ;;  %v2875_v29 = vld [vmem:[%s7590_s29] sm:$0x3] }
 0x23e   :  { %v2793_v14 = vadd.f32 %v7463_v43, %v2779_v6 }
 0x241   :  { %3927 = vmatpush.bf16.msrb.mxu0 %v5998_v44 }
 0x245   :  { %v2846_v17 = vpop.f32.mrf.mxu2 }
 0x246   :  { %v2847_v60 = vadd.f32 %v2846_v17, %v2833_v50  ;;  %v6625_v50 = vld [vmem:[#allocation14 + $0x50] sm:$0xff] }
 0x247   :  { %3580 = vmatpush.bf16.msra.mxu1 %v6625_v50  ;;  %v6117_v17 = vld [vmem:[#allocation19 + $0xf0] sm:$0xf]  ;;  %v6077_v50 = vld [vmem:[#allocation19 + $0xa0] sm:$0xf] }
 0x24b   :  { %3581 = vmatpush.bf16.msra.mxu1 %v6624_v27 }
 0x24d   :  { %v7473_v34 = vpop.f32.mrf.mxu2 }
 0x24f   :  { %3582 = vmatpush.bf16.msra.mxu1 %v6623_v56  ;;  %v6061_v56 = vld [vmem:[#allocation19 + $0x80] sm:$0xf] }
 0x251   :  { %v3304_v48 = vpop.f32.mrf.mxu0 }
 0x259   :  { %v3306_v39 = vpop.f32.mrf.mxu0 }
 0x265   :  { %v3332_v57 = vpop.f32.mrf.mxu2 }
 0x266   :  { %v3318_v32 = vpop.f32.mrf.mxu1 }
 0x267   :  { %v3319_v53 = vadd.f32 %v3318_v32, %v3304_v48  ;;  %v6086_v48 = vor.u32 %v6654_v41, %v6085_v40  ;;  %v2865_v32 = vld [vmem:[%s7589_s30] sm:$0x3]  ;;  %v2878_v40 = vperm.slane %v2875_v29, 1 }
 0x268   :  { %v2867_v5 = vperm.slane %v2865_v32, 0 }
 0x269   :  { %v3333_v12 = vadd.f32 %v3332_v57, %v3319_v53  ;;  %v6078_v53 = vor.u32 %v6652_v51, %v6077_v50  ;;  %v5981_v51 = vld [vmem:[#allocation20 + $0x60] sm:$0xf] }
 0x26d   :  { %v3334_v4 = vpop.f32.mrf.mxu2 }
 0x26e   :  { %v3320_v55 = vpop.f32.mrf.mxu1 }
 0x26f   :  { %v3321_v10 = vadd.f32 %v3320_v55, %v3306_v39 }
 0x271   :  { %v3335_v15 = vadd.f32 %v3334_v4, %v3321_v10 }
 0x275   :  { %v7465_v33 = vpop.f32.mrf.mxu3 }
 0x276   :  { %v2805_v58 = vadd.f32 %v7465_v33, %v2791_v36  ;;  %v6062_v33 = vor.u32 %v6648_v1, %v6061_v56  ;;  %v5957_v56 = vld [vmem:[#allocation20 + $0x30] sm:$0xf]  ;;  %v6670_v1 = vld [vmem:[#allocation20 + $0x34] sm:$0xf0] }
 0x278   :  { %v2871_v39 = vmul.f32 %v2867_v5, %v2805_v58  ;;  %v6674_v58 = vld [vmem:[#allocation20 + $0x54] sm:$0xf0] }
 0x27a   :  { %v3360_v27 = vpop.f32.mrf.mxu0 }
 0x27d   :  { %v7467_v21 = vpop.f32.mrf.mxu3  ;;  %v3388_v55 = vpop.f32.mrf.mxu2 }
 0x27e   :  { %v2807_v31 = vadd.f32 %v7467_v21, %v2793_v14  ;;  %v2877_v21 = vperm.slane %v2875_v29, 0  ;;  %v6672_v29 = vld [vmem:[#allocation20 + $0x44] sm:$0xf0] }
 0x281   :  { %v3374_v43 = vpop.f32.mrf.mxu1 }
 0x282   :  { %v3375_v28 = vadd.f32 %v3374_v43, %v3360_v27 }
 0x285   :  { %v2860_v35 = vpop.f32.mrf.mxu3 }
 0x286   :  { %v7475_v37 = vadd.f32 %v2860_v35, %v2847_v60  ;;  %v6662_v60 = vld [vmem:[#allocation19 + $0xf4] sm:$0xf0] }
 0x287   :  { %v6118_v47 = vor.u32 %v6662_v60, %v6117_v17  ;;  %v2881_v17 = vadd.f32 %v2877_v21, %v2871_v39  ;;  %v3389_v60 = vadd.f32 %v3388_v55, %v3375_v28  ;;  %v5967_v39 = vld [vmem:[#allocation20 + $0x48] sm:$0xf0]  ;;  %v6669_v28 = vld [vmem:[#allocation20 + $0x34] sm:$0xf] }
 0x289   :  { %3934 = vmatpush.bf16.msrb.mxu1 %v6118_v47  ;;  %v2885_v10 = vmax.f32 %v2881_v17, 0.0  ;;  %v5949_v17 = vld [vmem:[#allocation20 + $0x20] sm:$0xf] }
 0x28d   :  { %v7477_v52 = vpop.f32.mrf.mxu3  ;;  %3935 = vmatpush.bf16.msrb.mxu1 %v6110_v11 }
 0x291   :  { %3936 = vmatpush.bf16.msrb.mxu1 %v6102_v20 }
 0x295   :  { %v3346_v0 = vpop.f32.mrf.mxu3  ;;  %3937 = vmatpush.bf16.msrb.mxu1 %v6094_v30 }
 0x296   :  { %v3347_v61 = vadd.f32 %v3346_v0, %v3333_v12  ;;  %v2873_v12 = vmul.f32 %v2867_v5, %v2807_v31  ;;  %v3362_v0 = vpop.f32.mrf.mxu0  ;;  %v6675_v31 = vld [vmem:[#allocation20 + $0x64] sm:$0xf]  ;;  %v6673_v5 = vld [vmem:[#allocation20 + $0x54] sm:$0xf] }
 0x298   :  { %v3413_v3 = vmul.f32 %v3409_v63, %v3347_v61  ;;  %v2883_v44 = vadd.f32 %v2877_v21, %v2873_v12  ;;  %v3376_v61 = vpop.f32.mrf.mxu1  ;;  %v5978_v12 = vor.u32 %v6673_v5, %v5975_v62  ;;  %v5966_v21 = vor.u32 %v6672_v29, %v5965_v18  ;;  %v6087_v5 = vld [vmem:[#allocation19 + $0xb8] sm:$0xf0]  ;;  %v6635_v62 = vld [vmem:[#allocation19 + $0x24] sm:$0xf]  ;;  %v6015_v18 = vld [vmem:[#allocation19 + $0x28] sm:$0xf0] }
 0x299   :  { %3938 = vmatpush.bf16.msrb.mxu1 %v6086_v48  ;;  %v3377_v4 = vadd.f32 %v3376_v61, %v3362_v0  ;;  %v5951_v61 = vld [vmem:[#allocation20 + $0x28] sm:$0xf0]  ;;  %v6651_v29 = vld [vmem:[#allocation19 + $0xa4] sm:$0xf] }
 0x29a   :  { %v3423_v23 = vadd.f32 %v3419_v13, %v3413_v3  ;;  %v2887_v47 = vmax.f32 %v2883_v44, 0.0  ;;  %v3390_v3 = vpop.f32.mrf.mxu2  ;;  %v5958_v44 = vor.u32 %v6670_v1, %v5957_v56  ;;  %v6649_v56 = vld [vmem:[#allocation19 + $0x94] sm:$0xf] }
 0x29c   :  { %v3427_v35 = vmax.f32 %v3423_v23, 0.0  ;;  %v7506_v11 = vpack.c.bf16 %v2887_v47, %v2885_v10  ;;  %v6667_v47 = vld [vmem:[#allocation20 + $0x24] sm:$0xf] }
 0x29d   :  { %v3348_v22 = vpop.f32.mrf.mxu3  ;;  %3939 = vmatpush.bf16.msrb.mxu1 %v6078_v53  ;;  %v5973_v53 = vld [vmem:[#allocation20 + $0x50] sm:$0xf]  ;;  %v5954_v10 = vor.u32 %v6667_v47, %v5951_v61 }
 0x29e   :  { %v3349_v24 = vadd.f32 %v3348_v22, %v3335_v15  ;;  %v5974_v43 = vor.u32 %v6674_v58, %v5973_v53  ;;  %v6653_v53 = vld [vmem:[#allocation19 + $0xb4] sm:$0xf] }
 0x2a0   :  { %v3415_v49 = vmul.f32 %v3409_v63, %v3349_v24  ;;  %v2835_v24 = vadd.f32 %v7471_v38, %v7469_v26  ;;  %v5989_v26 = vld [vmem:[#allocation20 + $0x70] sm:$0xf]  ;;  %v6678_v38 = vld [vmem:[#allocation20 + $0x74] sm:$0xf0] }
 0x2a1   :  { %3940 = vmatpush.bf16.msrb.mxu1 %v6070_v59  ;;  %v5990_v50 = vor.u32 %v6678_v38, %v5989_v26  ;;  %v6671_v59 = vld [vmem:[#allocation20 + $0x44] sm:$0xf]  ;;  %v6657_v26 = vld [vmem:[#allocation19 + $0xd4] sm:$0xf] }
 0x2a2   :  { %v3425_v9 = vadd.f32 %v3419_v13, %v3415_v49  ;;  %v3391_v13 = vadd.f32 %v3390_v3, %v3377_v4  ;;  %v2849_v45 = vadd.f32 %v7473_v34, %v2835_v24  ;;  %v6677_v34 = vld [vmem:[#allocation20 + $0x74] sm:$0xf]  ;;  %v5970_v55 = vor.u32 %v6671_v59, %v5967_v39  ;;  %v5941_v4 = vld [vmem:[#allocation20 + $0x10] sm:$0xf]  ;;  %v6079_v59 = vld [vmem:[#allocation19 + $0xa8] sm:$0xf0] }
 0x2a3   :  { %3732 = vmatpush.bf16.msra.mxu2 %v5990_v50  ;;  %v6645_v24 = vld [vmem:[#allocation19 + $0x74] sm:$0xf]  ;;  %v6082_v39 = vor.u32 %v6651_v29, %v6079_v59 }
 0x2a4   :  { %v3429_v46 = vmax.f32 %v3425_v9, 0.0  ;;  %v2863_v30 = vadd.f32 %v7477_v52, %v2849_v45  ;;  %v5991_v52 = vld [vmem:[#allocation20 + $0x78] sm:$0xf0] }
 0x2a5   :  { %3941 = vmatpush.bf16.msrb.mxu1 %v6062_v33  ;;  %v5994_v36 = vor.u32 %v6677_v34, %v5991_v52  ;;  %v5959_v33 = vld [vmem:[#allocation20 + $0x38] sm:$0xf0]  ;;  %v6639_v52 = vld [vmem:[#allocation19 + $0x44] sm:$0xf] }
 0x2a6   :  { %v3431_v57 = vpack.c.bf16 %v3429_v46, %v3427_v35  ;;  %v2868_v35 = vperm.slane %v2865_v32, 1  ;;  %v6676_v32 = vld [vmem:[#allocation20 + $0x64] sm:$0xf0]  ;;  %v5962_v0 = vor.u32 %v6669_v28, %v5959_v33  ;;  %v6055_v45 = vld [vmem:[#allocation19 + $0x78] sm:$0xf0] }
 0x2a7   :  { %3746 = vmatpush.bf16.msra.mxu3 %v5994_v36  ;;  %v6103_v34 = vld [vmem:[#allocation19 + $0xd8] sm:$0xf0] }
 0x2a8   :  { %3569 = vmatmul.bf16.vlgmr.msra.gmra.mxu0 %v3431_v57  ;;  %v2874_v9 = vmul.f32 %v2868_v35, %v2863_v30  ;;  %v2872_v2 = vmul.f32 %v2868_v35, %v7475_v37  ;;  %v5983_v57 = vld [vmem:[#allocation20 + $0x68] sm:$0xf0]  ;;  %v5982_v37 = vor.u32 %v6676_v32, %v5981_v51  ;;  %v6058_v30 = vor.u32 %v6645_v24, %v6055_v45  ;;  %v6643_v35 = vld [vmem:[#allocation19 + $0x64] sm:$0xf]  ;;  %v6071_v28 = vld [vmem:[#allocation19 + $0x98] sm:$0xf0] }
 0x2a9   :  { %v5986_v27 = vor.u32 %v6675_v31, %v5983_v57  ;;  %v6106_v50 = vor.u32 %v6657_v26, %v6103_v34  ;;  %v6031_v51 = vld [vmem:[#allocation19 + $0x48] sm:$0xf0]  ;;  %v6655_v32 = vld [vmem:[#allocation19 + $0xc4] sm:$0xf]  ;;  %v6074_v33 = vor.u32 %v6649_v56, %v6071_v28 }
 0x2aa   :  { %v2884_v41 = vadd.f32 %v2878_v40, %v2874_v9  ;;  %v2882_v42 = vadd.f32 %v2878_v40, %v2872_v2  ;;  %3733 = vmatpush.bf16.msra.mxu2 %v5982_v37  ;;  %v6047_v9 = vld [vmem:[#allocation19 + $0x68] sm:$0xf0]  ;;  %v6659_v2 = vld [vmem:[#allocation19 + $0xe4] sm:$0xf]  ;;  %v6034_v36 = vor.u32 %v6639_v52, %v6031_v51  ;;  %v6637_v37 = vld [vmem:[#allocation19 + $0x34] sm:$0xf] }
 0x2ab   :  { %3747 = vmatpush.bf16.msra.mxu3 %v5986_v27  ;;  %v6050_v40 = vor.u32 %v6643_v35, %v6047_v9  ;;  %v6095_v31 = vld [vmem:[#allocation19 + $0xc8] sm:$0xf0]  ;;  %v6023_v27 = vld [vmem:[#allocation19 + $0x38] sm:$0xf0]  ;;  %v6681_v9 = vld [vmem:[#allocation22 + $0x10] sm:$0xff] }
 0x2ac   :  { %v2888_v14 = vmax.f32 %v2884_v41, 0.0  ;;  %v2886_v46 = vmax.f32 %v2882_v42, 0.0  ;;  %v6111_v41 = vld [vmem:[#allocation19 + $0xe8] sm:$0xf0]  ;;  %v6098_v57 = vor.u32 %v6655_v32, %v6095_v31  ;;  %v6026_v58 = vor.u32 %v6637_v37, %v6023_v27  ;;  %v6694_v35 = vld [vmem:[#allocation22 + $0x78] sm:$0xff]  ;;  %v6687_v52 = vld [vmem:[#allocation22 + $0x40] sm:$0xff] }
 0x2ad   :  { %v6114_v42 = vor.u32 %v6659_v2, %v6111_v41  ;;  %v6693_v2 = vld [vmem:[#allocation22 + $0x70] sm:$0xff]  ;;  %v6692_v41 = vld [vmem:[#allocation22 + $0x68] sm:$0xff] }
 0x2ae   :  { %v7515_v48 = vpack.c.bf16 %v2888_v14, %v2886_v46  ;;  %3734 = vmatpush.bf16.msra.mxu2 %v5974_v43  ;;  %v6641_v14 = vld [vmem:[#allocation19 + $0x54] sm:$0xf]  ;;  %v6039_v46 = vld [vmem:[#allocation19 + $0x58] sm:$0xf0]  ;;  %v6090_v43 = vor.u32 %v6653_v53, %v6087_v5 }
 0x2af   :  { %3748 = vmatpush.bf16.msra.mxu3 %v5978_v12  ;;  %v6042_v38 = vor.u32 %v6641_v14, %v6039_v46  ;;  %v6018_v12 = vor.u32 %v6635_v62, %v6015_v18  ;;  %v6691_v14 = vld [vmem:[#allocation22 + $0x60] sm:$0xff]  ;;  %v6688_v46 = vld [vmem:[#allocation22 + $0x48] sm:$0xff]  ;;  %v3976_v32 = vld [vmem:[%s7557_s16] sm:$0x3] }
 0x2b0   :  { %v3978_v31 = vperm.slane %v3976_v32, 0 }
 0x2b2   :  { %3735 = vmatpush.bf16.msra.mxu2 %v5966_v21  ;;  %v6633_v21 = vld [vmem:[#allocation19 + $0x14] sm:$0xf] }
 0x2b3   :  { %3749 = vmatpush.bf16.msra.mxu3 %v5970_v55  ;;  %v6007_v55 = vld [vmem:[#allocation19 + $0x18] sm:$0xf0] }
 0x2b4   :  { %v6010_v1 = vor.u32 %v6633_v21, %v6007_v55 }
 0x2b5   :  { %v3402_v63 = vpop.f32.mrf.mxu3 }
 0x2b6   :  { %v3403_v7 = vadd.f32 %v3402_v63, %v3389_v60  ;;  %v6668_v60 = vld [vmem:[#allocation20 + $0x24] sm:$0xf0]  ;;  %3736 = vmatpush.bf16.msra.mxu2 %v5958_v44  ;;  %v6631_v44 = vld [vmem:[#allocation19 + $0x4] sm:$0xf] }
 0x2b7   :  { %v5950_v63 = vor.u32 %v6668_v60, %v5949_v17  ;;  %3750 = vmatpush.bf16.msra.mxu3 %v5962_v0  ;;  %v5999_v17 = vld [vmem:[#allocation19 + $0x8] sm:$0xf0]  ;;  %v6647_v60 = vld [vmem:[#allocation19 + $0x84] sm:$0xf] }
 0x2b8   :  { %3928 = vmatmul.bf16.vlgmr.msrb.gmra.mxu0 %v7506_v11  ;;  %v3414_v15 = vmul.f32 %v3410_v8, %v3403_v7  ;;  %v6666_v7 = vld [vmem:[#allocation20 + $0x14] sm:$0xf0]  ;;  %v6063_v0 = vld [vmem:[#allocation19 + $0x88] sm:$0xf0]  ;;  %v6002_v47 = vor.u32 %v6631_v44, %v5999_v17 }
 0x2b9   :  { %v5942_v3 = vor.u32 %v6666_v7, %v5941_v4  ;;  %v6066_v61 = vor.u32 %v6647_v60, %v6063_v0  ;;  %v6726_v7 = vld [vmem:[#allocation16] ss:$0 sm:$0xff] }
 0x2ba   :  { %v3424_v22 = vadd.f32 %v3420_v16, %v3414_v15  ;;  %3737 = vmatpush.bf16.msra.mxu2 %v5950_v63 }
 0x2bb   :  { %3751 = vmatpush.bf16.msra.mxu3 %v5954_v10 }
 0x2bc   :  { %v3428_v54 = vmax.f32 %v3424_v22, 0.0 }
 0x2bd   :  { %v3404_v19 = vpop.f32.mrf.mxu3 }
 0x2be   :  { %v3405_v20 = vadd.f32 %v3404_v19, %v3391_v13  ;;  %v5943_v13 = vld [vmem:[#allocation20 + $0x18] sm:$0xf0]  ;;  %3738 = vmatpush.bf16.msra.mxu2 %v5942_v3  ;;  %v6664_v19 = vld [vmem:[#allocation20 + $0x4] sm:$0xf0]  ;;  %v6685_v3 = vld [vmem:[#allocation22 + $0x30] sm:$0xff] }
 0x2c0   :  { %v3416_v23 = vmul.f32 %v3410_v8, %v3405_v20  ;;  %v6665_v8 = vld [vmem:[#allocation20 + $0x14] sm:$0xf]  ;;  %v6663_v20 = vld [vmem:[#allocation20 + $0x4] sm:$0xf] }
 0x2c1   :  { %v5946_v15 = vor.u32 %v6665_v8, %v5943_v13  ;;  %v6686_v8 = vld [vmem:[#allocation22 + $0x38] sm:$0xff] }
 0x2c2   :  { %v3426_v25 = vadd.f32 %v3420_v16, %v3416_v23  ;;  %v5933_v16 = vld [vmem:[#allocation20] sm:$0xf]  ;;  %v5935_v23 = vld [vmem:[#allocation20 + $0x8] sm:$0xf0]  ;;  %4130 = vmatpush.bf16.msra.mxu0 %v6686_v8 }
 0x2c3   :  { %3752 = vmatpush.bf16.msra.mxu3 %v5946_v15  ;;  %v5934_v22 = vor.u32 %v6664_v19, %v5933_v16  ;;  %v6727_v15 = vld [vmem:[#allocation17] ss:$0 sm:$0xff] }
 0x2c4   :  { %v3430_v49 = vmax.f32 %v3426_v25, 0.0  ;;  %v5938_v25 = vor.u32 %v6663_v20, %v5935_v23 }
 0x2c5   :  { %3739 = vmatpush.bf16.msra.mxu2 %v5934_v22  ;;  %v6684_v22 = vld [vmem:[#allocation22 + $0x28] sm:$0xff] }
 0x2c6   :  { %v3432_v6 = vpack.c.bf16 %v3430_v49, %v3428_v54  ;;  %v6661_v54 = vld [vmem:[#allocation19 + $0xf4] sm:$0xf]  ;;  %v6119_v49 = vld [vmem:[#allocation19 + $0xf8] sm:$0xf0]  ;;  %4131 = vmatpush.bf16.msra.mxu0 %v6685_v3 }
 0x2c7   :  { %3753 = vmatpush.bf16.msra.mxu3 %v5938_v25 }
 0x2c8   :  { %3583 = vmatmul.bf16.vlgmr.msra.gmra.mxu1 %v3432_v6  ;;  %v6122_v6 = vor.u32 %v6661_v54, %v6119_v49 }
 0x2c9   :  { %3948 = vmatpush.bf16.msrb.mxu2 %v6058_v30  ;;  %v6683_v30 = vld [vmem:[#allocation22 + $0x20] sm:$0xff]  ;;  %4144 = vmatpush.bf16.msra.mxu1 %v6694_v35  ;;  %v6729_v35 = vld [vmem:[%s7591_s24] ss:$0 sm:$0xff] }
 0x2ca   :  { %4132 = vmatpush.bf16.msra.mxu0 %v6684_v22  ;;  %v6698_v22 = vld [vmem:[#allocation23 + $0x18] sm:$0xff] }
 0x2cb   :  { %3962 = vmatpush.bf16.msrb.mxu3 %v6122_v6  ;;  %v6682_v6 = vld [vmem:[#allocation22 + $0x18] sm:$0xff] }
 0x2cd   :  { %3949 = vmatpush.bf16.msrb.mxu2 %v6050_v40  ;;  %4145 = vmatpush.bf16.msra.mxu1 %v6693_v2  ;;  %v6680_v40 = vld [vmem:[#allocation22 + $0x8] sm:$0xff] }
 0x2ce   :  { %4133 = vmatpush.bf16.msra.mxu0 %v6683_v30  ;;  %v6728_v30 = vld [vmem:[%s7560_s19] ss:$0 sm:$0xff]  ;;  %s7131_s19 = smov [#allocation25]  }
 0x2cf   :  { %3963 = vmatpush.bf16.msrb.mxu3 %v6114_v42  ;;  %v6679_v42 = vld [vmem:[#allocation22] sm:$0xff]  ;;  %s4261_s14 = sshll.u32 %s7131_s19, 4  ;;  %s4262_s14 = int_to_ptr.vmem [resolvable:$true] %s4261_s14 }
 0x2d1   :  { %3950 = vmatpush.bf16.msrb.mxu2 %v6042_v38  ;;  %4146 = vmatpush.bf16.msra.mxu1 %v6692_v41 }
 0x2d2   :  { %4134 = vmatpush.bf16.msra.mxu0 %v6682_v6 }
 0x2d3   :  { %3964 = vmatpush.bf16.msrb.mxu3 %v6106_v50 }
 0x2d5   :  { %3951 = vmatpush.bf16.msrb.mxu2 %v6034_v36  ;;  %4147 = vmatpush.bf16.msra.mxu1 %v6691_v14 }
 0x2d6   :  { %4135 = vmatpush.bf16.msra.mxu0 %v6681_v9 }
 0x2d7   :  { %3965 = vmatpush.bf16.msrb.mxu3 %v6098_v57  ;;  %v3986_v57 = vld [vmem:[%s7558_s17] sm:$0x3] }
 0x2d8   :  { %3942 = vmatmul.bf16.vlgmr.msrb.gmra.mxu1 %v7515_v48  ;;  %v3988_v5 = vperm.slane %v3986_v57, 0  ;;  %v3989_v0 = vperm.slane %v3986_v57, 1 }
 0x2d9   :  { %3952 = vmatpush.bf16.msrb.mxu2 %v6026_v58 }
 0x2da   :  { %4136 = vmatpush.bf16.msra.mxu0 %v6680_v40 }
 0x2db   :  { %3966 = vmatpush.bf16.msrb.mxu3 %v6090_v43 }
 0x2dd   :  { %3953 = vmatpush.bf16.msrb.mxu2 %v6018_v12 }
 0x2de   :  { %4137 = vmatpush.bf16.msra.mxu0 %v6679_v42 }
 0x2df   :  { %3967 = vmatpush.bf16.msrb.mxu3 %v6082_v39 }
 0x2e1   :  { %3954 = vmatpush.bf16.msrb.mxu2 %v6010_v1 }
 0x2e3   :  { %3968 = vmatpush.bf16.msrb.mxu3 %v6074_v33  ;;  %v3979_v33 = vperm.slane %v3976_v32, 1 }
 0x2e5   :  { %3955 = vmatpush.bf16.msrb.mxu2 %v6002_v47 }
 0x2e7   :  { %3969 = vmatpush.bf16.msrb.mxu3 %v6066_v61 }
 0x325   :  { %v3570_v63 = vpop.f32.mrf.mxu0 }
 0x32d   :  { %v3572_v16 = vpop.f32.mrf.mxu0 }
 0x335   :  { %v3929_v26 = vpop.f32.mrf.mxu0 }
 0x33d   :  { %v3931_v37 = vpop.f32.mrf.mxu0 }
 0x345   :  { %v3584_v10 = vpop.f32.mrf.mxu1 }
 0x346   :  { %v3585_v4 = vadd.f32 %v3584_v10, %v3570_v63 }
 0x348   :  { %v3593_v13 = vmul.f32 %v6726_v7, %v3585_v4 }
 0x34a   :  { %v3599_v23 = vadd.f32 %v6727_v15, %v3593_v13 }
 0x34c   :  { %v3601_v45 = vmax.f32 %v3599_v23, 0.0  ;;  %v6697_v23 = vld [vmem:[#allocation23 + $0x10] sm:$0xff] }
 0x34d   :  { %v3586_v19 = vpop.f32.mrf.mxu1 }
 0x34e   :  { %v3587_v20 = vadd.f32 %v3586_v19, %v3572_v16  ;;  %v6701_v16 = vld [vmem:[#allocation23 + $0x30] sm:$0xff]  ;;  %v6700_v19 = vld [vmem:[#allocation23 + $0x28] sm:$0xff] }
 0x350   :  { %v3594_v24 = vmul.f32 %v6726_v7, %v3587_v20  ;;  %v6699_v20 = vld [vmem:[#allocation23 + $0x20] sm:$0xff] }
 0x352   :  { %v3600_v25 = vadd.f32 %v6727_v15, %v3594_v24  ;;  %v6702_v15 = vld [vmem:[#allocation23 + $0x38] sm:$0xff]  ;;  %v6696_v24 = vld [vmem:[#allocation23 + $0x8] sm:$0xff] }
 0x354   :  { %v3602_v54 = vmax.f32 %v3600_v25, 0.0  ;;  %v6695_v25 = vld [vmem:[#allocation23] sm:$0xff] }
 0x355   :  { %v3943_v38 = vpop.f32.mrf.mxu1 }
 0x356   :  { %v3603_v49 = vpack.c.bf16 %v3602_v54, %v3601_v45 }
 0x358   :  { %3740 = vmatmul.bf16.vlgmr.msra.gmra.mxu2 %v3603_v49  ;;  %3754 = vmatmul.bf16.vlgmr.msra.gmra.mxu3 %v3603_v49 }
 0x359   :  { %4241 = vmatpush.bf16.msra.mxu2 %v6702_v15 }
 0x35d   :  { %v3945_v62 = vpop.f32.mrf.mxu1  ;;  %4242 = vmatpush.bf16.msra.mxu2 %v6701_v16 }
 0x361   :  { %4243 = vmatpush.bf16.msra.mxu2 %v6700_v19 }
 0x365   :  { %4244 = vmatpush.bf16.msra.mxu2 %v6699_v20 }
 0x368   :  { %3956 = vmatmul.bf16.vlgmr.msrb.gmra.mxu2 %v7506_v11  ;;  %3970 = vmatmul.bf16.vlgmr.msrb.gmra.mxu3 %v7515_v48  ;;  %v6690_v11 = vld [vmem:[#allocation22 + $0x58] sm:$0xff]  ;;  %v6689_v48 = vld [vmem:[#allocation22 + $0x50] sm:$0xff] }
 0x369   :  { %4148 = vmatpush.bf16.msra.mxu1 %v6690_v11  ;;  %4245 = vmatpush.bf16.msra.mxu2 %v6698_v22 }
 0x36d   :  { %4149 = vmatpush.bf16.msra.mxu1 %v6689_v48  ;;  %4246 = vmatpush.bf16.msra.mxu2 %v6697_v23 }
 0x371   :  { %4150 = vmatpush.bf16.msra.mxu1 %v6688_v46  ;;  %4247 = vmatpush.bf16.msra.mxu2 %v6696_v24 }
 0x375   :  { %4151 = vmatpush.bf16.msra.mxu1 %v6687_v52  ;;  %4248 = vmatpush.bf16.msra.mxu2 %v6695_v25 }
 0x3db   :  { %v3741_v34 = vpop.f32.mrf.mxu2  ;;  %v3755_v50 = vpop.f32.mrf.mxu3 }
 0x3dc   :  { %v3930_v51 = vadd.f32 %v3929_v26, %v3741_v34  ;;  %v6730_v26 = vld [vmem:[%s7592_s13] ss:$0 sm:$0xff] }
 0x3de   :  { %v3944_v36 = vadd.f32 %v3943_v38, %v3930_v51 }
 0x3e0   :  { %v3982_v58 = vmul.f32 %v3978_v31, %v3944_v36 }
 0x3e2   :  { %v3992_v29 = vadd.f32 %v3988_v5, %v3982_v58 }
 0x3e3   :  { %v3743_v27 = vpop.f32.mrf.mxu2  ;;  %v3757_v53 = vpop.f32.mrf.mxu3 }
 0x3e4   :  { %v3932_v43 = vadd.f32 %v3931_v37, %v3743_v27  ;;  %v3996_v55 = vmax.f32 %v3992_v29, 0.0 }
 0x3e6   :  { %v3946_v18 = vadd.f32 %v3945_v62, %v3932_v43 }
 0x3e8   :  { %v3984_v12 = vmul.f32 %v3978_v31, %v3946_v18 }
 0x3ea   :  { %v3994_v59 = vadd.f32 %v3988_v5, %v3984_v12 }
 0x3eb   :  { %v3957_v39 = vpop.f32.mrf.mxu2  ;;  %v3971_v21 = vpop.f32.mrf.mxu3 }
 0x3ec   :  { %v3998_v56 = vmax.f32 %v3994_v59, 0.0  ;;  %v3958_v1 = vadd.f32 %v3957_v39, %v3755_v50 }
 0x3ee   :  { %v4000_v28 = vpack.c.bf16 %v3998_v56, %v3996_v55  ;;  %v3972_v44 = vadd.f32 %v3971_v21, %v3958_v1 }
 0x3f0   :  { %4138 = vmatmul.bf16.vlgmr.msra.gmra.mxu0 %v4000_v28  ;;  %v3983_v60 = vmul.f32 %v3979_v33, %v3972_v44 }
 0x3f2   :  { %v3993_v10 = vadd.f32 %v3989_v0, %v3983_v60 }
 0x3f3   :  { %v3959_v17 = vpop.f32.mrf.mxu2  ;;  %v3973_v61 = vpop.f32.mrf.mxu3 }
 0x3f4   :  { %v3960_v47 = vadd.f32 %v3959_v17, %v3757_v53  ;;  %v3997_v8 = vmax.f32 %v3993_v10, 0.0 }
 0x3f6   :  { %v3974_v63 = vadd.f32 %v3973_v61, %v3960_v47 }
 0x3f8   :  { %v3985_v4 = vmul.f32 %v3979_v33, %v3974_v63 }
 0x3fa   :  { %v3995_v7 = vadd.f32 %v3989_v0, %v3985_v4 }
 0x3fc   :  { %v3999_v3 = vmax.f32 %v3995_v7, 0.0 }
 0x3fe   :  { %v4001_v13 = vpack.c.bf16 %v3999_v3, %v3997_v8 }
 0x400   :  { %4152 = vmatmul.bf16.vlgmr.msra.gmra.mxu1 %v4001_v13 }
 0x46d   :  { %v4139_v45 = vpop.f32.mrf.mxu0 }
 0x475   :  { %v4141_v9 = vpop.f32.mrf.mxu0 }
 0x47d   :  { %v4153_v54 = vpop.f32.mrf.mxu1 }
 0x47e   :  { %v4154_v49 = vadd.f32 %v4153_v54, %v4139_v45 }
 0x480   :  { %v4162_v6 = vmul.f32 %v6728_v30, %v4154_v49 }
 0x482   :  { %v4168_v41 = vadd.f32 %v6729_v35, %v4162_v6 }
 0x484   :  { %v4170_v11 = vmax.f32 %v4168_v41, 0.0 }
 0x485   :  { %v4155_v2 = vpop.f32.mrf.mxu1 }
 0x486   :  { %v4156_v40 = vadd.f32 %v4155_v2, %v4141_v9 }
 0x488   :  { %v4163_v42 = vmul.f32 %v6728_v30, %v4156_v40 }
 0x48a   :  { %v4169_v14 = vadd.f32 %v6729_v35, %v4163_v42 }
 0x48c   :  { %v4171_v48 = vmax.f32 %v4169_v14, 0.0 }
 0x48e   :  { %v4172_v46 = vpack.c.bf16 %v4171_v48, %v4170_v11 }
 0x490   :  { %4249 = vmatmul.bf16.vlgmr.msra.gmra.mxu2 %v4172_v46 }
 0x513   :  { %v4250_v38 = vpop.f32.mrf.mxu2 }
 0x514   :  { %v4251_v34 = vadd.f32 %v6730_v26, %v4250_v38 }
 0x516   :  { %4255 = vst [vmem:[#allocation25] sm:$0xff] %v4251_v34 }
 0x51b   :  { %v4252_v50 = vpop.f32.mrf.mxu2 }
 0x51c   :  { %v4253_v52 = vadd.f32 %v6730_v26, %v4252_v50 }
 0x51e   :  { %4256 = vst [vmem:[#allocation25 + $0x8] sm:$0xff] %v4253_v52 }
 0x51f   :  { %4269 = dma.vmem_to_hbm [thread:$0]  %s4262_s14, 256, %s4264_s6, [#allocation4], %s7114_s22, %s7114_s22, %s7115_s20  }
 0x520   :  { %7107 = dma.done.wait [#allocation4], 256  }
 0x521   :  { %7108 = vsyncadd [#allocation4], 4294967040 }
 0x522   :  { %4274 = vsyncpa [#allocation3], 1 }
 0x523   :  { %4275 = vsyncpa [#allocation6], 1 }
 0x524   :  { %4276 = vsyncpa [#allocation9], 1 }
 0x525   :  { %4277 = vsyncpa [#allocation12], 1 }
 0x526   :  { %4278 = vsyncpa [#allocation15], 1 }
 0x527   :  { %4279 = vsyncpa [#allocation18], 1 }
 0x528   :  { %4280 = vsyncpa [#allocation21], 1 }
 0x529   :  { %4281 = vsyncpa [#allocation24], 1 }
 0x52a   :  { %4282 = vsyncpa [#allocation4], 1 }

</bundles_post_ra>
